<compile_context>
chip_gen: v7x
topology: tpu7x:2x2x1
jax: 0.10.0
libtpu: 0.0.40
codegen_flags: <defaults>
</compile_context>

<pallas_src>
import functools
from types import SimpleNamespace

import jax
import jax.numpy as jnp
import numpy as np
from jax.experimental import pallas as pl
from jax.experimental.pallas import tpu as pltpu


# ----------------------------------------------------------------------------
# Shape / layout bookkeeping
# ----------------------------------------------------------------------------
def _conv_dims(H, W):
    h1, w1 = (H - 8) // 4 + 1, (W - 8) // 4 + 1      # conv1: k=8, s=4
    h2, w2 = (h1 - 4) // 2 + 1, (w1 - 4) // 2 + 1    # conv2: k=4, s=2
    h3, w3 = h2 - 2, w2 - 2                          # conv3: k=3, s=1
    return h1, w1, h2, w2, h3, w3


def build_cfg(batch, obs_size):
    """Static layout config shared by the wrapper and the kernel."""
    H, W, C = obs_size
    h1, w1, h2, w2, h3, w3 = _conv_dims(H, W)
    assert h3 >= 1 and w3 >= 1, "input too small for the conv stack"

    # Parity-grouped row layout of the conv1 output:
    #   rows ordered by (a=ho%2, b=wo%2), then (n, p=ho//2, q=wo//2).
    P = {0: (h1 + 1) // 2, 1: h1 // 2}
    Q = {0: (w1 + 1) // 2, 1: w1 // 2}
    offs, n_idx, h_idx, w_idx = {}, [], [], []
    cur = 0
    for a in (0, 1):
        for b in (0, 1):
            offs[(a, b)] = cur
            for n in range(batch):
                for p in range(P[a]):
                    for q in range(Q[b]):
                        n_idx.append(n)
                        h_idx.append(2 * p + a)
                        w_idx.append(2 * q + b)
            cur += batch * P[a] * Q[b]
    assert cur == batch * h1 * w1

    return SimpleNamespace(
        batch=batch, C=C, H=H, W=W,
        h1=h1, w1=w1, h2=h2, w2=w2, h3=h3, w3=w3,
        P=P, Q=Q, offs=offs, r1=cur,
        row_n=np.array(n_idx, np.int32),
        row_h=np.array(h_idx, np.int32),
        row_w=np.array(w_idx, np.int32),
    )


# ----------------------------------------------------------------------------
# Fused whole-network kernel (single invocation, no grid, everything in VMEM)
# ----------------------------------------------------------------------------
def _critic_kernel(p1_ref, w1_ref, b1_ref, w2_ref, b2_ref, w3_ref, b3_ref,
                   fw1_ref, fb1_ref, fw2_ref, fb2_ref,
                   o_ref,
                   a1_ref, a2_ref, a3_ref, ls2_ref, ls3_ref, *, cfg):
    f32 = jnp.float32
    N, H2, W2, H3, W3 = cfg.batch, cfg.h2, cfg.w2, cfg.h3, cfg.w3

    # ---- conv1 (k=8, s=4): one MXU matmul over pre-extracted patches -------
    # p1 rows are already parity-grouped; 1/256 scaling is folded into w1.
    a1_ref[...] = jnp.maximum(
        jnp.dot(p1_ref[...], w1_ref[...], preferred_element_type=f32)
        + b1_ref[...], 0.0)

    # ---- conv2 (k=4, s=2) via parity decomposition --------------------------
    # For kernel tap (i, j) with i = 2u+a, j = 2v+b, the patch pixel is
    # a1_img[n, 2(ho+u)+a, 2(wo+v)+b], i.e. a CONTIGUOUS row slice of a1 within
    # parity class (a, b).  Assemble the im2col operand in ls2, one matmul/tap.
    acc2 = jnp.zeros((N * H2 * W2, 64), f32)
    for i in range(4):
        u, a = divmod(i, 2)
        for j in range(4):
            v, b = divmod(j, 2)
            base, Pa, Qb = cfg.offs[(a, b)], cfg.P[a], cfg.Q[b]
            r = 0
            for n in range(N):
                for ho in range(H2):
                    src = base + (n * Pa + ho + u) * Qb + v
                    ls2_ref[r:r + W2, :] = a1_ref[src:src + W2, :]
                    r += W2
            w_tap = w2_ref[(i * 4 + j) * 32:(i * 4 + j) * 32 + 32, :]
            acc2 = acc2 + jnp.dot(ls2_ref[...], w_tap,
                                  preferred_element_type=f32)
    a2_ref[...] = jnp.maximum(acc2 + b2_ref[...], 0.0)   # rows: (n, ho, wo)

    # ---- conv3 (k=3, s=1): contiguous slices of a2 --------------------------
    acc3 = jnp.zeros((N * H3 * W3, 64), f32)
    for i in range(3):
        for j in range(3):
            r = 0
            for n in range(N):
                for ho in range(H3):
                    src = (n * H2 + ho + i) * W2 + j
                    ls3_ref[r:r + W3, :] = a2_ref[src:src + W3, :]
                    r += W3
            w_tap = w3_ref[(i * 3 + j) * 64:(i * 3 + j) * 64 + 64, :]
            acc3 = acc3 + jnp.dot(ls3_ref[...], w_tap,
                                  preferred_element_type=f32)
    a3_ref[...] = jnp.maximum(acc3 + b3_ref[...], 0.0)   # rows: (n, ho, wo)

    # ---- fc1 (64*H3*W3 -> 512, ReLU) + fc2 (512 -> 1), per sample -----------
    npos = H3 * W3
    for n in range(N):
        acc = jnp.zeros((1, 512), f32)
        for pos in range(npos):
            row = a3_ref[n * npos + pos:n * npos + pos + 1, :]        # (1, 64)
            acc = acc + jnp.dot(row, fw1_ref[pos * 64:(pos + 1) * 64, :],
                                preferred_element_type=f32)
        hvec = jnp.maximum(acc + fb1_ref[...], 0.0)                   # (1, 512)
        o_ref[n:n + 1, :] = (
            jnp.dot(hvec, fw2_ref[...], preferred_element_type=f32)
            + fb2_ref[...]).astype(o_ref.dtype)


# ----------------------------------------------------------------------------
# Parameter init (torch-convention layouts) and one-time kernel-layout prep
# ----------------------------------------------------------------------------
def init_params(key, obs_size):
    H, W, C = obs_size                   # torch: obs = (C, H, W)
    _, _, _, _, h3, w3 = _conv_dims(H, W)
    conv_out = 64 * h3 * w3
    ks = jax.random.split(key, 10)

    def u(k, shape, fan_in):
        bnd = 1.0 / np.sqrt(fan_in)
        return jax.random.uniform(k, shape, jnp.float32, -bnd, bnd)

    return {
        "c1_w": u(ks[0], (32, C, 8, 8), C * 64), "c1_b": u(ks[1], (32,), C * 64),
        "c2_w": u(ks[2], (64, 32, 4, 4), 32 * 16), "c2_b": u(ks[3], (64,), 32 * 16),
        "c3_w": u(ks[4], (64, 64, 3, 3), 64 * 9), "c3_b": u(ks[5], (64,), 64 * 9),
        "fc1_w": u(ks[6], (512, conv_out), conv_out),
        "fc1_b": u(ks[7], (512,), conv_out),
        "fc2_w": u(ks[8], (1, 512), 512), "fc2_b": u(ks[9], (1,), 512),
    }


def prepare_params(params, cfg):
    """Torch-layout weights -> kernel (channels-last, tap-major) layout."""
    C, H3, W3 = cfg.C, cfg.h3, cfg.w3
    # conv1: rows ordered (c, i, j); fold the x/256 input scaling in.
    w1 = params["c1_w"].reshape(32, C * 64).T / 256.0            # (C*64, 32)
    # conv2/conv3: per-tap (cin, cout) blocks stacked row-wise, tap-major.
    w2 = params["c2_w"].transpose(2, 3, 1, 0).reshape(16 * 32, 64)
    w3 = params["c3_w"].transpose(2, 3, 1, 0).reshape(9 * 64, 64)
    # fc1: rows ordered (pos = ho*W3+wo, c) to match the kernel's NHWC flatten.
    fw1 = (params["fc1_w"].reshape(512, 64, H3, W3)
           .transpose(2, 3, 1, 0).reshape(H3 * W3 * 64, 512))
    fw2 = params["fc2_w"].T                                      # (512, 1)
    return {
        "w1": w1, "b1": params["c1_b"].reshape(1, -1),
        "w2": w2, "b2": params["c2_b"].reshape(1, -1),
        "w3": w3, "b3": params["c3_b"].reshape(1, -1),
        "fw1": fw1, "fb1": params["fc1_b"].reshape(1, -1),
        "fw2": fw2, "fb2": params["fc2_b"].reshape(1, -1),
    }


# ----------------------------------------------------------------------------
# Forward pass builder
# ----------------------------------------------------------------------------
def make_critic_forward(cfg):
    kernel = functools.partial(_critic_kernel, cfg=cfg)
    vmem_spec = pl.BlockSpec(memory_space=pltpu.MemorySpace.VMEM)

    call = pl.pallas_call(
        kernel,
        out_shape=jax.ShapeDtypeStruct((cfg.batch, 1), jnp.float32),
        in_specs=[vmem_spec] * 11,
        out_specs=vmem_spec,
        scratch_shapes=[
            pltpu.VMEM((cfg.r1, 32), jnp.float32),                     # a1
            pltpu.VMEM((cfg.batch * cfg.h2 * cfg.w2, 64), jnp.float32),  # a2
            pltpu.VMEM((cfg.batch * cfg.h3 * cfg.w3, 64), jnp.float32),  # a3
            pltpu.VMEM((cfg.batch * cfg.h2 * cfg.w2, 32), jnp.float32),  # ls2
            pltpu.VMEM((cfg.batch * cfg.h3 * cfg.w3, 64), jnp.float32),  # ls3
        ],
    )

    # conv1 patch-extraction indices (numpy constants, baked into the jit).
    k8 = np.arange(8, dtype=np.int32)
    nn = cfg.row_n[:, None, None]
    hh = cfg.row_h[:, None, None] * 4 + k8[None, :, None]
    ww = cfg.row_w[:, None, None] * 4 + k8[None, None, :]

    @jax.jit
    def forward(prep, x):
        # x: (N, C, H, W).  Build the conv1 im2col matrix with rows already in
        # the parity-grouped order the kernel expects, columns = (c, i, j).
        xh = x.astype(jnp.float32).transpose(0, 2, 3, 1)          # NHWC
        p = xh[nn, hh, ww, :]                                     # (R1, 8, 8, C)
        p1 = p.transpose(0, 3, 1, 2).reshape(cfg.r1, cfg.C * 64)  # (R1, C*64)
        return call(p1,
                    prep["w1"], prep["b1"], prep["w2"], prep["b2"],
                    prep["w3"], prep["b3"], prep["fw1"], prep["fb1"],
                    prep["fw2"], prep["fb2"])

    return forward


# ----------------------------------------------------------------------------
# Pure-JAX reference (lax.conv on torch-layout params) for the sanity check
# ----------------------------------------------------------------------------
def reference_forward(params, x):
    y = x.astype(jnp.float32) / 256.0
    for wn, bn, s in (("c1_w", "c1_b", 4), ("c2_w", "c2_b", 2),
                      ("c3_w", "c3_b", 1)):
        y = jax.lax.conv_general_dilated(
            y, params[wn], (s, s), "VALID",
            dimension_numbers=("NCHW", "OIHW", "NCHW"))
        y = jax.nn.relu(y + params[bn].reshape(1, -1, 1, 1))
    flat = y.reshape(y.shape[0], -1)                      # NCHW flatten
    h = jax.nn.relu(flat @ params["fc1_w"].T + params["fc1_b"])
    return h @ params["fc2_w"].T + params["fc2_b"]


if __name__ == "__main__":
    # obs_size = (H, W, C) as in the torch module; minimal size that keeps the
    # full 3-conv stack valid.
    obs_size = (48, 48, 4)
    batch = 2
    H, W, C = obs_size

    key = jax.random.PRNGKey(0)
    kp, kx = jax.random.split(key)

    cfg = build_cfg(batch, obs_size)
    params = init_params(kp, obs_size)
    prep = prepare_params(params, cfg)
    forward = make_critic_forward(cfg)

    # Pixel-like input (torch does x.float()/256).
    x = jax.random.randint(kx, (batch, C, H, W), 0, 256).astype(jnp.float32)

    out = jax.block_until_ready(forward(prep, x))
    assert out.shape == (batch, 1), out.shape

    ref = reference_forward(params, x)
    np.testing.assert_allclose(np.asarray(out), np.asarray(ref),
                               rtol=1e-3, atol=1e-3)

    print("KERNEL_OK")
</pallas_src>

<mosaic_0001>
module attributes {stable_mosaic.version = 11 : i64} {
  func.func @_critic_kernel(%arg0: memref<242x256xf32, #tpu.memory_space<vmem>>, %arg1: memref<256x32xf32, #tpu.memory_space<vmem>>, %arg2: memref<1x32xf32, #tpu.memory_space<vmem>>, %arg3: memref<512x64xf32, #tpu.memory_space<vmem>>, %arg4: memref<1x64xf32, #tpu.memory_space<vmem>>, %arg5: memref<576x64xf32, #tpu.memory_space<vmem>>, %arg6: memref<1x64xf32, #tpu.memory_space<vmem>>, %arg7: memref<256x512xf32, #tpu.memory_space<vmem>>, %arg8: memref<1x512xf32, #tpu.memory_space<vmem>>, %arg9: memref<512x1xf32, #tpu.memory_space<vmem>>, %arg10: memref<1x1xf32, #tpu.memory_space<vmem>>, %arg11: memref<2x1xf32, #tpu.memory_space<vmem>>, %arg12: memref<242x32xf32, #tpu.memory_space<vmem>>, %arg13: memref<32x64xf32, #tpu.memory_space<vmem>>, %arg14: memref<8x64xf32, #tpu.memory_space<vmem>>, %arg15: memref<32x32xf32, #tpu.memory_space<vmem>>, %arg16: memref<8x64xf32, #tpu.memory_space<vmem>>) attributes {dimension_semantics = [], scalar_prefetch = 0 : i64, scratch_operands = 5 : i64, tpu.core_type = #tpu.core_type<tc>} {
    %c0 = arith.constant 0 : index
    %c0_0 = arith.constant 0 : index
    %0 = vector.load %arg0[%c0, %c0_0] : memref<242x256xf32, #tpu.memory_space<vmem>>, vector<242x256xf32>
    %c0_1 = arith.constant 0 : index
    %c0_2 = arith.constant 0 : index
    %1 = vector.load %arg1[%c0_1, %c0_2] : memref<256x32xf32, #tpu.memory_space<vmem>>, vector<256x32xf32>
    %cst = arith.constant dense<0.000000e+00> : vector<242x32xf32>
    %2 = tpu.matmul %0, %1, %cst {dimension_numbers = #tpu.dot_dimension_numbers<[1], [0], [0], [1], [0, 0, 1, 1], [], []>} : vector<242x256xf32>, vector<256x32xf32>, vector<242x32xf32> -> vector<242x32xf32>
    %c0_3 = arith.constant 0 : index
    %c0_4 = arith.constant 0 : index
    %3 = vector.load %arg2[%c0_3, %c0_4] : memref<1x32xf32, #tpu.memory_space<vmem>>, vector<1x32xf32>
    %4 = vector.broadcast %3 : vector<1x32xf32> to vector<242x32xf32>
    %5 = arith.addf %2, %4 : vector<242x32xf32>
    %cst_5 = arith.constant 0.000000e+00 : f32
    %6 = vector.broadcast %cst_5 : f32 to vector<242x32xf32>
    %7 = arith.maximumf %5, %6 : vector<242x32xf32>
    %c0_6 = arith.constant 0 : index
    %c0_7 = arith.constant 0 : index
    %8 = vector.load %arg12[%c0_6, %c0_7] : memref<242x32xf32, #tpu.memory_space<vmem>>, vector<242x32xf32>
    tpu.vector_store %arg12[%c0_6, %c0_7], %7 {strides = array<i32>} : memref<242x32xf32, #tpu.memory_space<vmem>>, vector<242x32xf32>,
    %cst_8 = arith.constant 0.000000e+00 : f32
    %9 = vector.broadcast %cst_8 : f32 to vector<32x64xf32>
    %c0_9 = arith.constant 0 : index
    %c0_10 = arith.constant 0 : index
    %10 = vector.load %arg12[%c0_9, %c0_10] : memref<242x32xf32, #tpu.memory_space<vmem>>, vector<4x32xf32>
    %c0_11 = arith.constant 0 : index
    %c0_12 = arith.constant 0 : index
    %11 = vector.load %arg15[%c0_11, %c0_12] : memref<32x32xf32, #tpu.memory_space<vmem>>, vector<4x32xf32>
    tpu.vector_store %arg15[%c0_11, %c0_12], %10 {strides = array<i32>} : memref<32x32xf32, #tpu.memory_space<vmem>>, vector<4x32xf32>,
    %c6 = arith.constant 6 : index
    %c0_13 = arith.constant 0 : index
    %12 = vector.load %arg12[%c6, %c0_13] : memref<242x32xf32, #tpu.memory_space<vmem>>, vector<4x32xf32>
    %c4 = arith.constant 4 : index
    %c0_14 = arith.constant 0 : index
    %13 = vector.load %arg15[%c4, %c0_14] : memref<32x32xf32, #tpu.memory_space<vmem>>, vector<4x32xf32>
    tpu.vector_store %arg15[%c4, %c0_14], %12 {strides = array<i32>} : memref<32x32xf32, #tpu.memory_space<vmem>>, vector<4x32xf32>,
    %c12 = arith.constant 12 : index
    %c0_15 = arith.constant 0 : index
    %14 = vector.load %arg12[%c12, %c0_15] : memref<242x32xf32, #tpu.memory_space<vmem>>, vector<4x32xf32>
    %c8 = arith.constant 8 : index
    %c0_16 = arith.constant 0 : index
    %15 = vector.load %arg15[%c8, %c0_16] : memref<32x32xf32, #tpu.memory_space<vmem>>, vector<4x32xf32>
    tpu.vector_store %arg15[%c8, %c0_16], %14 {strides = array<i32>} : memref<32x32xf32, #tpu.memory_space<vmem>>, vector<4x32xf32>,
    %c18 = arith.constant 18 : index
    %c0_17 = arith.constant 0 : index
    %16 = vector.load %arg12[%c18, %c0_17] : memref<242x32xf32, #tpu.memory_space<vmem>>, vector<4x32xf32>
    %c12_18 = arith.constant 12 : index
    %c0_19 = arith.constant 0 : index
    %17 = vector.load %arg15[%c12_18, %c0_19] : memref<32x32xf32, #tpu.memory_space<vmem>>, vector<4x32xf32>
    tpu.vector_store %arg15[%c12_18, %c0_19], %16 {strides = array<i32>} : memref<32x32xf32, #tpu.memory_space<vmem>>, vector<4x32xf32>,
    %c36 = arith.constant 36 : index
    %c0_20 = arith.constant 0 : index
    %18 = vector.load %arg12[%c36, %c0_20] : memref<242x32xf32, #tpu.memory_space<vmem>>, vector<4x32xf32>
    %c16 = arith.constant 16 : index
    %c0_21 = arith.constant 0 : index
    %19 = vector.load %arg15[%c16, %c0_21] : memref<32x32xf32, #tpu.memory_space<vmem>>, vector<4x32xf32>
    tpu.vector_store %arg15[%c16, %c0_21], %18 {strides = array<i32>} : memref<32x32xf32, #tpu.memory_space<vmem>>, vector<4x32xf32>,
    %c42 = arith.constant 42 : index
    %c0_22 = arith.constant 0 : index
    %20 = vector.load %arg12[%c42, %c0_22] : memref<242x32xf32, #tpu.memory_space<vmem>>, vector<4x32xf32>
    %c20 = arith.constant 20 : index
    %c0_23 = arith.constant 0 : index
    %21 = vector.load %arg15[%c20, %c0_23] : memref<32x32xf32, #tpu.memory_space<vmem>>, vector<4x32xf32>
    tpu.vector_store %arg15[%c20, %c0_23], %20 {strides = array<i32>} : memref<32x32xf32, #tpu.memory_space<vmem>>, vector<4x32xf32>,
    %c48 = arith.constant 48 : index
    %c0_24 = arith.constant 0 : index
    %22 = vector.load %arg12[%c48, %c0_24] : memref<242x32xf32, #tpu.memory_space<vmem>>, vector<4x32xf32>
    %c24 = arith.constant 24 : index
    %c0_25 = arith.constant 0 : index
    %23 = vector.load %arg15[%c24, %c0_25] : memref<32x32xf32, #tpu.memory_space<vmem>>, vector<4x32xf32>
    tpu.vector_store %arg15[%c24, %c0_25], %22 {strides = array<i32>} : memref<32x32xf32, #tpu.memory_space<vmem>>, vector<4x32xf32>,
    %c54 = arith.constant 54 : index
    %c0_26 = arith.constant 0 : index
    %24 = vector.load %arg12[%c54, %c0_26] : memref<242x32xf32, #tpu.memory_space<vmem>>, vector<4x32xf32>
    %c28 = arith.constant 28 : index
    %c0_27 = arith.constant 0 : index
    %25 = vector.load %arg15[%c28, %c0_27] : memref<32x32xf32, #tpu.memory_space<vmem>>, vector<4x32xf32>
    tpu.vector_store %arg15[%c28, %c0_27], %24 {strides = array<i32>} : memref<32x32xf32, #tpu.memory_space<vmem>>, vector<4x32xf32>,
    %c0_28 = arith.constant 0 : index
    %c0_29 = arith.constant 0 : index
    %26 = vector.load %arg3[%c0_28, %c0_29] : memref<512x64xf32, #tpu.memory_space<vmem>>, vector<32x64xf32>
    %c0_30 = arith.constant 0 : index
    %c0_31 = arith.constant 0 : index
    %27 = vector.load %arg15[%c0_30, %c0_31] : memref<32x32xf32, #tpu.memory_space<vmem>>, vector<32x32xf32>
    %cst_32 = arith.constant dense<0.000000e+00> : vector<32x64xf32>
    %28 = tpu.matmul %27, %26, %cst_32 {dimension_numbers = #tpu.dot_dimension_numbers<[1], [0], [0], [1], [0, 0, 1, 1], [], []>} : vector<32x32xf32>, vector<32x64xf32>, vector<32x64xf32> -> vector<32x64xf32>
    %29 = arith.addf %9, %28 : vector<32x64xf32>
    %c72 = arith.constant 72 : index
    %c0_33 = arith.constant 0 : index
    %30 = vector.load %arg12[%c72, %c0_33] : memref<242x32xf32, #tpu.memory_space<vmem>>, vector<4x32xf32>
    %c0_34 = arith.constant 0 : index
    %c0_35 = arith.constant 0 : index
    %31 = vector.load %arg15[%c0_34, %c0_35] : memref<32x32xf32, #tpu.memory_space<vmem>>, vector<4x32xf32>
    tpu.vector_store %arg15[%c0_34, %c0_35], %30 {strides = array<i32>} : memref<32x32xf32, #tpu.memory_space<vmem>>, vector<4x32xf32>,
    %c77 = arith.constant 77 : index
    %c0_36 = arith.constant 0 : index
    %32 = vector.load %arg12[%c77, %c0_36] : memref<242x32xf32, #tpu.memory_space<vmem>>, vector<4x32xf32>
    %c4_37 = arith.constant 4 : index
    %c0_38 = arith.constant 0 : index
    %33 = vector.load %arg15[%c4_37, %c0_38] : memref<32x32xf32, #tpu.memory_space<vmem>>, vector<4x32xf32>
    tpu.vector_store %arg15[%c4_37, %c0_38], %32 {strides = array<i32>} : memref<32x32xf32, #tpu.memory_space<vmem>>, vector<4x32xf32>,
    %c82 = arith.constant 82 : index
    %c0_39 = arith.constant 0 : index
    %34 = vector.load %arg12[%c82, %c0_39] : memref<242x32xf32, #tpu.memory_space<vmem>>, vector<4x32xf32>
    %c8_40 = arith.constant 8 : index
    %c0_41 = arith.constant 0 : index
    %35 = vector.load %arg15[%c8_40, %c0_41] : memref<32x32xf32, #tpu.memory_space<vmem>>, vector<4x32xf32>
    tpu.vector_store %arg15[%c8_40, %c0_41], %34 {strides = array<i32>} : memref<32x32xf32, #tpu.memory_space<vmem>>, vector<4x32xf32>,
    %c87 = arith.constant 87 : index
    %c0_42 = arith.constant 0 : index
    %36 = vector.load %arg12[%c87, %c0_42] : memref<242x32xf32, #tpu.memory_space<vmem>>, vector<4x32xf32>
    %c12_43 = arith.constant 12 : index
    %c0_44 = arith.constant 0 : index
    %37 = vector.load %arg15[%c12_43, %c0_44] : memref<32x32xf32, #tpu.memory_space<vmem>>, vector<4x32xf32>
    tpu.vector_store %arg15[%c12_43, %c0_44], %36 {strides = array<i32>} : memref<32x32xf32, #tpu.memory_space<vmem>>, vector<4x32xf32>,
    %c102 = arith.constant 102 : index
    %c0_45 = arith.constant 0 : index
    %38 = vector.load %arg12[%c102, %c0_45] : memref<242x32xf32, #tpu.memory_space<vmem>>, vector<4x32xf32>
    %c16_46 = arith.constant 16 : index
    %c0_47 = arith.constant 0 : index
    %39 = vector.load %arg15[%c16_46, %c0_47] : memref<32x32xf32, #tpu.memory_space<vmem>>, vector<4x32xf32>
    tpu.vector_store %arg15[%c16_46, %c0_47], %38 {strides = array<i32>} : memref<32x32xf32, #tpu.memory_space<vmem>>, vector<4x32xf32>,
    %c107 = arith.constant 107 : index
    %c0_48 = arith.constant 0 : index
    %40 = vector.load %arg12[%c107, %c0_48] : memref<242x32xf32, #tpu.memory_space<vmem>>, vector<4x32xf32>
    %c20_49 = arith.constant 20 : index
    %c0_50 = arith.constant 0 : index
    %41 = vector.load %arg15[%c20_49, %c0_50] : memref<32x32xf32, #tpu.memory_space<vmem>>, vector<4x32xf32>
    tpu.vector_store %arg15[%c20_49, %c0_50], %40 {strides = array<i32>} : memref<32x32xf32, #tpu.memory_space<vmem>>, vector<4x32xf32>,
    %c112 = arith.constant 112 : index
    %c0_51 = arith.constant 0 : index
    %42 = vector.load %arg12[%c112, %c0_51] : memref<242x32xf32, #tpu.memory_space<vmem>>, vector<4x32xf32>
    %c24_52 = arith.constant 24 : index
    %c0_53 = arith.constant 0 : index
    %43 = vector.load %arg15[%c24_52, %c0_53] : memref<32x32xf32, #tpu.memory_space<vmem>>, vector<4x32xf32>
    tpu.vector_store %arg15[%c24_52, %c0_53], %42 {strides = array<i32>} : memref<32x32xf32, #tpu.memory_space<vmem>>, vector<4x32xf32>,
    %c117 = arith.constant 117 : index
    %c0_54 = arith.constant 0 : index
    %44 = vector.load %arg12[%c117, %c0_54] : memref<242x32xf32, #tpu.memory_space<vmem>>, vector<4x32xf32>
    %c28_55 = arith.constant 28 : index
    %c0_56 = arith.constant 0 : index
    %45 = vector.load %arg15[%c28_55, %c0_56] : memref<32x32xf32, #tpu.memory_space<vmem>>, vector<4x32xf32>
    tpu.vector_store %arg15[%c28_55, %c0_56], %44 {strides = array<i32>} : memref<32x32xf32, #tpu.memory_space<vmem>>, vector<4x32xf32>,
    %c32 = arith.constant 32 : index
    %c0_57 = arith.constant 0 : index
    %46 = vector.load %arg3[%c32, %c0_57] : memref<512x64xf32, #tpu.memory_space<vmem>>, vector<32x64xf32>
    %c0_58 = arith.constant 0 : index
    %c0_59 = arith.constant 0 : index
    %47 = vector.load %arg15[%c0_58, %c0_59] : memref<32x32xf32, #tpu.memory_space<vmem>>, vector<32x32xf32>
    %cst_60 = arith.constant dense<0.000000e+00> : vector<32x64xf32>
    %48 = tpu.matmul %47, %46, %cst_60 {dimension_numbers = #tpu.dot_dimension_numbers<[1], [0], [0], [1], [0, 0, 1, 1], [], []>} : vector<32x32xf32>, vector<32x64xf32>, vector<32x64xf32> -> vector<32x64xf32>
    %49 = arith.addf %29, %48 : vector<32x64xf32>
    %c1 = arith.constant 1 : index
    %c0_61 = arith.constant 0 : index
    %50 = vector.load %arg12[%c1, %c0_61] : memref<242x32xf32, #tpu.memory_space<vmem>>, vector<4x32xf32>
    %c0_62 = arith.constant 0 : index
    %c0_63 = arith.constant 0 : index
    %51 = vector.load %arg15[%c0_62, %c0_63] : memref<32x32xf32, #tpu.memory_space<vmem>>, vector<4x32xf32>
    tpu.vector_store %arg15[%c0_62, %c0_63], %50 {strides = array<i32>} : memref<32x32xf32, #tpu.memory_space<vmem>>, vector<4x32xf32>,
    %c7 = arith.constant 7 : index
    %c0_64 = arith.constant 0 : index
    %52 = vector.load %arg12[%c7, %c0_64] : memref<242x32xf32, #tpu.memory_space<vmem>>, vector<4x32xf32>
    %c4_65 = arith.constant 4 : index
    %c0_66 = arith.constant 0 : index
    %53 = vector.load %arg15[%c4_65, %c0_66] : memref<32x32xf32, #tpu.memory_space<vmem>>, vector<4x32xf32>
    tpu.vector_store %arg15[%c4_65, %c0_66], %52 {strides = array<i32>} : memref<32x32xf32, #tpu.memory_space<vmem>>, vector<4x32xf32>,
    %c13 = arith.constant 13 : index
    %c0_67 = arith.constant 0 : index
    %54 = vector.load %arg12[%c13, %c0_67] : memref<242x32xf32, #tpu.memory_space<vmem>>, vector<4x32xf32>
    %c8_68 = arith.constant 8 : index
    %c0_69 = arith.constant 0 : index
    %55 = vector.load %arg15[%c8_68, %c0_69] : memref<32x32xf32, #tpu.memory_space<vmem>>, vector<4x32xf32>
    tpu.vector_store %arg15[%c8_68, %c0_69], %54 {strides = array<i32>} : memref<32x32xf32, #tpu.memory_space<vmem>>, vector<4x32xf32>,
    %c19 = arith.constant 19 : index
    %c0_70 = arith.constant 0 : index
    %56 = vector.load %arg12[%c19, %c0_70] : memref<242x32xf32, #tpu.memory_space<vmem>>, vector<4x32xf32>
    %c12_71 = arith.constant 12 : index
    %c0_72 = arith.constant 0 : index
    %57 = vector.load %arg15[%c12_71, %c0_72] : memref<32x32xf32, #tpu.memory_space<vmem>>, vector<4x32xf32>
    tpu.vector_store %arg15[%c12_71, %c0_72], %56 {strides = array<i32>} : memref<32x32xf32, #tpu.memory_space<vmem>>, vector<4x32xf32>,
    %c37 = arith.constant 37 : index
    %c0_73 = arith.constant 0 : index
    %58 = vector.load %arg12[%c37, %c0_73] : memref<242x32xf32, #tpu.memory_space<vmem>>, vector<4x32xf32>
    %c16_74 = arith.constant 16 : index
    %c0_75 = arith.constant 0 : index
    %59 = vector.load %arg15[%c16_74, %c0_75] : memref<32x32xf32, #tpu.memory_space<vmem>>, vector<4x32xf32>
    tpu.vector_store %arg15[%c16_74, %c0_75], %58 {strides = array<i32>} : memref<32x32xf32, #tpu.memory_space<vmem>>, vector<4x32xf32>,
    %c43 = arith.constant 43 : index
    %c0_76 = arith.constant 0 : index
    %60 = vector.load %arg12[%c43, %c0_76] : memref<242x32xf32, #tpu.memory_space<vmem>>, vector<4x32xf32>
    %c20_77 = arith.constant 20 : index
    %c0_78 = arith.constant 0 : index
    %61 = vector.load %arg15[%c20_77, %c0_78] : memref<32x32xf32, #tpu.memory_space<vmem>>, vector<4x32xf32>
    tpu.vector_store %arg15[%c20_77, %c0_78], %60 {strides = array<i32>} : memref<32x32xf32, #tpu.memory_space<vmem>>, vector<4x32xf32>,
    %c49 = arith.constant 49 : index
    %c0_79 = arith.constant 0 : index
    %62 = vector.load %arg12[%c49, %c0_79] : memref<242x32xf32, #tpu.memory_space<vmem>>, vector<4x32xf32>
    %c24_80 = arith.constant 24 : index
    %c0_81 = arith.constant 0 : index
    %63 = vector.load %arg15[%c24_80, %c0_81] : memref<32x32xf32, #tpu.memory_space<vmem>>, vector<4x32xf32>
    tpu.vector_store %arg15[%c24_80, %c0_81], %62 {strides = array<i32>} : memref<32x32xf32, #tpu.memory_space<vmem>>, vector<4x32xf32>,
    %c55 = arith.constant 55 : index
    %c0_82 = arith.constant 0 : index
    %64 = vector.load %arg12[%c55, %c0_82] : memref<242x32xf32, #tpu.memory_space<vmem>>, vector<4x32xf32>
    %c28_83 = arith.constant 28 : index
    %c0_84 = arith.constant 0 : index
    %65 = vector.load %arg15[%c28_83, %c0_84] : memref<32x32xf32, #tpu.memory_space<vmem>>, vector<4x32xf32>
    tpu.vector_store %arg15[%c28_83, %c0_84], %64 {strides = array<i32>} : memref<32x32xf32, #tpu.memory_space<vmem>>, vector<4x32xf32>,
    %c64 = arith.constant 64 : index
    %c0_85 = arith.constant 0 : index
    %66 = vector.load %arg3[%c64, %c0_85] : memref<512x64xf32, #tpu.memory_space<vmem>>, vector<32x64xf32>
    %c0_86 = arith.constant 0 : index
    %c0_87 = arith.constant 0 : index
    %67 = vector.load %arg15[%c0_86, %c0_87] : memref<32x32xf32, #tpu.memory_space<vmem>>, vector<32x32xf32>
    %cst_88 = arith.constant dense<0.000000e+00> : vector<32x64xf32>
    %68 = tpu.matmul %67, %66, %cst_88 {dimension_numbers = #tpu.dot_dimension_numbers<[1], [0], [0], [1], [0, 0, 1, 1], [], []>} : vector<32x32xf32>, vector<32x64xf32>, vector<32x64xf32> -> vector<32x64xf32>
    %69 = arith.addf %49, %68 : vector<32x64xf32>
    %c73 = arith.constant 73 : index
    %c0_89 = arith.constant 0 : index
    %70 = vector.load %arg12[%c73, %c0_89] : memref<242x32xf32, #tpu.memory_space<vmem>>, vector<4x32xf32>
    %c0_90 = arith.constant 0 : index
    %c0_91 = arith.constant 0 : index
    %71 = vector.load %arg15[%c0_90, %c0_91] : memref<32x32xf32, #tpu.memory_space<vmem>>, vector<4x32xf32>
    tpu.vector_store %arg15[%c0_90, %c0_91], %70 {strides = array<i32>} : memref<32x32xf32, #tpu.memory_space<vmem>>, vector<4x32xf32>,
    %c78 = arith.constant 78 : index
    %c0_92 = arith.constant 0 : index
    %72 = vector.load %arg12[%c78, %c0_92] : memref<242x32xf32, #tpu.memory_space<vmem>>, vector<4x32xf32>
    %c4_93 = arith.constant 4 : index
    %c0_94 = arith.constant 0 : index
    %73 = vector.load %arg15[%c4_93, %c0_94] : memref<32x32xf32, #tpu.memory_space<vmem>>, vector<4x32xf32>
    tpu.vector_store %arg15[%c4_93, %c0_94], %72 {strides = array<i32>} : memref<32x32xf32, #tpu.memory_space<vmem>>, vector<4x32xf32>,
    %c83 = arith.constant 83 : index
    %c0_95 = arith.constant 0 : index
    %74 = vector.load %arg12[%c83, %c0_95] : memref<242x32xf32, #tpu.memory_space<vmem>>, vector<4x32xf32>
    %c8_96 = arith.constant 8 : index
    %c0_97 = arith.constant 0 : index
    %75 = vector.load %arg15[%c8_96, %c0_97] : memref<32x32xf32, #tpu.memory_space<vmem>>, vector<4x32xf32>
    tpu.vector_store %arg15[%c8_96, %c0_97], %74 {strides = array<i32>} : memref<32x32xf32, #tpu.memory_space<vmem>>, vector<4x32xf32>,
    %c88 = arith.constant 88 : index
    %c0_98 = arith.constant 0 : index
    %76 = vector.load %arg12[%c88, %c0_98] : memref<242x32xf32, #tpu.memory_space<vmem>>, vector<4x32xf32>
    %c12_99 = arith.constant 12 : index
    %c0_100 = arith.constant 0 : index
    %77 = vector.load %arg15[%c12_99, %c0_100] : memref<32x32xf32, #tpu.memory_space<vmem>>, vector<4x32xf32>
    tpu.vector_store %arg15[%c12_99, %c0_100], %76 {strides = array<i32>} : memref<32x32xf32, #tpu.memory_space<vmem>>, vector<4x32xf32>,
    %c103 = arith.constant 103 : index
    %c0_101 = arith.constant 0 : index
    %78 = vector.load %arg12[%c103, %c0_101] : memref<242x32xf32, #tpu.memory_space<vmem>>, vector<4x32xf32>
    %c16_102 = arith.constant 16 : index
    %c0_103 = arith.constant 0 : index
    %79 = vector.load %arg15[%c16_102, %c0_103] : memref<32x32xf32, #tpu.memory_space<vmem>>, vector<4x32xf32>
    tpu.vector_store %arg15[%c16_102, %c0_103], %78 {strides = array<i32>} : memref<32x32xf32, #tpu.memory_space<vmem>>, vector<4x32xf32>,
    %c108 = arith.constant 108 : index
    %c0_104 = arith.constant 0 : index
    %80 = vector.load %arg12[%c108, %c0_104] : memref<242x32xf32, #tpu.memory_space<vmem>>, vector<4x32xf32>
    %c20_105 = arith.constant 20 : index
    %c0_106 = arith.constant 0 : index
    %81 = vector.load %arg15[%c20_105, %c0_106] : memref<32x32xf32, #tpu.memory_space<vmem>>, vector<4x32xf32>
    tpu.vector_store %arg15[%c20_105, %c0_106], %80 {strides = array<i32>} : memref<32x32xf32, #tpu.memory_space<vmem>>, vector<4x32xf32>,
    %c113 = arith.constant 113 : index
    %c0_107 = arith.constant 0 : index
    %82 = vector.load %arg12[%c113, %c0_107] : memref<242x32xf32, #tpu.memory_space<vmem>>, vector<4x32xf32>
    %c24_108 = arith.constant 24 : index
    %c0_109 = arith.constant 0 : index
    %83 = vector.load %arg15[%c24_108, %c0_109] : memref<32x32xf32, #tpu.memory_space<vmem>>, vector<4x32xf32>
    tpu.vector_store %arg15[%c24_108, %c0_109], %82 {strides = array<i32>} : memref<32x32xf32, #tpu.memory_space<vmem>>, vector<4x32xf32>,
    %c118 = arith.constant 118 : index
    %c0_110 = arith.constant 0 : index
    %84 = vector.load %arg12[%c118, %c0_110] : memref<242x32xf32, #tpu.memory_space<vmem>>, vector<4x32xf32>
    %c28_111 = arith.constant 28 : index
    %c0_112 = arith.constant 0 : index
    %85 = vector.load %arg15[%c28_111, %c0_112] : memref<32x32xf32, #tpu.memory_space<vmem>>, vector<4x32xf32>
    tpu.vector_store %arg15[%c28_111, %c0_112], %84 {strides = array<i32>} : memref<32x32xf32, #tpu.memory_space<vmem>>, vector<4x32xf32>,
    %c96 = arith.constant 96 : index
    %c0_113 = arith.constant 0 : index
    %86 = vector.load %arg3[%c96, %c0_113] : memref<512x64xf32, #tpu.memory_space<vmem>>, vector<32x64xf32>
    %c0_114 = arith.constant 0 : index
    %c0_115 = arith.constant 0 : index
    %87 = vector.load %arg15[%c0_114, %c0_115] : memref<32x32xf32, #tpu.memory_space<vmem>>, vector<32x32xf32>
    %cst_116 = arith.constant dense<0.000000e+00> : vector<32x64xf32>
    %88 = tpu.matmul %87, %86, %cst_116 {dimension_numbers = #tpu.dot_dimension_numbers<[1], [0], [0], [1], [0, 0, 1, 1], [], []>} : vector<32x32xf32>, vector<32x64xf32>, vector<32x64xf32> -> vector<32x64xf32>
    %89 = arith.addf %69, %88 : vector<32x64xf32>
    %c132 = arith.constant 132 : index
    %c0_117 = arith.constant 0 : index
    %90 = vector.load %arg12[%c132, %c0_117] : memref<242x32xf32, #tpu.memory_space<vmem>>, vector<4x32xf32>
    %c0_118 = arith.constant 0 : index
    %c0_119 = arith.constant 0 : index
    %91 = vector.load %arg15[%c0_118, %c0_119] : memref<32x32xf32, #tpu.memory_space<vmem>>, vector<4x32xf32>
    tpu.vector_store %arg15[%c0_118, %c0_119], %90 {strides = array<i32>} : memref<32x32xf32, #tpu.memory_space<vmem>>, vector<4x32xf32>,
    %c138 = arith.constant 138 : index
    %c0_120 = arith.constant 0 : index
    %92 = vector.load %arg12[%c138, %c0_120] : memref<242x32xf32, #tpu.memory_space<vmem>>, vector<4x32xf32>
    %c4_121 = arith.constant 4 : index
    %c0_122 = arith.constant 0 : index
    %93 = vector.load %arg15[%c4_121, %c0_122] : memref<32x32xf32, #tpu.memory_space<vmem>>, vector<4x32xf32>
    tpu.vector_store %arg15[%c4_121, %c0_122], %92 {strides = array<i32>} : memref<32x32xf32, #tpu.memory_space<vmem>>, vector<4x32xf32>,
    %c144 = arith.constant 144 : index
    %c0_123 = arith.constant 0 : index
    %94 = vector.load %arg12[%c144, %c0_123] : memref<242x32xf32, #tpu.memory_space<vmem>>, vector<4x32xf32>
    %c8_124 = arith.constant 8 : index
    %c0_125 = arith.constant 0 : index
    %95 = vector.load %arg15[%c8_124, %c0_125] : memref<32x32xf32, #tpu.memory_space<vmem>>, vector<4x32xf32>
    tpu.vector_store %arg15[%c8_124, %c0_125], %94 {strides = array<i32>} : memref<32x32xf32, #tpu.memory_space<vmem>>, vector<4x32xf32>,
    %c150 = arith.constant 150 : index
    %c0_126 = arith.constant 0 : index
    %96 = vector.load %arg12[%c150, %c0_126] : memref<242x32xf32, #tpu.memory_space<vmem>>, vector<4x32xf32>
    %c12_127 = arith.constant 12 : index
    %c0_128 = arith.constant 0 : index
    %97 = vector.load %arg15[%c12_127, %c0_128] : memref<32x32xf32, #tpu.memory_space<vmem>>, vector<4x32xf32>
    tpu.vector_store %arg15[%c12_127, %c0_128], %96 {strides = array<i32>} : memref<32x32xf32, #tpu.memory_space<vmem>>, vector<4x32xf32>,
    %c162 = arith.constant 162 : index
    %c0_129 = arith.constant 0 : index
    %98 = vector.load %arg12[%c162, %c0_129] : memref<242x32xf32, #tpu.memory_space<vmem>>, vector<4x32xf32>
    %c16_130 = arith.constant 16 : index
    %c0_131 = arith.constant 0 : index
    %99 = vector.load %arg15[%c16_130, %c0_131] : memref<32x32xf32, #tpu.memory_space<vmem>>, vector<4x32xf32>
    tpu.vector_store %arg15[%c16_130, %c0_131], %98 {strides = array<i32>} : memref<32x32xf32, #tpu.memory_space<vmem>>, vector<4x32xf32>,
    %c168 = arith.constant 168 : index
    %c0_132 = arith.constant 0 : index
    %100 = vector.load %arg12[%c168, %c0_132] : memref<242x32xf32, #tpu.memory_space<vmem>>, vector<4x32xf32>
    %c20_133 = arith.constant 20 : index
    %c0_134 = arith.constant 0 : index
    %101 = vector.load %arg15[%c20_133, %c0_134] : memref<32x32xf32, #tpu.memory_space<vmem>>, vector<4x32xf32>
    tpu.vector_store %arg15[%c20_133, %c0_134], %100 {strides = array<i32>} : memref<32x32xf32, #tpu.memory_space<vmem>>, vector<4x32xf32>,
    %c174 = arith.constant 174 : index
    %c0_135 = arith.constant 0 : index
    %102 = vector.load %arg12[%c174, %c0_135] : memref<242x32xf32, #tpu.memory_space<vmem>>, vector<4x32xf32>
    %c24_136 = arith.constant 24 : index
    %c0_137 = arith.constant 0 : index
    %103 = vector.load %arg15[%c24_136, %c0_137] : memref<32x32xf32, #tpu.memory_space<vmem>>, vector<4x32xf32>
    tpu.vector_store %arg15[%c24_136, %c0_137], %102 {strides = array<i32>} : memref<32x32xf32, #tpu.memory_space<vmem>>, vector<4x32xf32>,
    %c180 = arith.constant 180 : index
    %c0_138 = arith.constant 0 : index
    %104 = vector.load %arg12[%c180, %c0_138] : memref<242x32xf32, #tpu.memory_space<vmem>>, vector<4x32xf32>
    %c28_139 = arith.constant 28 : index
    %c0_140 = arith.constant 0 : index
    %105 = vector.load %arg15[%c28_139, %c0_140] : memref<32x32xf32, #tpu.memory_space<vmem>>, vector<4x32xf32>
    tpu.vector_store %arg15[%c28_139, %c0_140], %104 {strides = array<i32>} : memref<32x32xf32, #tpu.memory_space<vmem>>, vector<4x32xf32>,
    %c128 = arith.constant 128 : index
    %c0_141 = arith.constant 0 : index
    %106 = vector.load %arg3[%c128, %c0_141] : memref<512x64xf32, #tpu.memory_space<vmem>>, vector<32x64xf32>
    %c0_142 = arith.constant 0 : index
    %c0_143 = arith.constant 0 : index
    %107 = vector.load %arg15[%c0_142, %c0_143] : memref<32x32xf32, #tpu.memory_space<vmem>>, vector<32x32xf32>
    %cst_144 = arith.constant dense<0.000000e+00> : vector<32x64xf32>
    %108 = tpu.matmul %107, %106, %cst_144 {dimension_numbers = #tpu.dot_dimension_numbers<[1], [0], [0], [1], [0, 0, 1, 1], [], []>} : vector<32x32xf32>, vector<32x64xf32>, vector<32x64xf32> -> vector<32x64xf32>
    %109 = arith.addf %89, %108 : vector<32x64xf32>
    %c192 = arith.constant 192 : index
    %c0_145 = arith.constant 0 : index
    %110 = vector.load %arg12[%c192, %c0_145] : memref<242x32xf32, #tpu.memory_space<vmem>>, vector<4x32xf32>
    %c0_146 = arith.constant 0 : index
    %c0_147 = arith.constant 0 : index
    %111 = vector.load %arg15[%c0_146, %c0_147] : memref<32x32xf32, #tpu.memory_space<vmem>>, vector<4x32xf32>
    tpu.vector_store %arg15[%c0_146, %c0_147], %110 {strides = array<i32>} : memref<32x32xf32, #tpu.memory_space<vmem>>, vector<4x32xf32>,
    %c197 = arith.constant 197 : index
    %c0_148 = arith.constant 0 : index
    %112 = vector.load %arg12[%c197, %c0_148] : memref<242x32xf32, #tpu.memory_space<vmem>>, vector<4x32xf32>
    %c4_149 = arith.constant 4 : index
    %c0_150 = arith.constant 0 : index
    %113 = vector.load %arg15[%c4_149, %c0_150] : memref<32x32xf32, #tpu.memory_space<vmem>>, vector<4x32xf32>
    tpu.vector_store %arg15[%c4_149, %c0_150], %112 {strides = array<i32>} : memref<32x32xf32, #tpu.memory_space<vmem>>, vector<4x32xf32>,
    %c202 = arith.constant 202 : index
    %c0_151 = arith.constant 0 : index
    %114 = vector.load %arg12[%c202, %c0_151] : memref<242x32xf32, #tpu.memory_space<vmem>>, vector<4x32xf32>
    %c8_152 = arith.constant 8 : index
    %c0_153 = arith.constant 0 : index
    %115 = vector.load %arg15[%c8_152, %c0_153] : memref<32x32xf32, #tpu.memory_space<vmem>>, vector<4x32xf32>
    tpu.vector_store %arg15[%c8_152, %c0_153], %114 {strides = array<i32>} : memref<32x32xf32, #tpu.memory_space<vmem>>, vector<4x32xf32>,
    %c207 = arith.constant 207 : index
    %c0_154 = arith.constant 0 : index
    %116 = vector.load %arg12[%c207, %c0_154] : memref<242x32xf32, #tpu.memory_space<vmem>>, vector<4x32xf32>
    %c12_155 = arith.constant 12 : index
    %c0_156 = arith.constant 0 : index
    %117 = vector.load %arg15[%c12_155, %c0_156] : memref<32x32xf32, #tpu.memory_space<vmem>>, vector<4x32xf32>
    tpu.vector_store %arg15[%c12_155, %c0_156], %116 {strides = array<i32>} : memref<32x32xf32, #tpu.memory_space<vmem>>, vector<4x32xf32>,
    %c217 = arith.constant 217 : index
    %c0_157 = arith.constant 0 : index
    %118 = vector.load %arg12[%c217, %c0_157] : memref<242x32xf32, #tpu.memory_space<vmem>>, vector<4x32xf32>
    %c16_158 = arith.constant 16 : index
    %c0_159 = arith.constant 0 : index
    %119 = vector.load %arg15[%c16_158, %c0_159] : memref<32x32xf32, #tpu.memory_space<vmem>>, vector<4x32xf32>
    tpu.vector_store %arg15[%c16_158, %c0_159], %118 {strides = array<i32>} : memref<32x32xf32, #tpu.memory_space<vmem>>, vector<4x32xf32>,
    %c222 = arith.constant 222 : index
    %c0_160 = arith.constant 0 : index
    %120 = vector.load %arg12[%c222, %c0_160] : memref<242x32xf32, #tpu.memory_space<vmem>>, vector<4x32xf32>
    %c20_161 = arith.constant 20 : index
    %c0_162 = arith.constant 0 : index
    %121 = vector.load %arg15[%c20_161, %c0_162] : memref<32x32xf32, #tpu.memory_space<vmem>>, vector<4x32xf32>
    tpu.vector_store %arg15[%c20_161, %c0_162], %120 {strides = array<i32>} : memref<32x32xf32, #tpu.memory_space<vmem>>, vector<4x32xf32>,
    %c227 = arith.constant 227 : index
    %c0_163 = arith.constant 0 : index
    %122 = vector.load %arg12[%c227, %c0_163] : memref<242x32xf32, #tpu.memory_space<vmem>>, vector<4x32xf32>
    %c24_164 = arith.constant 24 : index
    %c0_165 = arith.constant 0 : index
    %123 = vector.load %arg15[%c24_164, %c0_165] : memref<32x32xf32, #tpu.memory_space<vmem>>, vector<4x32xf32>
    tpu.vector_store %arg15[%c24_164, %c0_165], %122 {strides = array<i32>} : memref<32x32xf32, #tpu.memory_space<vmem>>, vector<4x32xf32>,
    %c232 = arith.constant 232 : index
    %c0_166 = arith.constant 0 : index
    %124 = vector.load %arg12[%c232, %c0_166] : memref<242x32xf32, #tpu.memory_space<vmem>>, vector<4x32xf32>
    %c28_167 = arith.constant 28 : index
    %c0_168 = arith.constant 0 : index
    %125 = vector.load %arg15[%c28_167, %c0_168] : memref<32x32xf32, #tpu.memory_space<vmem>>, vector<4x32xf32>
    tpu.vector_store %arg15[%c28_167, %c0_168], %124 {strides = array<i32>} : memref<32x32xf32, #tpu.memory_space<vmem>>, vector<4x32xf32>,
    %c160 = arith.constant 160 : index
    %c0_169 = arith.constant 0 : index
    %126 = vector.load %arg3[%c160, %c0_169] : memref<512x64xf32, #tpu.memory_space<vmem>>, vector<32x64xf32>
    %c0_170 = arith.constant 0 : index
    %c0_171 = arith.constant 0 : index
    %127 = vector.load %arg15[%c0_170, %c0_171] : memref<32x32xf32, #tpu.memory_space<vmem>>, vector<32x32xf32>
    %cst_172 = arith.constant dense<0.000000e+00> : vector<32x64xf32>
    %128 = tpu.matmul %127, %126, %cst_172 {dimension_numbers = #tpu.dot_dimension_numbers<[1], [0], [0], [1], [0, 0, 1, 1], [], []>} : vector<32x32xf32>, vector<32x64xf32>, vector<32x64xf32> -> vector<32x64xf32>
    %129 = arith.addf %109, %128 : vector<32x64xf32>
    %c133 = arith.constant 133 : index
    %c0_173 = arith.constant 0 : index
    %130 = vector.load %arg12[%c133, %c0_173] : memref<242x32xf32, #tpu.memory_space<vmem>>, vector<4x32xf32>
    %c0_174 = arith.constant 0 : index
    %c0_175 = arith.constant 0 : index
    %131 = vector.load %arg15[%c0_174, %c0_175] : memref<32x32xf32, #tpu.memory_space<vmem>>, vector<4x32xf32>
    tpu.vector_store %arg15[%c0_174, %c0_175], %130 {strides = array<i32>} : memref<32x32xf32, #tpu.memory_space<vmem>>, vector<4x32xf32>,
    %c139 = arith.constant 139 : index
    %c0_176 = arith.constant 0 : index
    %132 = vector.load %arg12[%c139, %c0_176] : memref<242x32xf32, #tpu.memory_space<vmem>>, vector<4x32xf32>
    %c4_177 = arith.constant 4 : index
    %c0_178 = arith.constant 0 : index
    %133 = vector.load %arg15[%c4_177, %c0_178] : memref<32x32xf32, #tpu.memory_space<vmem>>, vector<4x32xf32>
    tpu.vector_store %arg15[%c4_177, %c0_178], %132 {strides = array<i32>} : memref<32x32xf32, #tpu.memory_space<vmem>>, vector<4x32xf32>,
    %c145 = arith.constant 145 : index
    %c0_179 = arith.constant 0 : index
    %134 = vector.load %arg12[%c145, %c0_179] : memref<242x32xf32, #tpu.memory_space<vmem>>, vector<4x32xf32>
    %c8_180 = arith.constant 8 : index
    %c0_181 = arith.constant 0 : index
    %135 = vector.load %arg15[%c8_180, %c0_181] : memref<32x32xf32, #tpu.memory_space<vmem>>, vector<4x32xf32>
    tpu.vector_store %arg15[%c8_180, %c0_181], %134 {strides = array<i32>} : memref<32x32xf32, #tpu.memory_space<vmem>>, vector<4x32xf32>,
    %c151 = arith.constant 151 : index
    %c0_182 = arith.constant 0 : index
    %136 = vector.load %arg12[%c151, %c0_182] : memref<242x32xf32, #tpu.memory_space<vmem>>, vector<4x32xf32>
    %c12_183 = arith.constant 12 : index
    %c0_184 = arith.constant 0 : index
    %137 = vector.load %arg15[%c12_183, %c0_184] : memref<32x32xf32, #tpu.memory_space<vmem>>, vector<4x32xf32>
    tpu.vector_store %arg15[%c12_183, %c0_184], %136 {strides = array<i32>} : memref<32x32xf32, #tpu.memory_space<vmem>>, vector<4x32xf32>,
    %c163 = arith.constant 163 : index
    %c0_185 = arith.constant 0 : index
    %138 = vector.load %arg12[%c163, %c0_185] : memref<242x32xf32, #tpu.memory_space<vmem>>, vector<4x32xf32>
    %c16_186 = arith.constant 16 : index
    %c0_187 = arith.constant 0 : index
    %139 = vector.load %arg15[%c16_186, %c0_187] : memref<32x32xf32, #tpu.memory_space<vmem>>, vector<4x32xf32>
    tpu.vector_store %arg15[%c16_186, %c0_187], %138 {strides = array<i32>} : memref<32x32xf32, #tpu.memory_space<vmem>>, vector<4x32xf32>,
    %c169 = arith.constant 169 : index
    %c0_188 = arith.constant 0 : index
    %140 = vector.load %arg12[%c169, %c0_188] : memref<242x32xf32, #tpu.memory_space<vmem>>, vector<4x32xf32>
    %c20_189 = arith.constant 20 : index
    %c0_190 = arith.constant 0 : index
    %141 = vector.load %arg15[%c20_189, %c0_190] : memref<32x32xf32, #tpu.memory_space<vmem>>, vector<4x32xf32>
    tpu.vector_store %arg15[%c20_189, %c0_190], %140 {strides = array<i32>} : memref<32x32xf32, #tpu.memory_space<vmem>>, vector<4x32xf32>,
    %c175 = arith.constant 175 : index
    %c0_191 = arith.constant 0 : index
    %142 = vector.load %arg12[%c175, %c0_191] : memref<242x32xf32, #tpu.memory_space<vmem>>, vector<4x32xf32>
    %c24_192 = arith.constant 24 : index
    %c0_193 = arith.constant 0 : index
    %143 = vector.load %arg15[%c24_192, %c0_193] : memref<32x32xf32, #tpu.memory_space<vmem>>, vector<4x32xf32>
    tpu.vector_store %arg15[%c24_192, %c0_193], %142 {strides = array<i32>} : memref<32x32xf32, #tpu.memory_space<vmem>>, vector<4x32xf32>,
    %c181 = arith.constant 181 : index
    %c0_194 = arith.constant 0 : index
    %144 = vector.load %arg12[%c181, %c0_194] : memref<242x32xf32, #tpu.memory_space<vmem>>, vector<4x32xf32>
    %c28_195 = arith.constant 28 : index
    %c0_196 = arith.constant 0 : index
    %145 = vector.load %arg15[%c28_195, %c0_196] : memref<32x32xf32, #tpu.memory_space<vmem>>, vector<4x32xf32>
    tpu.vector_store %arg15[%c28_195, %c0_196], %144 {strides = array<i32>} : memref<32x32xf32, #tpu.memory_space<vmem>>, vector<4x32xf32>,
    %c192_197 = arith.constant 192 : index
    %c0_198 = arith.constant 0 : index
    %146 = vector.load %arg3[%c192_197, %c0_198] : memref<512x64xf32, #tpu.memory_space<vmem>>, vector<32x64xf32>
    %c0_199 = arith.constant 0 : index
    %c0_200 = arith.constant 0 : index
    %147 = vector.load %arg15[%c0_199, %c0_200] : memref<32x32xf32, #tpu.memory_space<vmem>>, vector<32x32xf32>
    %cst_201 = arith.constant dense<0.000000e+00> : vector<32x64xf32>
    %148 = tpu.matmul %147, %146, %cst_201 {dimension_numbers = #tpu.dot_dimension_numbers<[1], [0], [0], [1], [0, 0, 1, 1], [], []>} : vector<32x32xf32>, vector<32x64xf32>, vector<32x64xf32> -> vector<32x64xf32>
    %149 = arith.addf %129, %148 : vector<32x64xf32>
    %c193 = arith.constant 193 : index
    %c0_202 = arith.constant 0 : index
    %150 = vector.load %arg12[%c193, %c0_202] : memref<242x32xf32, #tpu.memory_space<vmem>>, vector<4x32xf32>
    %c0_203 = arith.constant 0 : index
    %c0_204 = arith.constant 0 : index
    %151 = vector.load %arg15[%c0_203, %c0_204] : memref<32x32xf32, #tpu.memory_space<vmem>>, vector<4x32xf32>
    tpu.vector_store %arg15[%c0_203, %c0_204], %150 {strides = array<i32>} : memref<32x32xf32, #tpu.memory_space<vmem>>, vector<4x32xf32>,
    %c198 = arith.constant 198 : index
    %c0_205 = arith.constant 0 : index
    %152 = vector.load %arg12[%c198, %c0_205] : memref<242x32xf32, #tpu.memory_space<vmem>>, vector<4x32xf32>
    %c4_206 = arith.constant 4 : index
    %c0_207 = arith.constant 0 : index
    %153 = vector.load %arg15[%c4_206, %c0_207] : memref<32x32xf32, #tpu.memory_space<vmem>>, vector<4x32xf32>
    tpu.vector_store %arg15[%c4_206, %c0_207], %152 {strides = array<i32>} : memref<32x32xf32, #tpu.memory_space<vmem>>, vector<4x32xf32>,
    %c203 = arith.constant 203 : index
    %c0_208 = arith.constant 0 : index
    %154 = vector.load %arg12[%c203, %c0_208] : memref<242x32xf32, #tpu.memory_space<vmem>>, vector<4x32xf32>
    %c8_209 = arith.constant 8 : index
    %c0_210 = arith.constant 0 : index
    %155 = vector.load %arg15[%c8_209, %c0_210] : memref<32x32xf32, #tpu.memory_space<vmem>>, vector<4x32xf32>
    tpu.vector_store %arg15[%c8_209, %c0_210], %154 {strides = array<i32>} : memref<32x32xf32, #tpu.memory_space<vmem>>, vector<4x32xf32>,
    %c208 = arith.constant 208 : index
    %c0_211 = arith.constant 0 : index
    %156 = vector.load %arg12[%c208, %c0_211] : memref<242x32xf32, #tpu.memory_space<vmem>>, vector<4x32xf32>
    %c12_212 = arith.constant 12 : index
    %c0_213 = arith.constant 0 : index
    %157 = vector.load %arg15[%c12_212, %c0_213] : memref<32x32xf32, #tpu.memory_space<vmem>>, vector<4x32xf32>
    tpu.vector_store %arg15[%c12_212, %c0_213], %156 {strides = array<i32>} : memref<32x32xf32, #tpu.memory_space<vmem>>, vector<4x32xf32>,
    %c218 = arith.constant 218 : index
    %c0_214 = arith.constant 0 : index
    %158 = vector.load %arg12[%c218, %c0_214] : memref<242x32xf32, #tpu.memory_space<vmem>>, vector<4x32xf32>
    %c16_215 = arith.constant 16 : index
    %c0_216 = arith.constant 0 : index
    %159 = vector.load %arg15[%c16_215, %c0_216] : memref<32x32xf32, #tpu.memory_space<vmem>>, vector<4x32xf32>
    tpu.vector_store %arg15[%c16_215, %c0_216], %158 {strides = array<i32>} : memref<32x32xf32, #tpu.memory_space<vmem>>, vector<4x32xf32>,
    %c223 = arith.constant 223 : index
    %c0_217 = arith.constant 0 : index
    %160 = vector.load %arg12[%c223, %c0_217] : memref<242x32xf32, #tpu.memory_space<vmem>>, vector<4x32xf32>
    %c20_218 = arith.constant 20 : index
    %c0_219 = arith.constant 0 : index
    %161 = vector.load %arg15[%c20_218, %c0_219] : memref<32x32xf32, #tpu.memory_space<vmem>>, vector<4x32xf32>
    tpu.vector_store %arg15[%c20_218, %c0_219], %160 {strides = array<i32>} : memref<32x32xf32, #tpu.memory_space<vmem>>, vector<4x32xf32>,
    %c228 = arith.constant 228 : index
    %c0_220 = arith.constant 0 : index
    %162 = vector.load %arg12[%c228, %c0_220] : memref<242x32xf32, #tpu.memory_space<vmem>>, vector<4x32xf32>
    %c24_221 = arith.constant 24 : index
    %c0_222 = arith.constant 0 : index
    %163 = vector.load %arg15[%c24_221, %c0_222] : memref<32x32xf32, #tpu.memory_space<vmem>>, vector<4x32xf32>
    tpu.vector_store %arg15[%c24_221, %c0_222], %162 {strides = array<i32>} : memref<32x32xf32, #tpu.memory_space<vmem>>, vector<4x32xf32>,
    %c233 = arith.constant 233 : index
    %c0_223 = arith.constant 0 : index
    %164 = vector.load %arg12[%c233, %c0_223] : memref<242x32xf32, #tpu.memory_space<vmem>>, vector<4x32xf32>
    %c28_224 = arith.constant 28 : index
    %c0_225 = arith.constant 0 : index
    %165 = vector.load %arg15[%c28_224, %c0_225] : memref<32x32xf32, #tpu.memory_space<vmem>>, vector<4x32xf32>
    tpu.vector_store %arg15[%c28_224, %c0_225], %164 {strides = array<i32>} : memref<32x32xf32, #tpu.memory_space<vmem>>, vector<4x32xf32>,
    %c224 = arith.constant 224 : index
    %c0_226 = arith.constant 0 : index
    %166 = vector.load %arg3[%c224, %c0_226] : memref<512x64xf32, #tpu.memory_space<vmem>>, vector<32x64xf32>
    %c0_227 = arith.constant 0 : index
    %c0_228 = arith.constant 0 : index
    %167 = vector.load %arg15[%c0_227, %c0_228] : memref<32x32xf32, #tpu.memory_space<vmem>>, vector<32x32xf32>
    %cst_229 = arith.constant dense<0.000000e+00> : vector<32x64xf32>
    %168 = tpu.matmul %167, %166, %cst_229 {dimension_numbers = #tpu.dot_dimension_numbers<[1], [0], [0], [1], [0, 0, 1, 1], [], []>} : vector<32x32xf32>, vector<32x64xf32>, vector<32x64xf32> -> vector<32x64xf32>
    %169 = arith.addf %149, %168 : vector<32x64xf32>
    %c6_230 = arith.constant 6 : index
    %c0_231 = arith.constant 0 : index
    %170 = vector.load %arg12[%c6_230, %c0_231] : memref<242x32xf32, #tpu.memory_space<vmem>>, vector<4x32xf32>
    %c0_232 = arith.constant 0 : index
    %c0_233 = arith.constant 0 : index
    %171 = vector.load %arg15[%c0_232, %c0_233] : memref<32x32xf32, #tpu.memory_space<vmem>>, vector<4x32xf32>
    tpu.vector_store %arg15[%c0_232, %c0_233], %170 {strides = array<i32>} : memref<32x32xf32, #tpu.memory_space<vmem>>, vector<4x32xf32>,
    %c12_234 = arith.constant 12 : index
    %c0_235 = arith.constant 0 : index
    %172 = vector.load %arg12[%c12_234, %c0_235] : memref<242x32xf32, #tpu.memory_space<vmem>>, vector<4x32xf32>
    %c4_236 = arith.constant 4 : index
    %c0_237 = arith.constant 0 : index
    %173 = vector.load %arg15[%c4_236, %c0_237] : memref<32x32xf32, #tpu.memory_space<vmem>>, vector<4x32xf32>
    tpu.vector_store %arg15[%c4_236, %c0_237], %172 {strides = array<i32>} : memref<32x32xf32, #tpu.memory_space<vmem>>, vector<4x32xf32>,
    %c18_238 = arith.constant 18 : index
    %c0_239 = arith.constant 0 : index
    %174 = vector.load %arg12[%c18_238, %c0_239] : memref<242x32xf32, #tpu.memory_space<vmem>>, vector<4x32xf32>
    %c8_240 = arith.constant 8 : index
    %c0_241 = arith.constant 0 : index
    %175 = vector.load %arg15[%c8_240, %c0_241] : memref<32x32xf32, #tpu.memory_space<vmem>>, vector<4x32xf32>
    tpu.vector_store %arg15[%c8_240, %c0_241], %174 {strides = array<i32>} : memref<32x32xf32, #tpu.memory_space<vmem>>, vector<4x32xf32>,
    %c24_242 = arith.constant 24 : index
    %c0_243 = arith.constant 0 : index
    %176 = vector.load %arg12[%c24_242, %c0_243] : memref<242x32xf32, #tpu.memory_space<vmem>>, vector<4x32xf32>
    %c12_244 = arith.constant 12 : index
    %c0_245 = arith.constant 0 : index
    %177 = vector.load %arg15[%c12_244, %c0_245] : memref<32x32xf32, #tpu.memory_space<vmem>>, vector<4x32xf32>
    tpu.vector_store %arg15[%c12_244, %c0_245], %176 {strides = array<i32>} : memref<32x32xf32, #tpu.memory_space<vmem>>, vector<4x32xf32>,
    %c42_246 = arith.constant 42 : index
    %c0_247 = arith.constant 0 : index
    %178 = vector.load %arg12[%c42_246, %c0_247] : memref<242x32xf32, #tpu.memory_space<vmem>>, vector<4x32xf32>
    %c16_248 = arith.constant 16 : index
    %c0_249 = arith.constant 0 : index
    %179 = vector.load %arg15[%c16_248, %c0_249] : memref<32x32xf32, #tpu.memory_space<vmem>>, vector<4x32xf32>
    tpu.vector_store %arg15[%c16_248, %c0_249], %178 {strides = array<i32>} : memref<32x32xf32, #tpu.memory_space<vmem>>, vector<4x32xf32>,
    %c48_250 = arith.constant 48 : index
    %c0_251 = arith.constant 0 : index
    %180 = vector.load %arg12[%c48_250, %c0_251] : memref<242x32xf32, #tpu.memory_space<vmem>>, vector<4x32xf32>
    %c20_252 = arith.constant 20 : index
    %c0_253 = arith.constant 0 : index
    %181 = vector.load %arg15[%c20_252, %c0_253] : memref<32x32xf32, #tpu.memory_space<vmem>>, vector<4x32xf32>
    tpu.vector_store %arg15[%c20_252, %c0_253], %180 {strides = array<i32>} : memref<32x32xf32, #tpu.memory_space<vmem>>, vector<4x32xf32>,
    %c54_254 = arith.constant 54 : index
    %c0_255 = arith.constant 0 : index
    %182 = vector.load %arg12[%c54_254, %c0_255] : memref<242x32xf32, #tpu.memory_space<vmem>>, vector<4x32xf32>
    %c24_256 = arith.constant 24 : index
    %c0_257 = arith.constant 0 : index
    %183 = vector.load %arg15[%c24_256, %c0_257] : memref<32x32xf32, #tpu.memory_space<vmem>>, vector<4x32xf32>
    tpu.vector_store %arg15[%c24_256, %c0_257], %182 {strides = array<i32>} : memref<32x32xf32, #tpu.memory_space<vmem>>, vector<4x32xf32>,
    %c60 = arith.constant 60 : index
    %c0_258 = arith.constant 0 : index
    %184 = vector.load %arg12[%c60, %c0_258] : memref<242x32xf32, #tpu.memory_space<vmem>>, vector<4x32xf32>
    %c28_259 = arith.constant 28 : index
    %c0_260 = arith.constant 0 : index
    %185 = vector.load %arg15[%c28_259, %c0_260] : memref<32x32xf32, #tpu.memory_space<vmem>>, vector<4x32xf32>
    tpu.vector_store %arg15[%c28_259, %c0_260], %184 {strides = array<i32>} : memref<32x32xf32, #tpu.memory_space<vmem>>, vector<4x32xf32>,
    %c256 = arith.constant 256 : index
    %c0_261 = arith.constant 0 : index
    %186 = vector.load %arg3[%c256, %c0_261] : memref<512x64xf32, #tpu.memory_space<vmem>>, vector<32x64xf32>
    %c0_262 = arith.constant 0 : index
    %c0_263 = arith.constant 0 : index
    %187 = vector.load %arg15[%c0_262, %c0_263] : memref<32x32xf32, #tpu.memory_space<vmem>>, vector<32x32xf32>
    %cst_264 = arith.constant dense<0.000000e+00> : vector<32x64xf32>
    %188 = tpu.matmul %187, %186, %cst_264 {dimension_numbers = #tpu.dot_dimension_numbers<[1], [0], [0], [1], [0, 0, 1, 1], [], []>} : vector<32x32xf32>, vector<32x64xf32>, vector<32x64xf32> -> vector<32x64xf32>
    %189 = arith.addf %169, %188 : vector<32x64xf32>
    %c77_265 = arith.constant 77 : index
    %c0_266 = arith.constant 0 : index
    %190 = vector.load %arg12[%c77_265, %c0_266] : memref<242x32xf32, #tpu.memory_space<vmem>>, vector<4x32xf32>
    %c0_267 = arith.constant 0 : index
    %c0_268 = arith.constant 0 : index
    %191 = vector.load %arg15[%c0_267, %c0_268] : memref<32x32xf32, #tpu.memory_space<vmem>>, vector<4x32xf32>
    tpu.vector_store %arg15[%c0_267, %c0_268], %190 {strides = array<i32>} : memref<32x32xf32, #tpu.memory_space<vmem>>, vector<4x32xf32>,
    %c82_269 = arith.constant 82 : index
    %c0_270 = arith.constant 0 : index
    %192 = vector.load %arg12[%c82_269, %c0_270] : memref<242x32xf32, #tpu.memory_space<vmem>>, vector<4x32xf32>
    %c4_271 = arith.constant 4 : index
    %c0_272 = arith.constant 0 : index
    %193 = vector.load %arg15[%c4_271, %c0_272] : memref<32x32xf32, #tpu.memory_space<vmem>>, vector<4x32xf32>
    tpu.vector_store %arg15[%c4_271, %c0_272], %192 {strides = array<i32>} : memref<32x32xf32, #tpu.memory_space<vmem>>, vector<4x32xf32>,
    %c87_273 = arith.constant 87 : index
    %c0_274 = arith.constant 0 : index
    %194 = vector.load %arg12[%c87_273, %c0_274] : memref<242x32xf32, #tpu.memory_space<vmem>>, vector<4x32xf32>
    %c8_275 = arith.constant 8 : index
    %c0_276 = arith.constant 0 : index
    %195 = vector.load %arg15[%c8_275, %c0_276] : memref<32x32xf32, #tpu.memory_space<vmem>>, vector<4x32xf32>
    tpu.vector_store %arg15[%c8_275, %c0_276], %194 {strides = array<i32>} : memref<32x32xf32, #tpu.memory_space<vmem>>, vector<4x32xf32>,
    %c92 = arith.constant 92 : index
    %c0_277 = arith.constant 0 : index
    %196 = vector.load %arg12[%c92, %c0_277] : memref<242x32xf32, #tpu.memory_space<vmem>>, vector<4x32xf32>
    %c12_278 = arith.constant 12 : index
    %c0_279 = arith.constant 0 : index
    %197 = vector.load %arg15[%c12_278, %c0_279] : memref<32x32xf32, #tpu.memory_space<vmem>>, vector<4x32xf32>
    tpu.vector_store %arg15[%c12_278, %c0_279], %196 {strides = array<i32>} : memref<32x32xf32, #tpu.memory_space<vmem>>, vector<4x32xf32>,
    %c107_280 = arith.constant 107 : index
    %c0_281 = arith.constant 0 : index
    %198 = vector.load %arg12[%c107_280, %c0_281] : memref<242x32xf32, #tpu.memory_space<vmem>>, vector<4x32xf32>
    %c16_282 = arith.constant 16 : index
    %c0_283 = arith.constant 0 : index
    %199 = vector.load %arg15[%c16_282, %c0_283] : memref<32x32xf32, #tpu.memory_space<vmem>>, vector<4x32xf32>
    tpu.vector_store %arg15[%c16_282, %c0_283], %198 {strides = array<i32>} : memref<32x32xf32, #tpu.memory_space<vmem>>, vector<4x32xf32>,
    %c112_284 = arith.constant 112 : index
    %c0_285 = arith.constant 0 : index
    %200 = vector.load %arg12[%c112_284, %c0_285] : memref<242x32xf32, #tpu.memory_space<vmem>>, vector<4x32xf32>
    %c20_286 = arith.constant 20 : index
    %c0_287 = arith.constant 0 : index
    %201 = vector.load %arg15[%c20_286, %c0_287] : memref<32x32xf32, #tpu.memory_space<vmem>>, vector<4x32xf32>
    tpu.vector_store %arg15[%c20_286, %c0_287], %200 {strides = array<i32>} : memref<32x32xf32, #tpu.memory_space<vmem>>, vector<4x32xf32>,
    %c117_288 = arith.constant 117 : index
    %c0_289 = arith.constant 0 : index
    %202 = vector.load %arg12[%c117_288, %c0_289] : memref<242x32xf32, #tpu.memory_space<vmem>>, vector<4x32xf32>
    %c24_290 = arith.constant 24 : index
    %c0_291 = arith.constant 0 : index
    %203 = vector.load %arg15[%c24_290, %c0_291] : memref<32x32xf32, #tpu.memory_space<vmem>>, vector<4x32xf32>
    tpu.vector_store %arg15[%c24_290, %c0_291], %202 {strides = array<i32>} : memref<32x32xf32, #tpu.memory_space<vmem>>, vector<4x32xf32>,
    %c122 = arith.constant 122 : index
    %c0_292 = arith.constant 0 : index
    %204 = vector.load %arg12[%c122, %c0_292] : memref<242x32xf32, #tpu.memory_space<vmem>>, vector<4x32xf32>
    %c28_293 = arith.constant 28 : index
    %c0_294 = arith.constant 0 : index
    %205 = vector.load %arg15[%c28_293, %c0_294] : memref<32x32xf32, #tpu.memory_space<vmem>>, vector<4x32xf32>
    tpu.vector_store %arg15[%c28_293, %c0_294], %204 {strides = array<i32>} : memref<32x32xf32, #tpu.memory_space<vmem>>, vector<4x32xf32>,
    %c288 = arith.constant 288 : index
    %c0_295 = arith.constant 0 : index
    %206 = vector.load %arg3[%c288, %c0_295] : memref<512x64xf32, #tpu.memory_space<vmem>>, vector<32x64xf32>
    %c0_296 = arith.constant 0 : index
    %c0_297 = arith.constant 0 : index
    %207 = vector.load %arg15[%c0_296, %c0_297] : memref<32x32xf32, #tpu.memory_space<vmem>>, vector<32x32xf32>
    %cst_298 = arith.constant dense<0.000000e+00> : vector<32x64xf32>
    %208 = tpu.matmul %207, %206, %cst_298 {dimension_numbers = #tpu.dot_dimension_numbers<[1], [0], [0], [1], [0, 0, 1, 1], [], []>} : vector<32x32xf32>, vector<32x64xf32>, vector<32x64xf32> -> vector<32x64xf32>
    %209 = arith.addf %189, %208 : vector<32x64xf32>
    %c7_299 = arith.constant 7 : index
    %c0_300 = arith.constant 0 : index
    %210 = vector.load %arg12[%c7_299, %c0_300] : memref<242x32xf32, #tpu.memory_space<vmem>>, vector<4x32xf32>
    %c0_301 = arith.constant 0 : index
    %c0_302 = arith.constant 0 : index
    %211 = vector.load %arg15[%c0_301, %c0_302] : memref<32x32xf32, #tpu.memory_space<vmem>>, vector<4x32xf32>
    tpu.vector_store %arg15[%c0_301, %c0_302], %210 {strides = array<i32>} : memref<32x32xf32, #tpu.memory_space<vmem>>, vector<4x32xf32>,
    %c13_303 = arith.constant 13 : index
    %c0_304 = arith.constant 0 : index
    %212 = vector.load %arg12[%c13_303, %c0_304] : memref<242x32xf32, #tpu.memory_space<vmem>>, vector<4x32xf32>
    %c4_305 = arith.constant 4 : index
    %c0_306 = arith.constant 0 : index
    %213 = vector.load %arg15[%c4_305, %c0_306] : memref<32x32xf32, #tpu.memory_space<vmem>>, vector<4x32xf32>
    tpu.vector_store %arg15[%c4_305, %c0_306], %212 {strides = array<i32>} : memref<32x32xf32, #tpu.memory_space<vmem>>, vector<4x32xf32>,
    %c19_307 = arith.constant 19 : index
    %c0_308 = arith.constant 0 : index
    %214 = vector.load %arg12[%c19_307, %c0_308] : memref<242x32xf32, #tpu.memory_space<vmem>>, vector<4x32xf32>
    %c8_309 = arith.constant 8 : index
    %c0_310 = arith.constant 0 : index
    %215 = vector.load %arg15[%c8_309, %c0_310] : memref<32x32xf32, #tpu.memory_space<vmem>>, vector<4x32xf32>
    tpu.vector_store %arg15[%c8_309, %c0_310], %214 {strides = array<i32>} : memref<32x32xf32, #tpu.memory_space<vmem>>, vector<4x32xf32>,
    %c25 = arith.constant 25 : index
    %c0_311 = arith.constant 0 : index
    %216 = vector.load %arg12[%c25, %c0_311] : memref<242x32xf32, #tpu.memory_space<vmem>>, vector<4x32xf32>
    %c12_312 = arith.constant 12 : index
    %c0_313 = arith.constant 0 : index
    %217 = vector.load %arg15[%c12_312, %c0_313] : memref<32x32xf32, #tpu.memory_space<vmem>>, vector<4x32xf32>
    tpu.vector_store %arg15[%c12_312, %c0_313], %216 {strides = array<i32>} : memref<32x32xf32, #tpu.memory_space<vmem>>, vector<4x32xf32>,
    %c43_314 = arith.constant 43 : index
    %c0_315 = arith.constant 0 : index
    %218 = vector.load %arg12[%c43_314, %c0_315] : memref<242x32xf32, #tpu.memory_space<vmem>>, vector<4x32xf32>
    %c16_316 = arith.constant 16 : index
    %c0_317 = arith.constant 0 : index
    %219 = vector.load %arg15[%c16_316, %c0_317] : memref<32x32xf32, #tpu.memory_space<vmem>>, vector<4x32xf32>
    tpu.vector_store %arg15[%c16_316, %c0_317], %218 {strides = array<i32>} : memref<32x32xf32, #tpu.memory_space<vmem>>, vector<4x32xf32>,
    %c49_318 = arith.constant 49 : index
    %c0_319 = arith.constant 0 : index
    %220 = vector.load %arg12[%c49_318, %c0_319] : memref<242x32xf32, #tpu.memory_space<vmem>>, vector<4x32xf32>
    %c20_320 = arith.constant 20 : index
    %c0_321 = arith.constant 0 : index
    %221 = vector.load %arg15[%c20_320, %c0_321] : memref<32x32xf32, #tpu.memory_space<vmem>>, vector<4x32xf32>
    tpu.vector_store %arg15[%c20_320, %c0_321], %220 {strides = array<i32>} : memref<32x32xf32, #tpu.memory_space<vmem>>, vector<4x32xf32>,
    %c55_322 = arith.constant 55 : index
    %c0_323 = arith.constant 0 : index
    %222 = vector.load %arg12[%c55_322, %c0_323] : memref<242x32xf32, #tpu.memory_space<vmem>>, vector<4x32xf32>
    %c24_324 = arith.constant 24 : index
    %c0_325 = arith.constant 0 : index
    %223 = vector.load %arg15[%c24_324, %c0_325] : memref<32x32xf32, #tpu.memory_space<vmem>>, vector<4x32xf32>
    tpu.vector_store %arg15[%c24_324, %c0_325], %222 {strides = array<i32>} : memref<32x32xf32, #tpu.memory_space<vmem>>, vector<4x32xf32>,
    %c61 = arith.constant 61 : index
    %c0_326 = arith.constant 0 : index
    %224 = vector.load %arg12[%c61, %c0_326] : memref<242x32xf32, #tpu.memory_space<vmem>>, vector<4x32xf32>
    %c28_327 = arith.constant 28 : index
    %c0_328 = arith.constant 0 : index
    %225 = vector.load %arg15[%c28_327, %c0_328] : memref<32x32xf32, #tpu.memory_space<vmem>>, vector<4x32xf32>
    tpu.vector_store %arg15[%c28_327, %c0_328], %224 {strides = array<i32>} : memref<32x32xf32, #tpu.memory_space<vmem>>, vector<4x32xf32>,
    %c320 = arith.constant 320 : index
    %c0_329 = arith.constant 0 : index
    %226 = vector.load %arg3[%c320, %c0_329] : memref<512x64xf32, #tpu.memory_space<vmem>>, vector<32x64xf32>
    %c0_330 = arith.constant 0 : index
    %c0_331 = arith.constant 0 : index
    %227 = vector.load %arg15[%c0_330, %c0_331] : memref<32x32xf32, #tpu.memory_space<vmem>>, vector<32x32xf32>
    %cst_332 = arith.constant dense<0.000000e+00> : vector<32x64xf32>
    %228 = tpu.matmul %227, %226, %cst_332 {dimension_numbers = #tpu.dot_dimension_numbers<[1], [0], [0], [1], [0, 0, 1, 1], [], []>} : vector<32x32xf32>, vector<32x64xf32>, vector<32x64xf32> -> vector<32x64xf32>
    %229 = arith.addf %209, %228 : vector<32x64xf32>
    %c78_333 = arith.constant 78 : index
    %c0_334 = arith.constant 0 : index
    %230 = vector.load %arg12[%c78_333, %c0_334] : memref<242x32xf32, #tpu.memory_space<vmem>>, vector<4x32xf32>
    %c0_335 = arith.constant 0 : index
    %c0_336 = arith.constant 0 : index
    %231 = vector.load %arg15[%c0_335, %c0_336] : memref<32x32xf32, #tpu.memory_space<vmem>>, vector<4x32xf32>
    tpu.vector_store %arg15[%c0_335, %c0_336], %230 {strides = array<i32>} : memref<32x32xf32, #tpu.memory_space<vmem>>, vector<4x32xf32>,
    %c83_337 = arith.constant 83 : index
    %c0_338 = arith.constant 0 : index
    %232 = vector.load %arg12[%c83_337, %c0_338] : memref<242x32xf32, #tpu.memory_space<vmem>>, vector<4x32xf32>
    %c4_339 = arith.constant 4 : index
    %c0_340 = arith.constant 0 : index
    %233 = vector.load %arg15[%c4_339, %c0_340] : memref<32x32xf32, #tpu.memory_space<vmem>>, vector<4x32xf32>
    tpu.vector_store %arg15[%c4_339, %c0_340], %232 {strides = array<i32>} : memref<32x32xf32, #tpu.memory_space<vmem>>, vector<4x32xf32>,
    %c88_341 = arith.constant 88 : index
    %c0_342 = arith.constant 0 : index
    %234 = vector.load %arg12[%c88_341, %c0_342] : memref<242x32xf32, #tpu.memory_space<vmem>>, vector<4x32xf32>
    %c8_343 = arith.constant 8 : index
    %c0_344 = arith.constant 0 : index
    %235 = vector.load %arg15[%c8_343, %c0_344] : memref<32x32xf32, #tpu.memory_space<vmem>>, vector<4x32xf32>
    tpu.vector_store %arg15[%c8_343, %c0_344], %234 {strides = array<i32>} : memref<32x32xf32, #tpu.memory_space<vmem>>, vector<4x32xf32>,
    %c93 = arith.constant 93 : index
    %c0_345 = arith.constant 0 : index
    %236 = vector.load %arg12[%c93, %c0_345] : memref<242x32xf32, #tpu.memory_space<vmem>>, vector<4x32xf32>
    %c12_346 = arith.constant 12 : index
    %c0_347 = arith.constant 0 : index
    %237 = vector.load %arg15[%c12_346, %c0_347] : memref<32x32xf32, #tpu.memory_space<vmem>>, vector<4x32xf32>
    tpu.vector_store %arg15[%c12_346, %c0_347], %236 {strides = array<i32>} : memref<32x32xf32, #tpu.memory_space<vmem>>, vector<4x32xf32>,
    %c108_348 = arith.constant 108 : index
    %c0_349 = arith.constant 0 : index
    %238 = vector.load %arg12[%c108_348, %c0_349] : memref<242x32xf32, #tpu.memory_space<vmem>>, vector<4x32xf32>
    %c16_350 = arith.constant 16 : index
    %c0_351 = arith.constant 0 : index
    %239 = vector.load %arg15[%c16_350, %c0_351] : memref<32x32xf32, #tpu.memory_space<vmem>>, vector<4x32xf32>
    tpu.vector_store %arg15[%c16_350, %c0_351], %238 {strides = array<i32>} : memref<32x32xf32, #tpu.memory_space<vmem>>, vector<4x32xf32>,
    %c113_352 = arith.constant 113 : index
    %c0_353 = arith.constant 0 : index
    %240 = vector.load %arg12[%c113_352, %c0_353] : memref<242x32xf32, #tpu.memory_space<vmem>>, vector<4x32xf32>
    %c20_354 = arith.constant 20 : index
    %c0_355 = arith.constant 0 : index
    %241 = vector.load %arg15[%c20_354, %c0_355] : memref<32x32xf32, #tpu.memory_space<vmem>>, vector<4x32xf32>
    tpu.vector_store %arg15[%c20_354, %c0_355], %240 {strides = array<i32>} : memref<32x32xf32, #tpu.memory_space<vmem>>, vector<4x32xf32>,
    %c118_356 = arith.constant 118 : index
    %c0_357 = arith.constant 0 : index
    %242 = vector.load %arg12[%c118_356, %c0_357] : memref<242x32xf32, #tpu.memory_space<vmem>>, vector<4x32xf32>
    %c24_358 = arith.constant 24 : index
    %c0_359 = arith.constant 0 : index
    %243 = vector.load %arg15[%c24_358, %c0_359] : memref<32x32xf32, #tpu.memory_space<vmem>>, vector<4x32xf32>
    tpu.vector_store %arg15[%c24_358, %c0_359], %242 {strides = array<i32>} : memref<32x32xf32, #tpu.memory_space<vmem>>, vector<4x32xf32>,
    %c123 = arith.constant 123 : index
    %c0_360 = arith.constant 0 : index
    %244 = vector.load %arg12[%c123, %c0_360] : memref<242x32xf32, #tpu.memory_space<vmem>>, vector<4x32xf32>
    %c28_361 = arith.constant 28 : index
    %c0_362 = arith.constant 0 : index
    %245 = vector.load %arg15[%c28_361, %c0_362] : memref<32x32xf32, #tpu.memory_space<vmem>>, vector<4x32xf32>
    tpu.vector_store %arg15[%c28_361, %c0_362], %244 {strides = array<i32>} : memref<32x32xf32, #tpu.memory_space<vmem>>, vector<4x32xf32>,
    %c352 = arith.constant 352 : index
    %c0_363 = arith.constant 0 : index
    %246 = vector.load %arg3[%c352, %c0_363] : memref<512x64xf32, #tpu.memory_space<vmem>>, vector<32x64xf32>
    %c0_364 = arith.constant 0 : index
    %c0_365 = arith.constant 0 : index
    %247 = vector.load %arg15[%c0_364, %c0_365] : memref<32x32xf32, #tpu.memory_space<vmem>>, vector<32x32xf32>
    %cst_366 = arith.constant dense<0.000000e+00> : vector<32x64xf32>
    %248 = tpu.matmul %247, %246, %cst_366 {dimension_numbers = #tpu.dot_dimension_numbers<[1], [0], [0], [1], [0, 0, 1, 1], [], []>} : vector<32x32xf32>, vector<32x64xf32>, vector<32x64xf32> -> vector<32x64xf32>
    %249 = arith.addf %229, %248 : vector<32x64xf32>
    %c138_367 = arith.constant 138 : index
    %c0_368 = arith.constant 0 : index
    %250 = vector.load %arg12[%c138_367, %c0_368] : memref<242x32xf32, #tpu.memory_space<vmem>>, vector<4x32xf32>
    %c0_369 = arith.constant 0 : index
    %c0_370 = arith.constant 0 : index
    %251 = vector.load %arg15[%c0_369, %c0_370] : memref<32x32xf32, #tpu.memory_space<vmem>>, vector<4x32xf32>
    tpu.vector_store %arg15[%c0_369, %c0_370], %250 {strides = array<i32>} : memref<32x32xf32, #tpu.memory_space<vmem>>, vector<4x32xf32>,
    %c144_371 = arith.constant 144 : index
    %c0_372 = arith.constant 0 : index
    %252 = vector.load %arg12[%c144_371, %c0_372] : memref<242x32xf32, #tpu.memory_space<vmem>>, vector<4x32xf32>
    %c4_373 = arith.constant 4 : index
    %c0_374 = arith.constant 0 : index
    %253 = vector.load %arg15[%c4_373, %c0_374] : memref<32x32xf32, #tpu.memory_space<vmem>>, vector<4x32xf32>
    tpu.vector_store %arg15[%c4_373, %c0_374], %252 {strides = array<i32>} : memref<32x32xf32, #tpu.memory_space<vmem>>, vector<4x32xf32>,
    %c150_375 = arith.constant 150 : index
    %c0_376 = arith.constant 0 : index
    %254 = vector.load %arg12[%c150_375, %c0_376] : memref<242x32xf32, #tpu.memory_space<vmem>>, vector<4x32xf32>
    %c8_377 = arith.constant 8 : index
    %c0_378 = arith.constant 0 : index
    %255 = vector.load %arg15[%c8_377, %c0_378] : memref<32x32xf32, #tpu.memory_space<vmem>>, vector<4x32xf32>
    tpu.vector_store %arg15[%c8_377, %c0_378], %254 {strides = array<i32>} : memref<32x32xf32, #tpu.memory_space<vmem>>, vector<4x32xf32>,
    %c156 = arith.constant 156 : index
    %c0_379 = arith.constant 0 : index
    %256 = vector.load %arg12[%c156, %c0_379] : memref<242x32xf32, #tpu.memory_space<vmem>>, vector<4x32xf32>
    %c12_380 = arith.constant 12 : index
    %c0_381 = arith.constant 0 : index
    %257 = vector.load %arg15[%c12_380, %c0_381] : memref<32x32xf32, #tpu.memory_space<vmem>>, vector<4x32xf32>
    tpu.vector_store %arg15[%c12_380, %c0_381], %256 {strides = array<i32>} : memref<32x32xf32, #tpu.memory_space<vmem>>, vector<4x32xf32>,
    %c168_382 = arith.constant 168 : index
    %c0_383 = arith.constant 0 : index
    %258 = vector.load %arg12[%c168_382, %c0_383] : memref<242x32xf32, #tpu.memory_space<vmem>>, vector<4x32xf32>
    %c16_384 = arith.constant 16 : index
    %c0_385 = arith.constant 0 : index
    %259 = vector.load %arg15[%c16_384, %c0_385] : memref<32x32xf32, #tpu.memory_space<vmem>>, vector<4x32xf32>
    tpu.vector_store %arg15[%c16_384, %c0_385], %258 {strides = array<i32>} : memref<32x32xf32, #tpu.memory_space<vmem>>, vector<4x32xf32>,
    %c174_386 = arith.constant 174 : index
    %c0_387 = arith.constant 0 : index
    %260 = vector.load %arg12[%c174_386, %c0_387] : memref<242x32xf32, #tpu.memory_space<vmem>>, vector<4x32xf32>
    %c20_388 = arith.constant 20 : index
    %c0_389 = arith.constant 0 : index
    %261 = vector.load %arg15[%c20_388, %c0_389] : memref<32x32xf32, #tpu.memory_space<vmem>>, vector<4x32xf32>
    tpu.vector_store %arg15[%c20_388, %c0_389], %260 {strides = array<i32>} : memref<32x32xf32, #tpu.memory_space<vmem>>, vector<4x32xf32>,
    %c180_390 = arith.constant 180 : index
    %c0_391 = arith.constant 0 : index
    %262 = vector.load %arg12[%c180_390, %c0_391] : memref<242x32xf32, #tpu.memory_space<vmem>>, vector<4x32xf32>
    %c24_392 = arith.constant 24 : index
    %c0_393 = arith.constant 0 : index
    %263 = vector.load %arg15[%c24_392, %c0_393] : memref<32x32xf32, #tpu.memory_space<vmem>>, vector<4x32xf32>
    tpu.vector_store %arg15[%c24_392, %c0_393], %262 {strides = array<i32>} : memref<32x32xf32, #tpu.memory_space<vmem>>, vector<4x32xf32>,
    %c186 = arith.constant 186 : index
    %c0_394 = arith.constant 0 : index
    %264 = vector.load %arg12[%c186, %c0_394] : memref<242x32xf32, #tpu.memory_space<vmem>>, vector<4x32xf32>
    %c28_395 = arith.constant 28 : index
    %c0_396 = arith.constant 0 : index
    %265 = vector.load %arg15[%c28_395, %c0_396] : memref<32x32xf32, #tpu.memory_space<vmem>>, vector<4x32xf32>
    tpu.vector_store %arg15[%c28_395, %c0_396], %264 {strides = array<i32>} : memref<32x32xf32, #tpu.memory_space<vmem>>, vector<4x32xf32>,
    %c384 = arith.constant 384 : index
    %c0_397 = arith.constant 0 : index
    %266 = vector.load %arg3[%c384, %c0_397] : memref<512x64xf32, #tpu.memory_space<vmem>>, vector<32x64xf32>
    %c0_398 = arith.constant 0 : index
    %c0_399 = arith.constant 0 : index
    %267 = vector.load %arg15[%c0_398, %c0_399] : memref<32x32xf32, #tpu.memory_space<vmem>>, vector<32x32xf32>
    %cst_400 = arith.constant dense<0.000000e+00> : vector<32x64xf32>
    %268 = tpu.matmul %267, %266, %cst_400 {dimension_numbers = #tpu.dot_dimension_numbers<[1], [0], [0], [1], [0, 0, 1, 1], [], []>} : vector<32x32xf32>, vector<32x64xf32>, vector<32x64xf32> -> vector<32x64xf32>
    %269 = arith.addf %249, %268 : vector<32x64xf32>
    %c197_401 = arith.constant 197 : index
    %c0_402 = arith.constant 0 : index
    %270 = vector.load %arg12[%c197_401, %c0_402] : memref<242x32xf32, #tpu.memory_space<vmem>>, vector<4x32xf32>
    %c0_403 = arith.constant 0 : index
    %c0_404 = arith.constant 0 : index
    %271 = vector.load %arg15[%c0_403, %c0_404] : memref<32x32xf32, #tpu.memory_space<vmem>>, vector<4x32xf32>
    tpu.vector_store %arg15[%c0_403, %c0_404], %270 {strides = array<i32>} : memref<32x32xf32, #tpu.memory_space<vmem>>, vector<4x32xf32>,
    %c202_405 = arith.constant 202 : index
    %c0_406 = arith.constant 0 : index
    %272 = vector.load %arg12[%c202_405, %c0_406] : memref<242x32xf32, #tpu.memory_space<vmem>>, vector<4x32xf32>
    %c4_407 = arith.constant 4 : index
    %c0_408 = arith.constant 0 : index
    %273 = vector.load %arg15[%c4_407, %c0_408] : memref<32x32xf32, #tpu.memory_space<vmem>>, vector<4x32xf32>
    tpu.vector_store %arg15[%c4_407, %c0_408], %272 {strides = array<i32>} : memref<32x32xf32, #tpu.memory_space<vmem>>, vector<4x32xf32>,
    %c207_409 = arith.constant 207 : index
    %c0_410 = arith.constant 0 : index
    %274 = vector.load %arg12[%c207_409, %c0_410] : memref<242x32xf32, #tpu.memory_space<vmem>>, vector<4x32xf32>
    %c8_411 = arith.constant 8 : index
    %c0_412 = arith.constant 0 : index
    %275 = vector.load %arg15[%c8_411, %c0_412] : memref<32x32xf32, #tpu.memory_space<vmem>>, vector<4x32xf32>
    tpu.vector_store %arg15[%c8_411, %c0_412], %274 {strides = array<i32>} : memref<32x32xf32, #tpu.memory_space<vmem>>, vector<4x32xf32>,
    %c212 = arith.constant 212 : index
    %c0_413 = arith.constant 0 : index
    %276 = vector.load %arg12[%c212, %c0_413] : memref<242x32xf32, #tpu.memory_space<vmem>>, vector<4x32xf32>
    %c12_414 = arith.constant 12 : index
    %c0_415 = arith.constant 0 : index
    %277 = vector.load %arg15[%c12_414, %c0_415] : memref<32x32xf32, #tpu.memory_space<vmem>>, vector<4x32xf32>
    tpu.vector_store %arg15[%c12_414, %c0_415], %276 {strides = array<i32>} : memref<32x32xf32, #tpu.memory_space<vmem>>, vector<4x32xf32>,
    %c222_416 = arith.constant 222 : index
    %c0_417 = arith.constant 0 : index
    %278 = vector.load %arg12[%c222_416, %c0_417] : memref<242x32xf32, #tpu.memory_space<vmem>>, vector<4x32xf32>
    %c16_418 = arith.constant 16 : index
    %c0_419 = arith.constant 0 : index
    %279 = vector.load %arg15[%c16_418, %c0_419] : memref<32x32xf32, #tpu.memory_space<vmem>>, vector<4x32xf32>
    tpu.vector_store %arg15[%c16_418, %c0_419], %278 {strides = array<i32>} : memref<32x32xf32, #tpu.memory_space<vmem>>, vector<4x32xf32>,
    %c227_420 = arith.constant 227 : index
    %c0_421 = arith.constant 0 : index
    %280 = vector.load %arg12[%c227_420, %c0_421] : memref<242x32xf32, #tpu.memory_space<vmem>>, vector<4x32xf32>
    %c20_422 = arith.constant 20 : index
    %c0_423 = arith.constant 0 : index
    %281 = vector.load %arg15[%c20_422, %c0_423] : memref<32x32xf32, #tpu.memory_space<vmem>>, vector<4x32xf32>
    tpu.vector_store %arg15[%c20_422, %c0_423], %280 {strides = array<i32>} : memref<32x32xf32, #tpu.memory_space<vmem>>, vector<4x32xf32>,
    %c232_424 = arith.constant 232 : index
    %c0_425 = arith.constant 0 : index
    %282 = vector.load %arg12[%c232_424, %c0_425] : memref<242x32xf32, #tpu.memory_space<vmem>>, vector<4x32xf32>
    %c24_426 = arith.constant 24 : index
    %c0_427 = arith.constant 0 : index
    %283 = vector.load %arg15[%c24_426, %c0_427] : memref<32x32xf32, #tpu.memory_space<vmem>>, vector<4x32xf32>
    tpu.vector_store %arg15[%c24_426, %c0_427], %282 {strides = array<i32>} : memref<32x32xf32, #tpu.memory_space<vmem>>, vector<4x32xf32>,
    %c237 = arith.constant 237 : index
    %c0_428 = arith.constant 0 : index
    %284 = vector.load %arg12[%c237, %c0_428] : memref<242x32xf32, #tpu.memory_space<vmem>>, vector<4x32xf32>
    %c28_429 = arith.constant 28 : index
    %c0_430 = arith.constant 0 : index
    %285 = vector.load %arg15[%c28_429, %c0_430] : memref<32x32xf32, #tpu.memory_space<vmem>>, vector<4x32xf32>
    tpu.vector_store %arg15[%c28_429, %c0_430], %284 {strides = array<i32>} : memref<32x32xf32, #tpu.memory_space<vmem>>, vector<4x32xf32>,
    %c416 = arith.constant 416 : index
    %c0_431 = arith.constant 0 : index
    %286 = vector.load %arg3[%c416, %c0_431] : memref<512x64xf32, #tpu.memory_space<vmem>>, vector<32x64xf32>
    %c0_432 = arith.constant 0 : index
    %c0_433 = arith.constant 0 : index
    %287 = vector.load %arg15[%c0_432, %c0_433] : memref<32x32xf32, #tpu.memory_space<vmem>>, vector<32x32xf32>
    %cst_434 = arith.constant dense<0.000000e+00> : vector<32x64xf32>
    %288 = tpu.matmul %287, %286, %cst_434 {dimension_numbers = #tpu.dot_dimension_numbers<[1], [0], [0], [1], [0, 0, 1, 1], [], []>} : vector<32x32xf32>, vector<32x64xf32>, vector<32x64xf32> -> vector<32x64xf32>
    %289 = arith.addf %269, %288 : vector<32x64xf32>
    %c139_435 = arith.constant 139 : index
    %c0_436 = arith.constant 0 : index
    %290 = vector.load %arg12[%c139_435, %c0_436] : memref<242x32xf32, #tpu.memory_space<vmem>>, vector<4x32xf32>
    %c0_437 = arith.constant 0 : index
    %c0_438 = arith.constant 0 : index
    %291 = vector.load %arg15[%c0_437, %c0_438] : memref<32x32xf32, #tpu.memory_space<vmem>>, vector<4x32xf32>
    tpu.vector_store %arg15[%c0_437, %c0_438], %290 {strides = array<i32>} : memref<32x32xf32, #tpu.memory_space<vmem>>, vector<4x32xf32>,
    %c145_439 = arith.constant 145 : index
    %c0_440 = arith.constant 0 : index
    %292 = vector.load %arg12[%c145_439, %c0_440] : memref<242x32xf32, #tpu.memory_space<vmem>>, vector<4x32xf32>
    %c4_441 = arith.constant 4 : index
    %c0_442 = arith.constant 0 : index
    %293 = vector.load %arg15[%c4_441, %c0_442] : memref<32x32xf32, #tpu.memory_space<vmem>>, vector<4x32xf32>
    tpu.vector_store %arg15[%c4_441, %c0_442], %292 {strides = array<i32>} : memref<32x32xf32, #tpu.memory_space<vmem>>, vector<4x32xf32>,
    %c151_443 = arith.constant 151 : index
    %c0_444 = arith.constant 0 : index
    %294 = vector.load %arg12[%c151_443, %c0_444] : memref<242x32xf32, #tpu.memory_space<vmem>>, vector<4x32xf32>
    %c8_445 = arith.constant 8 : index
    %c0_446 = arith.constant 0 : index
    %295 = vector.load %arg15[%c8_445, %c0_446] : memref<32x32xf32, #tpu.memory_space<vmem>>, vector<4x32xf32>
    tpu.vector_store %arg15[%c8_445, %c0_446], %294 {strides = array<i32>} : memref<32x32xf32, #tpu.memory_space<vmem>>, vector<4x32xf32>,
    %c157 = arith.constant 157 : index
    %c0_447 = arith.constant 0 : index
    %296 = vector.load %arg12[%c157, %c0_447] : memref<242x32xf32, #tpu.memory_space<vmem>>, vector<4x32xf32>
    %c12_448 = arith.constant 12 : index
    %c0_449 = arith.constant 0 : index
    %297 = vector.load %arg15[%c12_448, %c0_449] : memref<32x32xf32, #tpu.memory_space<vmem>>, vector<4x32xf32>
    tpu.vector_store %arg15[%c12_448, %c0_449], %296 {strides = array<i32>} : memref<32x32xf32, #tpu.memory_space<vmem>>, vector<4x32xf32>,
    %c169_450 = arith.constant 169 : index
    %c0_451 = arith.constant 0 : index
    %298 = vector.load %arg12[%c169_450, %c0_451] : memref<242x32xf32, #tpu.memory_space<vmem>>, vector<4x32xf32>
    %c16_452 = arith.constant 16 : index
    %c0_453 = arith.constant 0 : index
    %299 = vector.load %arg15[%c16_452, %c0_453] : memref<32x32xf32, #tpu.memory_space<vmem>>, vector<4x32xf32>
    tpu.vector_store %arg15[%c16_452, %c0_453], %298 {strides = array<i32>} : memref<32x32xf32, #tpu.memory_space<vmem>>, vector<4x32xf32>,
    %c175_454 = arith.constant 175 : index
    %c0_455 = arith.constant 0 : index
    %300 = vector.load %arg12[%c175_454, %c0_455] : memref<242x32xf32, #tpu.memory_space<vmem>>, vector<4x32xf32>
    %c20_456 = arith.constant 20 : index
    %c0_457 = arith.constant 0 : index
    %301 = vector.load %arg15[%c20_456, %c0_457] : memref<32x32xf32, #tpu.memory_space<vmem>>, vector<4x32xf32>
    tpu.vector_store %arg15[%c20_456, %c0_457], %300 {strides = array<i32>} : memref<32x32xf32, #tpu.memory_space<vmem>>, vector<4x32xf32>,
    %c181_458 = arith.constant 181 : index
    %c0_459 = arith.constant 0 : index
    %302 = vector.load %arg12[%c181_458, %c0_459] : memref<242x32xf32, #tpu.memory_space<vmem>>, vector<4x32xf32>
    %c24_460 = arith.constant 24 : index
    %c0_461 = arith.constant 0 : index
    %303 = vector.load %arg15[%c24_460, %c0_461] : memref<32x32xf32, #tpu.memory_space<vmem>>, vector<4x32xf32>
    tpu.vector_store %arg15[%c24_460, %c0_461], %302 {strides = array<i32>} : memref<32x32xf32, #tpu.memory_space<vmem>>, vector<4x32xf32>,
    %c187 = arith.constant 187 : index
    %c0_462 = arith.constant 0 : index
    %304 = vector.load %arg12[%c187, %c0_462] : memref<242x32xf32, #tpu.memory_space<vmem>>, vector<4x32xf32>
    %c28_463 = arith.constant 28 : index
    %c0_464 = arith.constant 0 : index
    %305 = vector.load %arg15[%c28_463, %c0_464] : memref<32x32xf32, #tpu.memory_space<vmem>>, vector<4x32xf32>
    tpu.vector_store %arg15[%c28_463, %c0_464], %304 {strides = array<i32>} : memref<32x32xf32, #tpu.memory_space<vmem>>, vector<4x32xf32>,
    %c448 = arith.constant 448 : index
    %c0_465 = arith.constant 0 : index
    %306 = vector.load %arg3[%c448, %c0_465] : memref<512x64xf32, #tpu.memory_space<vmem>>, vector<32x64xf32>
    %c0_466 = arith.constant 0 : index
    %c0_467 = arith.constant 0 : index
    %307 = vector.load %arg15[%c0_466, %c0_467] : memref<32x32xf32, #tpu.memory_space<vmem>>, vector<32x32xf32>
    %cst_468 = arith.constant dense<0.000000e+00> : vector<32x64xf32>
    %308 = tpu.matmul %307, %306, %cst_468 {dimension_numbers = #tpu.dot_dimension_numbers<[1], [0], [0], [1], [0, 0, 1, 1], [], []>} : vector<32x32xf32>, vector<32x64xf32>, vector<32x64xf32> -> vector<32x64xf32>
    %309 = arith.addf %289, %308 : vector<32x64xf32>
    %c198_469 = arith.constant 198 : index
    %c0_470 = arith.constant 0 : index
    %310 = vector.load %arg12[%c198_469, %c0_470] : memref<242x32xf32, #tpu.memory_space<vmem>>, vector<4x32xf32>
    %c0_471 = arith.constant 0 : index
    %c0_472 = arith.constant 0 : index
    %311 = vector.load %arg15[%c0_471, %c0_472] : memref<32x32xf32, #tpu.memory_space<vmem>>, vector<4x32xf32>
    tpu.vector_store %arg15[%c0_471, %c0_472], %310 {strides = array<i32>} : memref<32x32xf32, #tpu.memory_space<vmem>>, vector<4x32xf32>,
    %c203_473 = arith.constant 203 : index
    %c0_474 = arith.constant 0 : index
    %312 = vector.load %arg12[%c203_473, %c0_474] : memref<242x32xf32, #tpu.memory_space<vmem>>, vector<4x32xf32>
    %c4_475 = arith.constant 4 : index
    %c0_476 = arith.constant 0 : index
    %313 = vector.load %arg15[%c4_475, %c0_476] : memref<32x32xf32, #tpu.memory_space<vmem>>, vector<4x32xf32>
    tpu.vector_store %arg15[%c4_475, %c0_476], %312 {strides = array<i32>} : memref<32x32xf32, #tpu.memory_space<vmem>>, vector<4x32xf32>,
    %c208_477 = arith.constant 208 : index
    %c0_478 = arith.constant 0 : index
    %314 = vector.load %arg12[%c208_477, %c0_478] : memref<242x32xf32, #tpu.memory_space<vmem>>, vector<4x32xf32>
    %c8_479 = arith.constant 8 : index
    %c0_480 = arith.constant 0 : index
    %315 = vector.load %arg15[%c8_479, %c0_480] : memref<32x32xf32, #tpu.memory_space<vmem>>, vector<4x32xf32>
    tpu.vector_store %arg15[%c8_479, %c0_480], %314 {strides = array<i32>} : memref<32x32xf32, #tpu.memory_space<vmem>>, vector<4x32xf32>,
    %c213 = arith.constant 213 : index
    %c0_481 = arith.constant 0 : index
    %316 = vector.load %arg12[%c213, %c0_481] : memref<242x32xf32, #tpu.memory_space<vmem>>, vector<4x32xf32>
    %c12_482 = arith.constant 12 : index
    %c0_483 = arith.constant 0 : index
    %317 = vector.load %arg15[%c12_482, %c0_483] : memref<32x32xf32, #tpu.memory_space<vmem>>, vector<4x32xf32>
    tpu.vector_store %arg15[%c12_482, %c0_483], %316 {strides = array<i32>} : memref<32x32xf32, #tpu.memory_space<vmem>>, vector<4x32xf32>,
    %c223_484 = arith.constant 223 : index
    %c0_485 = arith.constant 0 : index
    %318 = vector.load %arg12[%c223_484, %c0_485] : memref<242x32xf32, #tpu.memory_space<vmem>>, vector<4x32xf32>
    %c16_486 = arith.constant 16 : index
    %c0_487 = arith.constant 0 : index
    %319 = vector.load %arg15[%c16_486, %c0_487] : memref<32x32xf32, #tpu.memory_space<vmem>>, vector<4x32xf32>
    tpu.vector_store %arg15[%c16_486, %c0_487], %318 {strides = array<i32>} : memref<32x32xf32, #tpu.memory_space<vmem>>, vector<4x32xf32>,
    %c228_488 = arith.constant 228 : index
    %c0_489 = arith.constant 0 : index
    %320 = vector.load %arg12[%c228_488, %c0_489] : memref<242x32xf32, #tpu.memory_space<vmem>>, vector<4x32xf32>
    %c20_490 = arith.constant 20 : index
    %c0_491 = arith.constant 0 : index
    %321 = vector.load %arg15[%c20_490, %c0_491] : memref<32x32xf32, #tpu.memory_space<vmem>>, vector<4x32xf32>
    tpu.vector_store %arg15[%c20_490, %c0_491], %320 {strides = array<i32>} : memref<32x32xf32, #tpu.memory_space<vmem>>, vector<4x32xf32>,
    %c233_492 = arith.constant 233 : index
    %c0_493 = arith.constant 0 : index
    %322 = vector.load %arg12[%c233_492, %c0_493] : memref<242x32xf32, #tpu.memory_space<vmem>>, vector<4x32xf32>
    %c24_494 = arith.constant 24 : index
    %c0_495 = arith.constant 0 : index
    %323 = vector.load %arg15[%c24_494, %c0_495] : memref<32x32xf32, #tpu.memory_space<vmem>>, vector<4x32xf32>
    tpu.vector_store %arg15[%c24_494, %c0_495], %322 {strides = array<i32>} : memref<32x32xf32, #tpu.memory_space<vmem>>, vector<4x32xf32>,
    %c238 = arith.constant 238 : index
    %c0_496 = arith.constant 0 : index
    %324 = vector.load %arg12[%c238, %c0_496] : memref<242x32xf32, #tpu.memory_space<vmem>>, vector<4x32xf32>
    %c28_497 = arith.constant 28 : index
    %c0_498 = arith.constant 0 : index
    %325 = vector.load %arg15[%c28_497, %c0_498] : memref<32x32xf32, #tpu.memory_space<vmem>>, vector<4x32xf32>
    tpu.vector_store %arg15[%c28_497, %c0_498], %324 {strides = array<i32>} : memref<32x32xf32, #tpu.memory_space<vmem>>, vector<4x32xf32>,
    %c480 = arith.constant 480 : index
    %c0_499 = arith.constant 0 : index
    %326 = vector.load %arg3[%c480, %c0_499] : memref<512x64xf32, #tpu.memory_space<vmem>>, vector<32x64xf32>
    %c0_500 = arith.constant 0 : index
    %c0_501 = arith.constant 0 : index
    %327 = vector.load %arg15[%c0_500, %c0_501] : memref<32x32xf32, #tpu.memory_space<vmem>>, vector<32x32xf32>
    %cst_502 = arith.constant dense<0.000000e+00> : vector<32x64xf32>
    %328 = tpu.matmul %327, %326, %cst_502 {dimension_numbers = #tpu.dot_dimension_numbers<[1], [0], [0], [1], [0, 0, 1, 1], [], []>} : vector<32x32xf32>, vector<32x64xf32>, vector<32x64xf32> -> vector<32x64xf32>
    %329 = arith.addf %309, %328 : vector<32x64xf32>
    %c0_503 = arith.constant 0 : index
    %c0_504 = arith.constant 0 : index
    %330 = vector.load %arg4[%c0_503, %c0_504] : memref<1x64xf32, #tpu.memory_space<vmem>>, vector<1x64xf32>
    %331 = vector.broadcast %330 : vector<1x64xf32> to vector<32x64xf32>
    %332 = arith.addf %329, %331 : vector<32x64xf32>
    %cst_505 = arith.constant 0.000000e+00 : f32
    %333 = vector.broadcast %cst_505 : f32 to vector<32x64xf32>
    %334 = arith.maximumf %332, %333 : vector<32x64xf32>
    %c0_506 = arith.constant 0 : index
    %c0_507 = arith.constant 0 : index
    %335 = vector.load %arg13[%c0_506, %c0_507] : memref<32x64xf32, #tpu.memory_space<vmem>>, vector<32x64xf32>
    tpu.vector_store %arg13[%c0_506, %c0_507], %334 {strides = array<i32>} : memref<32x64xf32, #tpu.memory_space<vmem>>, vector<32x64xf32>,
    %cst_508 = arith.constant 0.000000e+00 : f32
    %336 = vector.broadcast %cst_508 : f32 to vector<8x64xf32>
    %c0_509 = arith.constant 0 : index
    %c0_510 = arith.constant 0 : index
    %337 = vector.load %arg13[%c0_509, %c0_510] : memref<32x64xf32, #tpu.memory_space<vmem>>, vector<2x64xf32>
    %c0_511 = arith.constant 0 : index
    %c0_512 = arith.constant 0 : index
    %338 = vector.load %arg16[%c0_511, %c0_512] : memref<8x64xf32, #tpu.memory_space<vmem>>, vector<2x64xf32>
    tpu.vector_store %arg16[%c0_511, %c0_512], %337 {strides = array<i32>} : memref<8x64xf32, #tpu.memory_space<vmem>>, vector<2x64xf32>,
    %c4_513 = arith.constant 4 : index
    %c0_514 = arith.constant 0 : index
    %339 = vector.load %arg13[%c4_513, %c0_514] : memref<32x64xf32, #tpu.memory_space<vmem>>, vector<2x64xf32>
    %c2 = arith.constant 2 : index
    %c0_515 = arith.constant 0 : index
    %340 = vector.load %arg16[%c2, %c0_515] : memref<8x64xf32, #tpu.memory_space<vmem>>, vector<2x64xf32>
    tpu.vector_store %arg16[%c2, %c0_515], %339 {strides = array<i32>} : memref<8x64xf32, #tpu.memory_space<vmem>>, vector<2x64xf32>,
    %c16_516 = arith.constant 16 : index
    %c0_517 = arith.constant 0 : index
    %341 = vector.load %arg13[%c16_516, %c0_517] : memref<32x64xf32, #tpu.memory_space<vmem>>, vector<2x64xf32>
    %c4_518 = arith.constant 4 : index
    %c0_519 = arith.constant 0 : index
    %342 = vector.load %arg16[%c4_518, %c0_519] : memref<8x64xf32, #tpu.memory_space<vmem>>, vector<2x64xf32>
    tpu.vector_store %arg16[%c4_518, %c0_519], %341 {strides = array<i32>} : memref<8x64xf32, #tpu.memory_space<vmem>>, vector<2x64xf32>,
    %c20_520 = arith.constant 20 : index
    %c0_521 = arith.constant 0 : index
    %343 = vector.load %arg13[%c20_520, %c0_521] : memref<32x64xf32, #tpu.memory_space<vmem>>, vector<2x64xf32>
    %c6_522 = arith.constant 6 : index
    %c0_523 = arith.constant 0 : index
    %344 = vector.load %arg16[%c6_522, %c0_523] : memref<8x64xf32, #tpu.memory_space<vmem>>, vector<2x64xf32>
    tpu.vector_store %arg16[%c6_522, %c0_523], %343 {strides = array<i32>} : memref<8x64xf32, #tpu.memory_space<vmem>>, vector<2x64xf32>,
    %c0_524 = arith.constant 0 : index
    %c0_525 = arith.constant 0 : index
    %345 = vector.load %arg5[%c0_524, %c0_525] : memref<576x64xf32, #tpu.memory_space<vmem>>, vector<64x64xf32>
    %c0_526 = arith.constant 0 : index
    %c0_527 = arith.constant 0 : index
    %346 = vector.load %arg16[%c0_526, %c0_527] : memref<8x64xf32, #tpu.memory_space<vmem>>, vector<8x64xf32>
    %cst_528 = arith.constant dense<0.000000e+00> : vector<8x64xf32>
    %347 = tpu.matmul %346, %345, %cst_528 {dimension_numbers = #tpu.dot_dimension_numbers<[1], [0], [0], [1], [0, 0, 1, 1], [], []>} : vector<8x64xf32>, vector<64x64xf32>, vector<8x64xf32> -> vector<8x64xf32>
    %348 = arith.addf %336, %347 : vector<8x64xf32>
    %c1_529 = arith.constant 1 : index
    %c0_530 = arith.constant 0 : index
    %349 = vector.load %arg13[%c1_529, %c0_530] : memref<32x64xf32, #tpu.memory_space<vmem>>, vector<2x64xf32>
    %c0_531 = arith.constant 0 : index
    %c0_532 = arith.constant 0 : index
    %350 = vector.load %arg16[%c0_531, %c0_532] : memref<8x64xf32, #tpu.memory_space<vmem>>, vector<2x64xf32>
    tpu.vector_store %arg16[%c0_531, %c0_532], %349 {strides = array<i32>} : memref<8x64xf32, #tpu.memory_space<vmem>>, vector<2x64xf32>,
    %c5 = arith.constant 5 : index
    %c0_533 = arith.constant 0 : index
    %351 = vector.load %arg13[%c5, %c0_533] : memref<32x64xf32, #tpu.memory_space<vmem>>, vector<2x64xf32>
    %c2_534 = arith.constant 2 : index
    %c0_535 = arith.constant 0 : index
    %352 = vector.load %arg16[%c2_534, %c0_535] : memref<8x64xf32, #tpu.memory_space<vmem>>, vector<2x64xf32>
    tpu.vector_store %arg16[%c2_534, %c0_535], %351 {strides = array<i32>} : memref<8x64xf32, #tpu.memory_space<vmem>>, vector<2x64xf32>,
    %c17 = arith.constant 17 : index
    %c0_536 = arith.constant 0 : index
    %353 = vector.load %arg13[%c17, %c0_536] : memref<32x64xf32, #tpu.memory_space<vmem>>, vector<2x64xf32>
    %c4_537 = arith.constant 4 : index
    %c0_538 = arith.constant 0 : index
    %354 = vector.load %arg16[%c4_537, %c0_538] : memref<8x64xf32, #tpu.memory_space<vmem>>, vector<2x64xf32>
    tpu.vector_store %arg16[%c4_537, %c0_538], %353 {strides = array<i32>} : memref<8x64xf32, #tpu.memory_space<vmem>>, vector<2x64xf32>,
    %c21 = arith.constant 21 : index
    %c0_539 = arith.constant 0 : index
    %355 = vector.load %arg13[%c21, %c0_539] : memref<32x64xf32, #tpu.memory_space<vmem>>, vector<2x64xf32>
    %c6_540 = arith.constant 6 : index
    %c0_541 = arith.constant 0 : index
    %356 = vector.load %arg16[%c6_540, %c0_541] : memref<8x64xf32, #tpu.memory_space<vmem>>, vector<2x64xf32>
    tpu.vector_store %arg16[%c6_540, %c0_541], %355 {strides = array<i32>} : memref<8x64xf32, #tpu.memory_space<vmem>>, vector<2x64xf32>,
    %c64_542 = arith.constant 64 : index
    %c0_543 = arith.constant 0 : index
    %357 = vector.load %arg5[%c64_542, %c0_543] : memref<576x64xf32, #tpu.memory_space<vmem>>, vector<64x64xf32>
    %c0_544 = arith.constant 0 : index
    %c0_545 = arith.constant 0 : index
    %358 = vector.load %arg16[%c0_544, %c0_545] : memref<8x64xf32, #tpu.memory_space<vmem>>, vector<8x64xf32>
    %cst_546 = arith.constant dense<0.000000e+00> : vector<8x64xf32>
    %359 = tpu.matmul %358, %357, %cst_546 {dimension_numbers = #tpu.dot_dimension_numbers<[1], [0], [0], [1], [0, 0, 1, 1], [], []>} : vector<8x64xf32>, vector<64x64xf32>, vector<8x64xf32> -> vector<8x64xf32>
    %360 = arith.addf %348, %359 : vector<8x64xf32>
    %c2_547 = arith.constant 2 : index
    %c0_548 = arith.constant 0 : index
    %361 = vector.load %arg13[%c2_547, %c0_548] : memref<32x64xf32, #tpu.memory_space<vmem>>, vector<2x64xf32>
    %c0_549 = arith.constant 0 : index
    %c0_550 = arith.constant 0 : index
    %362 = vector.load %arg16[%c0_549, %c0_550] : memref<8x64xf32, #tpu.memory_space<vmem>>, vector<2x64xf32>
    tpu.vector_store %arg16[%c0_549, %c0_550], %361 {strides = array<i32>} : memref<8x64xf32, #tpu.memory_space<vmem>>, vector<2x64xf32>,
    %c6_551 = arith.constant 6 : index
    %c0_552 = arith.constant 0 : index
    %363 = vector.load %arg13[%c6_551, %c0_552] : memref<32x64xf32, #tpu.memory_space<vmem>>, vector<2x64xf32>
    %c2_553 = arith.constant 2 : index
    %c0_554 = arith.constant 0 : index
    %364 = vector.load %arg16[%c2_553, %c0_554] : memref<8x64xf32, #tpu.memory_space<vmem>>, vector<2x64xf32>
    tpu.vector_store %arg16[%c2_553, %c0_554], %363 {strides = array<i32>} : memref<8x64xf32, #tpu.memory_space<vmem>>, vector<2x64xf32>,
    %c18_555 = arith.constant 18 : index
    %c0_556 = arith.constant 0 : index
    %365 = vector.load %arg13[%c18_555, %c0_556] : memref<32x64xf32, #tpu.memory_space<vmem>>, vector<2x64xf32>
    %c4_557 = arith.constant 4 : index
    %c0_558 = arith.constant 0 : index
    %366 = vector.load %arg16[%c4_557, %c0_558] : memref<8x64xf32, #tpu.memory_space<vmem>>, vector<2x64xf32>
    tpu.vector_store %arg16[%c4_557, %c0_558], %365 {strides = array<i32>} : memref<8x64xf32, #tpu.memory_space<vmem>>, vector<2x64xf32>,
    %c22 = arith.constant 22 : index
    %c0_559 = arith.constant 0 : index
    %367 = vector.load %arg13[%c22, %c0_559] : memref<32x64xf32, #tpu.memory_space<vmem>>, vector<2x64xf32>
    %c6_560 = arith.constant 6 : index
    %c0_561 = arith.constant 0 : index
    %368 = vector.load %arg16[%c6_560, %c0_561] : memref<8x64xf32, #tpu.memory_space<vmem>>, vector<2x64xf32>
    tpu.vector_store %arg16[%c6_560, %c0_561], %367 {strides = array<i32>} : memref<8x64xf32, #tpu.memory_space<vmem>>, vector<2x64xf32>,
    %c128_562 = arith.constant 128 : index
    %c0_563 = arith.constant 0 : index
    %369 = vector.load %arg5[%c128_562, %c0_563] : memref<576x64xf32, #tpu.memory_space<vmem>>, vector<64x64xf32>
    %c0_564 = arith.constant 0 : index
    %c0_565 = arith.constant 0 : index
    %370 = vector.load %arg16[%c0_564, %c0_565] : memref<8x64xf32, #tpu.memory_space<vmem>>, vector<8x64xf32>
    %cst_566 = arith.constant dense<0.000000e+00> : vector<8x64xf32>
    %371 = tpu.matmul %370, %369, %cst_566 {dimension_numbers = #tpu.dot_dimension_numbers<[1], [0], [0], [1], [0, 0, 1, 1], [], []>} : vector<8x64xf32>, vector<64x64xf32>, vector<8x64xf32> -> vector<8x64xf32>
    %372 = arith.addf %360, %371 : vector<8x64xf32>
    %c4_567 = arith.constant 4 : index
    %c0_568 = arith.constant 0 : index
    %373 = vector.load %arg13[%c4_567, %c0_568] : memref<32x64xf32, #tpu.memory_space<vmem>>, vector<2x64xf32>
    %c0_569 = arith.constant 0 : index
    %c0_570 = arith.constant 0 : index
    %374 = vector.load %arg16[%c0_569, %c0_570] : memref<8x64xf32, #tpu.memory_space<vmem>>, vector<2x64xf32>
    tpu.vector_store %arg16[%c0_569, %c0_570], %373 {strides = array<i32>} : memref<8x64xf32, #tpu.memory_space<vmem>>, vector<2x64xf32>,
    %c8_571 = arith.constant 8 : index
    %c0_572 = arith.constant 0 : index
    %375 = vector.load %arg13[%c8_571, %c0_572] : memref<32x64xf32, #tpu.memory_space<vmem>>, vector<2x64xf32>
    %c2_573 = arith.constant 2 : index
    %c0_574 = arith.constant 0 : index
    %376 = vector.load %arg16[%c2_573, %c0_574] : memref<8x64xf32, #tpu.memory_space<vmem>>, vector<2x64xf32>
    tpu.vector_store %arg16[%c2_573, %c0_574], %375 {strides = array<i32>} : memref<8x64xf32, #tpu.memory_space<vmem>>, vector<2x64xf32>,
    %c20_575 = arith.constant 20 : index
    %c0_576 = arith.constant 0 : index
    %377 = vector.load %arg13[%c20_575, %c0_576] : memref<32x64xf32, #tpu.memory_space<vmem>>, vector<2x64xf32>
    %c4_577 = arith.constant 4 : index
    %c0_578 = arith.constant 0 : index
    %378 = vector.load %arg16[%c4_577, %c0_578] : memref<8x64xf32, #tpu.memory_space<vmem>>, vector<2x64xf32>
    tpu.vector_store %arg16[%c4_577, %c0_578], %377 {strides = array<i32>} : memref<8x64xf32, #tpu.memory_space<vmem>>, vector<2x64xf32>,
    %c24_579 = arith.constant 24 : index
    %c0_580 = arith.constant 0 : index
    %379 = vector.load %arg13[%c24_579, %c0_580] : memref<32x64xf32, #tpu.memory_space<vmem>>, vector<2x64xf32>
    %c6_581 = arith.constant 6 : index
    %c0_582 = arith.constant 0 : index
    %380 = vector.load %arg16[%c6_581, %c0_582] : memref<8x64xf32, #tpu.memory_space<vmem>>, vector<2x64xf32>
    tpu.vector_store %arg16[%c6_581, %c0_582], %379 {strides = array<i32>} : memref<8x64xf32, #tpu.memory_space<vmem>>, vector<2x64xf32>,
    %c192_583 = arith.constant 192 : index
    %c0_584 = arith.constant 0 : index
    %381 = vector.load %arg5[%c192_583, %c0_584] : memref<576x64xf32, #tpu.memory_space<vmem>>, vector<64x64xf32>
    %c0_585 = arith.constant 0 : index
    %c0_586 = arith.constant 0 : index
    %382 = vector.load %arg16[%c0_585, %c0_586] : memref<8x64xf32, #tpu.memory_space<vmem>>, vector<8x64xf32>
    %cst_587 = arith.constant dense<0.000000e+00> : vector<8x64xf32>
    %383 = tpu.matmul %382, %381, %cst_587 {dimension_numbers = #tpu.dot_dimension_numbers<[1], [0], [0], [1], [0, 0, 1, 1], [], []>} : vector<8x64xf32>, vector<64x64xf32>, vector<8x64xf32> -> vector<8x64xf32>
    %384 = arith.addf %372, %383 : vector<8x64xf32>
    %c5_588 = arith.constant 5 : index
    %c0_589 = arith.constant 0 : index
    %385 = vector.load %arg13[%c5_588, %c0_589] : memref<32x64xf32, #tpu.memory_space<vmem>>, vector<2x64xf32>
    %c0_590 = arith.constant 0 : index
    %c0_591 = arith.constant 0 : index
    %386 = vector.load %arg16[%c0_590, %c0_591] : memref<8x64xf32, #tpu.memory_space<vmem>>, vector<2x64xf32>
    tpu.vector_store %arg16[%c0_590, %c0_591], %385 {strides = array<i32>} : memref<8x64xf32, #tpu.memory_space<vmem>>, vector<2x64xf32>,
    %c9 = arith.constant 9 : index
    %c0_592 = arith.constant 0 : index
    %387 = vector.load %arg13[%c9, %c0_592] : memref<32x64xf32, #tpu.memory_space<vmem>>, vector<2x64xf32>
    %c2_593 = arith.constant 2 : index
    %c0_594 = arith.constant 0 : index
    %388 = vector.load %arg16[%c2_593, %c0_594] : memref<8x64xf32, #tpu.memory_space<vmem>>, vector<2x64xf32>
    tpu.vector_store %arg16[%c2_593, %c0_594], %387 {strides = array<i32>} : memref<8x64xf32, #tpu.memory_space<vmem>>, vector<2x64xf32>,
    %c21_595 = arith.constant 21 : index
    %c0_596 = arith.constant 0 : index
    %389 = vector.load %arg13[%c21_595, %c0_596] : memref<32x64xf32, #tpu.memory_space<vmem>>, vector<2x64xf32>
    %c4_597 = arith.constant 4 : index
    %c0_598 = arith.constant 0 : index
    %390 = vector.load %arg16[%c4_597, %c0_598] : memref<8x64xf32, #tpu.memory_space<vmem>>, vector<2x64xf32>
    tpu.vector_store %arg16[%c4_597, %c0_598], %389 {strides = array<i32>} : memref<8x64xf32, #tpu.memory_space<vmem>>, vector<2x64xf32>,
    %c25_599 = arith.constant 25 : index
    %c0_600 = arith.constant 0 : index
    %391 = vector.load %arg13[%c25_599, %c0_600] : memref<32x64xf32, #tpu.memory_space<vmem>>, vector<2x64xf32>
    %c6_601 = arith.constant 6 : index
    %c0_602 = arith.constant 0 : index
    %392 = vector.load %arg16[%c6_601, %c0_602] : memref<8x64xf32, #tpu.memory_space<vmem>>, vector<2x64xf32>
    tpu.vector_store %arg16[%c6_601, %c0_602], %391 {strides = array<i32>} : memref<8x64xf32, #tpu.memory_space<vmem>>, vector<2x64xf32>,
    %c256_603 = arith.constant 256 : index
    %c0_604 = arith.constant 0 : index
    %393 = vector.load %arg5[%c256_603, %c0_604] : memref<576x64xf32, #tpu.memory_space<vmem>>, vector<64x64xf32>
    %c0_605 = arith.constant 0 : index
    %c0_606 = arith.constant 0 : index
    %394 = vector.load %arg16[%c0_605, %c0_606] : memref<8x64xf32, #tpu.memory_space<vmem>>, vector<8x64xf32>
    %cst_607 = arith.constant dense<0.000000e+00> : vector<8x64xf32>
    %395 = tpu.matmul %394, %393, %cst_607 {dimension_numbers = #tpu.dot_dimension_numbers<[1], [0], [0], [1], [0, 0, 1, 1], [], []>} : vector<8x64xf32>, vector<64x64xf32>, vector<8x64xf32> -> vector<8x64xf32>
    %396 = arith.addf %384, %395 : vector<8x64xf32>
    %c6_608 = arith.constant 6 : index
    %c0_609 = arith.constant 0 : index
    %397 = vector.load %arg13[%c6_608, %c0_609] : memref<32x64xf32, #tpu.memory_space<vmem>>, vector<2x64xf32>
    %c0_610 = arith.constant 0 : index
    %c0_611 = arith.constant 0 : index
    %398 = vector.load %arg16[%c0_610, %c0_611] : memref<8x64xf32, #tpu.memory_space<vmem>>, vector<2x64xf32>
    tpu.vector_store %arg16[%c0_610, %c0_611], %397 {strides = array<i32>} : memref<8x64xf32, #tpu.memory_space<vmem>>, vector<2x64xf32>,
    %c10 = arith.constant 10 : index
    %c0_612 = arith.constant 0 : index
    %399 = vector.load %arg13[%c10, %c0_612] : memref<32x64xf32, #tpu.memory_space<vmem>>, vector<2x64xf32>
    %c2_613 = arith.constant 2 : index
    %c0_614 = arith.constant 0 : index
    %400 = vector.load %arg16[%c2_613, %c0_614] : memref<8x64xf32, #tpu.memory_space<vmem>>, vector<2x64xf32>
    tpu.vector_store %arg16[%c2_613, %c0_614], %399 {strides = array<i32>} : memref<8x64xf32, #tpu.memory_space<vmem>>, vector<2x64xf32>,
    %c22_615 = arith.constant 22 : index
    %c0_616 = arith.constant 0 : index
    %401 = vector.load %arg13[%c22_615, %c0_616] : memref<32x64xf32, #tpu.memory_space<vmem>>, vector<2x64xf32>
    %c4_617 = arith.constant 4 : index
    %c0_618 = arith.constant 0 : index
    %402 = vector.load %arg16[%c4_617, %c0_618] : memref<8x64xf32, #tpu.memory_space<vmem>>, vector<2x64xf32>
    tpu.vector_store %arg16[%c4_617, %c0_618], %401 {strides = array<i32>} : memref<8x64xf32, #tpu.memory_space<vmem>>, vector<2x64xf32>,
    %c26 = arith.constant 26 : index
    %c0_619 = arith.constant 0 : index
    %403 = vector.load %arg13[%c26, %c0_619] : memref<32x64xf32, #tpu.memory_space<vmem>>, vector<2x64xf32>
    %c6_620 = arith.constant 6 : index
    %c0_621 = arith.constant 0 : index
    %404 = vector.load %arg16[%c6_620, %c0_621] : memref<8x64xf32, #tpu.memory_space<vmem>>, vector<2x64xf32>
    tpu.vector_store %arg16[%c6_620, %c0_621], %403 {strides = array<i32>} : memref<8x64xf32, #tpu.memory_space<vmem>>, vector<2x64xf32>,
    %c320_622 = arith.constant 320 : index
    %c0_623 = arith.constant 0 : index
    %405 = vector.load %arg5[%c320_622, %c0_623] : memref<576x64xf32, #tpu.memory_space<vmem>>, vector<64x64xf32>
    %c0_624 = arith.constant 0 : index
    %c0_625 = arith.constant 0 : index
    %406 = vector.load %arg16[%c0_624, %c0_625] : memref<8x64xf32, #tpu.memory_space<vmem>>, vector<8x64xf32>
    %cst_626 = arith.constant dense<0.000000e+00> : vector<8x64xf32>
    %407 = tpu.matmul %406, %405, %cst_626 {dimension_numbers = #tpu.dot_dimension_numbers<[1], [0], [0], [1], [0, 0, 1, 1], [], []>} : vector<8x64xf32>, vector<64x64xf32>, vector<8x64xf32> -> vector<8x64xf32>
    %408 = arith.addf %396, %407 : vector<8x64xf32>
    %c8_627 = arith.constant 8 : index
    %c0_628 = arith.constant 0 : index
    %409 = vector.load %arg13[%c8_627, %c0_628] : memref<32x64xf32, #tpu.memory_space<vmem>>, vector<2x64xf32>
    %c0_629 = arith.constant 0 : index
    %c0_630 = arith.constant 0 : index
    %410 = vector.load %arg16[%c0_629, %c0_630] : memref<8x64xf32, #tpu.memory_space<vmem>>, vector<2x64xf32>
    tpu.vector_store %arg16[%c0_629, %c0_630], %409 {strides = array<i32>} : memref<8x64xf32, #tpu.memory_space<vmem>>, vector<2x64xf32>,
    %c12_631 = arith.constant 12 : index
    %c0_632 = arith.constant 0 : index
    %411 = vector.load %arg13[%c12_631, %c0_632] : memref<32x64xf32, #tpu.memory_space<vmem>>, vector<2x64xf32>
    %c2_633 = arith.constant 2 : index
    %c0_634 = arith.constant 0 : index
    %412 = vector.load %arg16[%c2_633, %c0_634] : memref<8x64xf32, #tpu.memory_space<vmem>>, vector<2x64xf32>
    tpu.vector_store %arg16[%c2_633, %c0_634], %411 {strides = array<i32>} : memref<8x64xf32, #tpu.memory_space<vmem>>, vector<2x64xf32>,
    %c24_635 = arith.constant 24 : index
    %c0_636 = arith.constant 0 : index
    %413 = vector.load %arg13[%c24_635, %c0_636] : memref<32x64xf32, #tpu.memory_space<vmem>>, vector<2x64xf32>
    %c4_637 = arith.constant 4 : index
    %c0_638 = arith.constant 0 : index
    %414 = vector.load %arg16[%c4_637, %c0_638] : memref<8x64xf32, #tpu.memory_space<vmem>>, vector<2x64xf32>
    tpu.vector_store %arg16[%c4_637, %c0_638], %413 {strides = array<i32>} : memref<8x64xf32, #tpu.memory_space<vmem>>, vector<2x64xf32>,
    %c28_639 = arith.constant 28 : index
    %c0_640 = arith.constant 0 : index
    %415 = vector.load %arg13[%c28_639, %c0_640] : memref<32x64xf32, #tpu.memory_space<vmem>>, vector<2x64xf32>
    %c6_641 = arith.constant 6 : index
    %c0_642 = arith.constant 0 : index
    %416 = vector.load %arg16[%c6_641, %c0_642] : memref<8x64xf32, #tpu.memory_space<vmem>>, vector<2x64xf32>
    tpu.vector_store %arg16[%c6_641, %c0_642], %415 {strides = array<i32>} : memref<8x64xf32, #tpu.memory_space<vmem>>, vector<2x64xf32>,
    %c384_643 = arith.constant 384 : index
    %c0_644 = arith.constant 0 : index
    %417 = vector.load %arg5[%c384_643, %c0_644] : memref<576x64xf32, #tpu.memory_space<vmem>>, vector<64x64xf32>
    %c0_645 = arith.constant 0 : index
    %c0_646 = arith.constant 0 : index
    %418 = vector.load %arg16[%c0_645, %c0_646] : memref<8x64xf32, #tpu.memory_space<vmem>>, vector<8x64xf32>
    %cst_647 = arith.constant dense<0.000000e+00> : vector<8x64xf32>
    %419 = tpu.matmul %418, %417, %cst_647 {dimension_numbers = #tpu.dot_dimension_numbers<[1], [0], [0], [1], [0, 0, 1, 1], [], []>} : vector<8x64xf32>, vector<64x64xf32>, vector<8x64xf32> -> vector<8x64xf32>
    %420 = arith.addf %408, %419 : vector<8x64xf32>
    %c9_648 = arith.constant 9 : index
    %c0_649 = arith.constant 0 : index
    %421 = vector.load %arg13[%c9_648, %c0_649] : memref<32x64xf32, #tpu.memory_space<vmem>>, vector<2x64xf32>
    %c0_650 = arith.constant 0 : index
    %c0_651 = arith.constant 0 : index
    %422 = vector.load %arg16[%c0_650, %c0_651] : memref<8x64xf32, #tpu.memory_space<vmem>>, vector<2x64xf32>
    tpu.vector_store %arg16[%c0_650, %c0_651], %421 {strides = array<i32>} : memref<8x64xf32, #tpu.memory_space<vmem>>, vector<2x64xf32>,
    %c13_652 = arith.constant 13 : index
    %c0_653 = arith.constant 0 : index
    %423 = vector.load %arg13[%c13_652, %c0_653] : memref<32x64xf32, #tpu.memory_space<vmem>>, vector<2x64xf32>
    %c2_654 = arith.constant 2 : index
    %c0_655 = arith.constant 0 : index
    %424 = vector.load %arg16[%c2_654, %c0_655] : memref<8x64xf32, #tpu.memory_space<vmem>>, vector<2x64xf32>
    tpu.vector_store %arg16[%c2_654, %c0_655], %423 {strides = array<i32>} : memref<8x64xf32, #tpu.memory_space<vmem>>, vector<2x64xf32>,
    %c25_656 = arith.constant 25 : index
    %c0_657 = arith.constant 0 : index
    %425 = vector.load %arg13[%c25_656, %c0_657] : memref<32x64xf32, #tpu.memory_space<vmem>>, vector<2x64xf32>
    %c4_658 = arith.constant 4 : index
    %c0_659 = arith.constant 0 : index
    %426 = vector.load %arg16[%c4_658, %c0_659] : memref<8x64xf32, #tpu.memory_space<vmem>>, vector<2x64xf32>
    tpu.vector_store %arg16[%c4_658, %c0_659], %425 {strides = array<i32>} : memref<8x64xf32, #tpu.memory_space<vmem>>, vector<2x64xf32>,
    %c29 = arith.constant 29 : index
    %c0_660 = arith.constant 0 : index
    %427 = vector.load %arg13[%c29, %c0_660] : memref<32x64xf32, #tpu.memory_space<vmem>>, vector<2x64xf32>
    %c6_661 = arith.constant 6 : index
    %c0_662 = arith.constant 0 : index
    %428 = vector.load %arg16[%c6_661, %c0_662] : memref<8x64xf32, #tpu.memory_space<vmem>>, vector<2x64xf32>
    tpu.vector_store %arg16[%c6_661, %c0_662], %427 {strides = array<i32>} : memref<8x64xf32, #tpu.memory_space<vmem>>, vector<2x64xf32>,
    %c448_663 = arith.constant 448 : index
    %c0_664 = arith.constant 0 : index
    %429 = vector.load %arg5[%c448_663, %c0_664] : memref<576x64xf32, #tpu.memory_space<vmem>>, vector<64x64xf32>
    %c0_665 = arith.constant 0 : index
    %c0_666 = arith.constant 0 : index
    %430 = vector.load %arg16[%c0_665, %c0_666] : memref<8x64xf32, #tpu.memory_space<vmem>>, vector<8x64xf32>
    %cst_667 = arith.constant dense<0.000000e+00> : vector<8x64xf32>
    %431 = tpu.matmul %430, %429, %cst_667 {dimension_numbers = #tpu.dot_dimension_numbers<[1], [0], [0], [1], [0, 0, 1, 1], [], []>} : vector<8x64xf32>, vector<64x64xf32>, vector<8x64xf32> -> vector<8x64xf32>
    %432 = arith.addf %420, %431 : vector<8x64xf32>
    %c10_668 = arith.constant 10 : index
    %c0_669 = arith.constant 0 : index
    %433 = vector.load %arg13[%c10_668, %c0_669] : memref<32x64xf32, #tpu.memory_space<vmem>>, vector<2x64xf32>
    %c0_670 = arith.constant 0 : index
    %c0_671 = arith.constant 0 : index
    %434 = vector.load %arg16[%c0_670, %c0_671] : memref<8x64xf32, #tpu.memory_space<vmem>>, vector<2x64xf32>
    tpu.vector_store %arg16[%c0_670, %c0_671], %433 {strides = array<i32>} : memref<8x64xf32, #tpu.memory_space<vmem>>, vector<2x64xf32>,
    %c14 = arith.constant 14 : index
    %c0_672 = arith.constant 0 : index
    %435 = vector.load %arg13[%c14, %c0_672] : memref<32x64xf32, #tpu.memory_space<vmem>>, vector<2x64xf32>
    %c2_673 = arith.constant 2 : index
    %c0_674 = arith.constant 0 : index
    %436 = vector.load %arg16[%c2_673, %c0_674] : memref<8x64xf32, #tpu.memory_space<vmem>>, vector<2x64xf32>
    tpu.vector_store %arg16[%c2_673, %c0_674], %435 {strides = array<i32>} : memref<8x64xf32, #tpu.memory_space<vmem>>, vector<2x64xf32>,
    %c26_675 = arith.constant 26 : index
    %c0_676 = arith.constant 0 : index
    %437 = vector.load %arg13[%c26_675, %c0_676] : memref<32x64xf32, #tpu.memory_space<vmem>>, vector<2x64xf32>
    %c4_677 = arith.constant 4 : index
    %c0_678 = arith.constant 0 : index
    %438 = vector.load %arg16[%c4_677, %c0_678] : memref<8x64xf32, #tpu.memory_space<vmem>>, vector<2x64xf32>
    tpu.vector_store %arg16[%c4_677, %c0_678], %437 {strides = array<i32>} : memref<8x64xf32, #tpu.memory_space<vmem>>, vector<2x64xf32>,
    %c30 = arith.constant 30 : index
    %c0_679 = arith.constant 0 : index
    %439 = vector.load %arg13[%c30, %c0_679] : memref<32x64xf32, #tpu.memory_space<vmem>>, vector<2x64xf32>
    %c6_680 = arith.constant 6 : index
    %c0_681 = arith.constant 0 : index
    %440 = vector.load %arg16[%c6_680, %c0_681] : memref<8x64xf32, #tpu.memory_space<vmem>>, vector<2x64xf32>
    tpu.vector_store %arg16[%c6_680, %c0_681], %439 {strides = array<i32>} : memref<8x64xf32, #tpu.memory_space<vmem>>, vector<2x64xf32>,
    %c512 = arith.constant 512 : index
    %c0_682 = arith.constant 0 : index
    %441 = vector.load %arg5[%c512, %c0_682] : memref<576x64xf32, #tpu.memory_space<vmem>>, vector<64x64xf32>
    %c0_683 = arith.constant 0 : index
    %c0_684 = arith.constant 0 : index
    %442 = vector.load %arg16[%c0_683, %c0_684] : memref<8x64xf32, #tpu.memory_space<vmem>>, vector<8x64xf32>
    %cst_685 = arith.constant dense<0.000000e+00> : vector<8x64xf32>
    %443 = tpu.matmul %442, %441, %cst_685 {dimension_numbers = #tpu.dot_dimension_numbers<[1], [0], [0], [1], [0, 0, 1, 1], [], []>} : vector<8x64xf32>, vector<64x64xf32>, vector<8x64xf32> -> vector<8x64xf32>
    %444 = arith.addf %432, %443 : vector<8x64xf32>
    %c0_686 = arith.constant 0 : index
    %c0_687 = arith.constant 0 : index
    %445 = vector.load %arg6[%c0_686, %c0_687] : memref<1x64xf32, #tpu.memory_space<vmem>>, vector<1x64xf32>
    %446 = vector.broadcast %445 : vector<1x64xf32> to vector<8x64xf32>
    %447 = arith.addf %444, %446 : vector<8x64xf32>
    %cst_688 = arith.constant 0.000000e+00 : f32
    %448 = vector.broadcast %cst_688 : f32 to vector<8x64xf32>
    %449 = arith.maximumf %447, %448 : vector<8x64xf32>
    %c0_689 = arith.constant 0 : index
    %c0_690 = arith.constant 0 : index
    %450 = vector.load %arg14[%c0_689, %c0_690] : memref<8x64xf32, #tpu.memory_space<vmem>>, vector<8x64xf32>
    tpu.vector_store %arg14[%c0_689, %c0_690], %449 {strides = array<i32>} : memref<8x64xf32, #tpu.memory_space<vmem>>, vector<8x64xf32>,
    %cst_691 = arith.constant 0.000000e+00 : f32
    %451 = vector.broadcast %cst_691 : f32 to vector<1x512xf32>
    %c0_692 = arith.constant 0 : index
    %c0_693 = arith.constant 0 : index
    %452 = vector.load %arg14[%c0_692, %c0_693] : memref<8x64xf32, #tpu.memory_space<vmem>>, vector<1x64xf32>
    %c0_694 = arith.constant 0 : index
    %c0_695 = arith.constant 0 : index
    %453 = vector.load %arg7[%c0_694, %c0_695] : memref<256x512xf32, #tpu.memory_space<vmem>>, vector<64x512xf32>
    %cst_696 = arith.constant dense<0.000000e+00> : vector<1x512xf32>
    %454 = tpu.matmul %452, %453, %cst_696 {dimension_numbers = #tpu.dot_dimension_numbers<[1], [0], [0], [1], [0, 0, 1, 1], [], []>} : vector<1x64xf32>, vector<64x512xf32>, vector<1x512xf32> -> vector<1x512xf32>
    %455 = arith.addf %451, %454 : vector<1x512xf32>
    %c1_697 = arith.constant 1 : index
    %c0_698 = arith.constant 0 : index
    %456 = vector.load %arg14[%c1_697, %c0_698] : memref<8x64xf32, #tpu.memory_space<vmem>>, vector<1x64xf32>
    %c64_699 = arith.constant 64 : index
    %c0_700 = arith.constant 0 : index
    %457 = vector.load %arg7[%c64_699, %c0_700] : memref<256x512xf32, #tpu.memory_space<vmem>>, vector<64x512xf32>
    %cst_701 = arith.constant dense<0.000000e+00> : vector<1x512xf32>
    %458 = tpu.matmul %456, %457, %cst_701 {dimension_numbers = #tpu.dot_dimension_numbers<[1], [0], [0], [1], [0, 0, 1, 1], [], []>} : vector<1x64xf32>, vector<64x512xf32>, vector<1x512xf32> -> vector<1x512xf32>
    %459 = arith.addf %455, %458 : vector<1x512xf32>
    %c2_702 = arith.constant 2 : index
    %c0_703 = arith.constant 0 : index
    %460 = vector.load %arg14[%c2_702, %c0_703] : memref<8x64xf32, #tpu.memory_space<vmem>>, vector<1x64xf32>
    %c128_704 = arith.constant 128 : index
    %c0_705 = arith.constant 0 : index
    %461 = vector.load %arg7[%c128_704, %c0_705] : memref<256x512xf32, #tpu.memory_space<vmem>>, vector<64x512xf32>
    %cst_706 = arith.constant dense<0.000000e+00> : vector<1x512xf32>
    %462 = tpu.matmul %460, %461, %cst_706 {dimension_numbers = #tpu.dot_dimension_numbers<[1], [0], [0], [1], [0, 0, 1, 1], [], []>} : vector<1x64xf32>, vector<64x512xf32>, vector<1x512xf32> -> vector<1x512xf32>
    %463 = arith.addf %459, %462 : vector<1x512xf32>
    %c3 = arith.constant 3 : index
    %c0_707 = arith.constant 0 : index
    %464 = vector.load %arg14[%c3, %c0_707] : memref<8x64xf32, #tpu.memory_space<vmem>>, vector<1x64xf32>
    %c192_708 = arith.constant 192 : index
    %c0_709 = arith.constant 0 : index
    %465 = vector.load %arg7[%c192_708, %c0_709] : memref<256x512xf32, #tpu.memory_space<vmem>>, vector<64x512xf32>
    %cst_710 = arith.constant dense<0.000000e+00> : vector<1x512xf32>
    %466 = tpu.matmul %464, %465, %cst_710 {dimension_numbers = #tpu.dot_dimension_numbers<[1], [0], [0], [1], [0, 0, 1, 1], [], []>} : vector<1x64xf32>, vector<64x512xf32>, vector<1x512xf32> -> vector<1x512xf32>
    %467 = arith.addf %463, %466 : vector<1x512xf32>
    %c0_711 = arith.constant 0 : index
    %c0_712 = arith.constant 0 : index
    %468 = vector.load %arg8[%c0_711, %c0_712] : memref<1x512xf32, #tpu.memory_space<vmem>>, vector<1x512xf32>
    %469 = arith.addf %467, %468 : vector<1x512xf32>
    %cst_713 = arith.constant 0.000000e+00 : f32
    %470 = vector.broadcast %cst_713 : f32 to vector<1x512xf32>
    %471 = arith.maximumf %469, %470 : vector<1x512xf32>
    %c0_714 = arith.constant 0 : index
    %c0_715 = arith.constant 0 : index
    %472 = vector.load %arg9[%c0_714, %c0_715] : memref<512x1xf32, #tpu.memory_space<vmem>>, vector<512x1xf32>
    %cst_716 = arith.constant dense<0.000000e+00> : vector<1x1xf32>
    %473 = tpu.matmul %471, %472, %cst_716 {dimension_numbers = #tpu.dot_dimension_numbers<[1], [0], [0], [1], [0, 0, 1, 1], [], []>} : vector<1x512xf32>, vector<512x1xf32>, vector<1x1xf32> -> vector<1x1xf32>
    %c0_717 = arith.constant 0 : index
    %c0_718 = arith.constant 0 : index
    %474 = vector.load %arg10[%c0_717, %c0_718] : memref<1x1xf32, #tpu.memory_space<vmem>>, vector<1x1xf32>
    %475 = arith.addf %473, %474 : vector<1x1xf32>
    %c0_719 = arith.constant 0 : index
    %c0_720 = arith.constant 0 : index
    %476 = vector.load %arg11[%c0_719, %c0_720] : memref<2x1xf32, #tpu.memory_space<vmem>>, vector<1x1xf32>
    tpu.vector_store %arg11[%c0_719, %c0_720], %475 {strides = array<i32>} : memref<2x1xf32, #tpu.memory_space<vmem>>, vector<1x1xf32>,
    %cst_721 = arith.constant 0.000000e+00 : f32
    %477 = vector.broadcast %cst_721 : f32 to vector<1x512xf32>
    %c4_722 = arith.constant 4 : index
    %c0_723 = arith.constant 0 : index
    %478 = vector.load %arg14[%c4_722, %c0_723] : memref<8x64xf32, #tpu.memory_space<vmem>>, vector<1x64xf32>
    %c0_724 = arith.constant 0 : index
    %c0_725 = arith.constant 0 : index
    %479 = vector.load %arg7[%c0_724, %c0_725] : memref<256x512xf32, #tpu.memory_space<vmem>>, vector<64x512xf32>
    %cst_726 = arith.constant dense<0.000000e+00> : vector<1x512xf32>
    %480 = tpu.matmul %478, %479, %cst_726 {dimension_numbers = #tpu.dot_dimension_numbers<[1], [0], [0], [1], [0, 0, 1, 1], [], []>} : vector<1x64xf32>, vector<64x512xf32>, vector<1x512xf32> -> vector<1x512xf32>
    %481 = arith.addf %477, %480 : vector<1x512xf32>
    %c5_727 = arith.constant 5 : index
    %c0_728 = arith.constant 0 : index
    %482 = vector.load %arg14[%c5_727, %c0_728] : memref<8x64xf32, #tpu.memory_space<vmem>>, vector<1x64xf32>
    %c64_729 = arith.constant 64 : index
    %c0_730 = arith.constant 0 : index
    %483 = vector.load %arg7[%c64_729, %c0_730] : memref<256x512xf32, #tpu.memory_space<vmem>>, vector<64x512xf32>
    %cst_731 = arith.constant dense<0.000000e+00> : vector<1x512xf32>
    %484 = tpu.matmul %482, %483, %cst_731 {dimension_numbers = #tpu.dot_dimension_numbers<[1], [0], [0], [1], [0, 0, 1, 1], [], []>} : vector<1x64xf32>, vector<64x512xf32>, vector<1x512xf32> -> vector<1x512xf32>
    %485 = arith.addf %481, %484 : vector<1x512xf32>
    %c6_732 = arith.constant 6 : index
    %c0_733 = arith.constant 0 : index
    %486 = vector.load %arg14[%c6_732, %c0_733] : memref<8x64xf32, #tpu.memory_space<vmem>>, vector<1x64xf32>
    %c128_734 = arith.constant 128 : index
    %c0_735 = arith.constant 0 : index
    %487 = vector.load %arg7[%c128_734, %c0_735] : memref<256x512xf32, #tpu.memory_space<vmem>>, vector<64x512xf32>
    %cst_736 = arith.constant dense<0.000000e+00> : vector<1x512xf32>
    %488 = tpu.matmul %486, %487, %cst_736 {dimension_numbers = #tpu.dot_dimension_numbers<[1], [0], [0], [1], [0, 0, 1, 1], [], []>} : vector<1x64xf32>, vector<64x512xf32>, vector<1x512xf32> -> vector<1x512xf32>
    %489 = arith.addf %485, %488 : vector<1x512xf32>
    %c7_737 = arith.constant 7 : index
    %c0_738 = arith.constant 0 : index
    %490 = vector.load %arg14[%c7_737, %c0_738] : memref<8x64xf32, #tpu.memory_space<vmem>>, vector<1x64xf32>
    %c192_739 = arith.constant 192 : index
    %c0_740 = arith.constant 0 : index
    %491 = vector.load %arg7[%c192_739, %c0_740] : memref<256x512xf32, #tpu.memory_space<vmem>>, vector<64x512xf32>
    %cst_741 = arith.constant dense<0.000000e+00> : vector<1x512xf32>
    %492 = tpu.matmul %490, %491, %cst_741 {dimension_numbers = #tpu.dot_dimension_numbers<[1], [0], [0], [1], [0, 0, 1, 1], [], []>} : vector<1x64xf32>, vector<64x512xf32>, vector<1x512xf32> -> vector<1x512xf32>
    %493 = arith.addf %489, %492 : vector<1x512xf32>
    %c0_742 = arith.constant 0 : index
    %c0_743 = arith.constant 0 : index
    %494 = vector.load %arg8[%c0_742, %c0_743] : memref<1x512xf32, #tpu.memory_space<vmem>>, vector<1x512xf32>
    %495 = arith.addf %493, %494 : vector<1x512xf32>
    %cst_744 = arith.constant 0.000000e+00 : f32
    %496 = vector.broadcast %cst_744 : f32 to vector<1x512xf32>
    %497 = arith.maximumf %495, %496 : vector<1x512xf32>
    %c0_745 = arith.constant 0 : index
    %c0_746 = arith.constant 0 : index
    %498 = vector.load %arg9[%c0_745, %c0_746] : memref<512x1xf32, #tpu.memory_space<vmem>>, vector<512x1xf32>
    %cst_747 = arith.constant dense<0.000000e+00> : vector<1x1xf32>
    %499 = tpu.matmul %497, %498, %cst_747 {dimension_numbers = #tpu.dot_dimension_numbers<[1], [0], [0], [1], [0, 0, 1, 1], [], []>} : vector<1x512xf32>, vector<512x1xf32>, vector<1x1xf32> -> vector<1x1xf32>
    %c0_748 = arith.constant 0 : index
    %c0_749 = arith.constant 0 : index
    %500 = vector.load %arg10[%c0_748, %c0_749] : memref<1x1xf32, #tpu.memory_space<vmem>>, vector<1x1xf32>
    %501 = arith.addf %499, %500 : vector<1x1xf32>
    %c1_750 = arith.constant 1 : index
    %c0_751 = arith.constant 0 : index
    %502 = vector.load %arg11[%c1_750, %c0_751] : memref<2x1xf32, #tpu.memory_space<vmem>>, vector<1x1xf32>
    tpu.vector_store %arg11[%c1_750, %c0_751], %501 {strides = array<i32>} : memref<2x1xf32, #tpu.memory_space<vmem>>, vector<1x1xf32>,
    return
  }
}

</mosaic_0001>

<bundles_post_ra>
// kernel: forward.1
= control target key start
LH: loop header
LB: loop body
LE: loop exit
PB: predicated region body
PF: predicated region fallthrough
CT: control target
= control target key end

     0   :  { %v6774_v0 = vmov 0.0|0.0   ;;  %vm392_vm0 = vcmask 261120   ;;  %vm426_vm1 = vcmask 257024   ;;  %vm423_vm2 = vcmask 254976   ;;  %s8986_s1 = inlined_call_operand.vmem [shape: f32[256,32], index: 1, kind: input, shape index: {}]   ;;  %s8987_s0 = inlined_call_operand.vmem [shape: f32[242,256], index: 0, kind: input, shape index: {}]   ;;  %s8988_s3 = inlined_call_operand.vmem [shape: f32[512,64], index: 3, kind: input, shape index: {}]   ;;  %s8989_s2 = inlined_call_operand.vmem [shape: f32[1,32], index: 2, kind: input, shape index: {}]   ;;  %s8990_s5 = inlined_call_operand.vmem [shape: f32[576,64], index: 5, kind: input, shape index: {}]   ;;  %s8991_s4 = inlined_call_operand.vmem [shape: f32[1,64], index: 4, kind: input, shape index: {}]   ;;  %s8992_s7 = inlined_call_operand.vmem [shape: f32[256,512], index: 7, kind: input, shape index: {}]   ;;  %s8993_s6 = inlined_call_operand.vmem [shape: f32[1,64], index: 6, kind: input, shape index: {}]   ;;  %s8994_s9 = inlined_call_operand.vmem [shape: f32[512,1], index: 9, kind: input, shape index: {}]   ;;  %s8995_s8 = inlined_call_operand.vmem [shape: f32[1,512], index: 8, kind: input, shape index: {}]   ;;  %s8996_s10 = inlined_call_operand.<no memory space> [shape: f32[1,1], index: 10, kind: input, shape index: {}]   ;;  %s8997_s11 = inlined_call_operand.vmem [shape: f32[2,1], index: 11, kind: output, shape index: {}]  }
   0x1   :  { %6019 = vmatprep.subr.bf16.mxu0 %v6774_v0  ;;  %v102_v1 = vld [vmem:[%s8986_s1] sm:$0xff]  ;;  %v103_v2 = vld [vmem:[%s8986_s1 + $0x8] sm:$0xff]  ;;  %v104_v3 = vld [vmem:[%s8986_s1 + $0x10] sm:$0xff]  ;;  %vm6775_vm3 = vmmov 0   ;;  %vm2433_vm4 = vcmask 523264   ;;  %vm2439_vm5 = vcmask 517120  }
   0x2   :  { %v6020_v4 = vpack.c.bf16 %v103_v2, %v102_v1  ;;  %v105_v5 = vld [vmem:[%s8986_s1 + $0x18] sm:$0xff]  ;;  %v106_v7 = vld [vmem:[%s8986_s1 + $0x20] sm:$0xff]  ;;  %v107_v8 = vld [vmem:[%s8986_s1 + $0x28] sm:$0xff]  ;;  %vm4221_vm6 = vcmask 0  }
   0x3   :  { %v6023_v6 = vpack.c.bf16 %v105_v5, %v104_v3  ;;  %v6026_v9 = vpack.c.bf16 %v107_v8, %v106_v7  ;;  %v108_v10 = vld [vmem:[%s8986_s1 + $0x30] sm:$0xff]  ;;  %v109_v11 = vld [vmem:[%s8986_s1 + $0x38] sm:$0xff]  ;;  %v41_v12 = vld [vmem:[%s8987_s0 + $0x8] sm:$0xff] }
   0x4   :  { %6021 = vmatpush1.bf16.msra.mxu0 %v6020_v4  ;;  %v6029_v13 = vpack.c.bf16 %v109_v11, %v108_v10  ;;  %205 = vmatprep.mubr.f32.mxu0 %v41_v12  ;;  %v110_v14 = vld [vmem:[%s8986_s1 + $0x40] sm:$0xff]  ;;  %v111_v15 = vld [vmem:[%s8986_s1 + $0x48] sm:$0xff]  ;;  %v112_v17 = vld [vmem:[%s8986_s1 + $0x50] sm:$0xff] }
   0x5   :  { %6022 = vmatprep.subr.bf16.mxu0 %v6774_v0  ;;  %v6032_v16 = vpack.c.bf16 %v111_v15, %v110_v14  ;;  %v113_v18 = vld [vmem:[%s8986_s1 + $0x58] sm:$0xff]  ;;  %v114_v20 = vld [vmem:[%s8986_s1 + $0x60] sm:$0xff]  ;;  %v115_v21 = vld [vmem:[%s8986_s1 + $0x68] sm:$0xff] }
   0x6   :  { %v6035_v19 = vpack.c.bf16 %v113_v18, %v112_v17  ;;  %v6038_v22 = vpack.c.bf16 %v115_v21, %v114_v20  ;;  %v116_v23 = vld [vmem:[%s8986_s1 + $0x70] sm:$0xff]  ;;  %v117_v24 = vld [vmem:[%s8986_s1 + $0x78] sm:$0xff]  ;;  %v118_v26 = vld [vmem:[%s8986_s1 + $0x80] sm:$0xff] }
   0x7   :  { %v6041_v25 = vpack.c.bf16 %v117_v24, %v116_v23  ;;  %v119_v27 = vld [vmem:[%s8986_s1 + $0x88] sm:$0xff]  ;;  %v120_v29 = vld [vmem:[%s8986_s1 + $0x90] sm:$0xff]  ;;  %v121_v30 = vld [vmem:[%s8986_s1 + $0x98] sm:$0xff] }
   0x8   :  { %6024 = vmatpush1.bf16.msra.mxu0 %v6023_v6  ;;  %v6044_v28 = vpack.c.bf16 %v119_v27, %v118_v26  ;;  %v6047_v31 = vpack.c.bf16 %v121_v30, %v120_v29  ;;  %v122_v32 = vld [vmem:[%s8986_s1 + $0xa0] sm:$0xff]  ;;  %v123_v33 = vld [vmem:[%s8986_s1 + $0xa8] sm:$0xff]  ;;  %v124_v35 = vld [vmem:[%s8986_s1 + $0xb0] sm:$0xff] }
   0x9   :  { %6025 = vmatprep.subr.bf16.mxu0 %v6774_v0  ;;  %v6050_v34 = vpack.c.bf16 %v123_v33, %v122_v32  ;;  %v125_v36 = vld [vmem:[%s8986_s1 + $0xb8] sm:$0xff]  ;;  %v126_v38 = vld [vmem:[%s8986_s1 + $0xc0] sm:$0xff]  ;;  %v127_v39 = vld [vmem:[%s8986_s1 + $0xc8] sm:$0xff] }
   0xa   :  { %v6053_v37 = vpack.c.bf16 %v125_v36, %v124_v35  ;;  %v6056_v40 = vpack.c.bf16 %v127_v39, %v126_v38  ;;  %v128_v41 = vld [vmem:[%s8986_s1 + $0xd0] sm:$0xff]  ;;  %v129_v42 = vld [vmem:[%s8986_s1 + $0xd8] sm:$0xff]  ;;  %v130_v44 = vld [vmem:[%s8986_s1 + $0xe0] sm:$0xff] }
   0xb   :  { %v6059_v43 = vpack.c.bf16 %v129_v42, %v128_v41  ;;  %v131_v45 = vld [vmem:[%s8986_s1 + $0xe8] sm:$0xff]  ;;  %v132_v47 = vld [vmem:[%s8986_s1 + $0xf0] sm:$0xff]  ;;  %v133_v48 = vld [vmem:[%s8986_s1 + $0xf8] sm:$0xff] }
   0xc   :  { %6027 = vmatpush1.bf16.msra.mxu0 %v6026_v9  ;;  %v6062_v46 = vpack.c.bf16 %v131_v45, %v130_v44  ;;  %v6065_v49 = vpack.c.bf16 %v133_v48, %v132_v47  ;;  %v40_v50 = vld [vmem:[%s8987_s0] sm:$0xff]  ;;  %v43_v51 = vld [vmem:[%s8987_s0 + $0x18] sm:$0xff]  ;;  %v42_v52 = vld [vmem:[%s8987_s0 + $0x10] sm:$0xff] }
   0xd   :  { %6028 = vmatprep.subr.bf16.mxu0 %v6774_v0  ;;  %v45_v53 = vld [vmem:[%s8987_s0 + $0x28] sm:$0xff]  ;;  %v44_v54 = vld [vmem:[%s8987_s0 + $0x20] sm:$0xff]  ;;  %v47_v55 = vld [vmem:[%s8987_s0 + $0x38] sm:$0xff] }
   0xe   :  { %v46_v56 = vld [vmem:[%s8987_s0 + $0x30] sm:$0xff]  ;;  %v49_v57 = vld [vmem:[%s8987_s0 + $0x48] sm:$0xff]  ;;  %v48_v58 = vld [vmem:[%s8987_s0 + $0x40] sm:$0xff] }
   0xf   :  { %v51_v59 = vld [vmem:[%s8987_s0 + $0x58] sm:$0xff]  ;;  %v50_v60 = vld [vmem:[%s8987_s0 + $0x50] sm:$0xff]  ;;  %v53_v61 = vld [vmem:[%s8987_s0 + $0x68] sm:$0xff] }
  0x10   :  { %6030 = vmatpush1.bf16.msra.mxu0 %v6029_v13  ;;  %v52_v62 = vld [vmem:[%s8987_s0 + $0x60] sm:$0xff]  ;;  %v55_v63 = vld [vmem:[%s8987_s0 + $0x78] sm:$0xff]  ;;  %v54_v1 = vld [vmem:[%s8987_s0 + $0x70] sm:$0xff] }
  0x11   :  { %6031 = vmatprep.subr.bf16.mxu0 %v6774_v0  ;;  %v57_v2 = vld [vmem:[%s8987_s0 + $0x88] sm:$0xff]  ;;  %v56_v3 = vld [vmem:[%s8987_s0 + $0x80] sm:$0xff]  ;;  %v59_v4 = vld [vmem:[%s8987_s0 + $0x98] sm:$0xff] }
  0x12   :  { %v58_v5 = vld [vmem:[%s8987_s0 + $0x90] sm:$0xff]  ;;  %v61_v6 = vld [vmem:[%s8987_s0 + $0xa8] sm:$0xff]  ;;  %v60_v7 = vld [vmem:[%s8987_s0 + $0xa0] sm:$0xff] }
  0x13   :  { %v63_v8 = vld [vmem:[%s8987_s0 + $0xb8] sm:$0xff]  ;;  %v62_v9 = vld [vmem:[%s8987_s0 + $0xb0] sm:$0xff]  ;;  %v65_v10 = vld [vmem:[%s8987_s0 + $0xc8] sm:$0xff] }
  0x14   :  { %6033 = vmatpush1.bf16.msra.mxu0 %v6032_v16  ;;  %v64_v11 = vld [vmem:[%s8987_s0 + $0xc0] sm:$0xff]  ;;  %v67_v12 = vld [vmem:[%s8987_s0 + $0xd8] sm:$0xff]  ;;  %v66_v13 = vld [vmem:[%s8987_s0 + $0xd0] sm:$0xff] }
  0x15   :  { %6034 = vmatprep.subr.bf16.mxu0 %v6774_v0  ;;  %v69_v14 = vld [vmem:[%s8987_s0 + $0xe8] sm:$0xff]  ;;  %v68_v15 = vld [vmem:[%s8987_s0 + $0xe0] sm:$0xff]  ;;  %v71_v16 = vld [vmem:[%s8987_s0 + $0xf8] sm:$0xff] }
  0x16   :  { %v70_v17 = vld [vmem:[%s8987_s0 + $0xf0] sm:$0xff]  ;;  %v73_v18 = vld [vmem:[%s8987_s0 + $0x108] sm:$0xff]  ;;  %v75_v20 = vld [vmem:[%s8987_s0 + $0x118] sm:$0xff] }
  0x17   :  { %v74_v21 = vld [vmem:[%s8987_s0 + $0x110] sm:$0xff]  ;;  %v76_v23 = vld [vmem:[%s8987_s0 + $0x120] sm:$0xff]  ;;  %v79_v24 = vld [vmem:[%s8987_s0 + $0x138] sm:$0xff] }
  0x18   :  { %6036 = vmatpush1.bf16.msra.mxu0 %v6035_v19  ;;  %v72_v19 = vld [vmem:[%s8987_s0 + $0x100] sm:$0xff]  ;;  %v81_v26 = vld [vmem:[%s8987_s0 + $0x148] sm:$0xff]  ;;  %v82_v29 = vld [vmem:[%s8987_s0 + $0x150] sm:$0xff] }
  0x19   :  { %6037 = vmatprep.subr.bf16.mxu0 %v6774_v0  ;;  %v80_v27 = vld [vmem:[%s8987_s0 + $0x140] sm:$0xff]  ;;  %v85_v30 = vld [vmem:[%s8987_s0 + $0x168] sm:$0xff]  ;;  %v87_v32 = vld [vmem:[%s8987_s0 + $0x178] sm:$0xff] }
  0x1a   :  { %v86_v33 = vld [vmem:[%s8987_s0 + $0x170] sm:$0xff]  ;;  %v88_v35 = vld [vmem:[%s8987_s0 + $0x180] sm:$0xff]  ;;  %v91_v36 = vld [vmem:[%s8987_s0 + $0x198] sm:$0xff] }
  0x1b   :  { %v93_v38 = vld [vmem:[%s8987_s0 + $0x1a8] sm:$0xff]  ;;  %v92_v39 = vld [vmem:[%s8987_s0 + $0x1a0] sm:$0xff]  ;;  %v94_v41 = vld [vmem:[%s8987_s0 + $0x1b0] sm:$0xff] }
  0x1c   :  { %6039 = vmatpush1.bf16.msra.mxu0 %v6038_v22  ;;  %v77_v22 = vld [vmem:[%s8987_s0 + $0x128] sm:$0xff]  ;;  %v99_v44 = vld [vmem:[%s8987_s0 + $0x1d8] sm:$0xff]  ;;  %v98_v45 = vld [vmem:[%s8987_s0 + $0x1d0] sm:$0xff] }
  0x1d   :  { %6040 = vmatprep.subr.bf16.mxu0 %v6774_v0  ;;  %v97_v42 = vld [vmem:[%s8987_s0 + $0x1c8] sm:$0xff]  ;;  %v100_v47 = vld [vmem:[%s8987_s0 + $0x1e0] sm:$0x3] }
  0x1e   :  { %v466_v48 = vld [vmem:[%s8988_s3 + $0x20] sm:$0xff] }
  0x20   :  { %6042 = vmatpush1.bf16.msra.mxu0 %v6041_v25  ;;  %v78_v25 = vld [vmem:[%s8987_s0 + $0x130] sm:$0xff] }
  0x21   :  { %6043 = vmatprep.subr.bf16.mxu0 %v6774_v0 }
  0x24   :  { %6045 = vmatpush1.bf16.msra.mxu0 %v6044_v28  ;;  %v83_v28 = vld [vmem:[%s8987_s0 + $0x158] sm:$0xff] }
  0x25   :  { %6046 = vmatprep.subr.bf16.mxu0 %v6774_v0 }
  0x28   :  { %6048 = vmatpush1.bf16.msra.mxu0 %v6047_v31  ;;  %v84_v31 = vld [vmem:[%s8987_s0 + $0x160] sm:$0xff] }
  0x29   :  { %6049 = vmatprep.subr.bf16.mxu0 %v6774_v0 }
  0x2c   :  { %6051 = vmatpush1.bf16.msra.mxu0 %v6050_v34  ;;  %v89_v34 = vld [vmem:[%s8987_s0 + $0x188] sm:$0xff] }
  0x2d   :  { %6052 = vmatprep.subr.bf16.mxu0 %v6774_v0 }
  0x30   :  { %6054 = vmatpush1.bf16.msra.mxu0 %v6053_v37  ;;  %v90_v37 = vld [vmem:[%s8987_s0 + $0x190] sm:$0xff] }
  0x31   :  { %6055 = vmatprep.subr.bf16.mxu0 %v6774_v0 }
  0x34   :  { %6057 = vmatpush1.bf16.msra.mxu0 %v6056_v40  ;;  %v95_v40 = vld [vmem:[%s8987_s0 + $0x1b8] sm:$0xff] }
  0x35   :  { %6058 = vmatprep.subr.bf16.mxu0 %v6774_v0 }
  0x38   :  { %6060 = vmatpush1.bf16.msra.mxu0 %v6059_v43  ;;  %v96_v43 = vld [vmem:[%s8987_s0 + $0x1c0] sm:$0xff] }
  0x39   :  { %6061 = vmatprep.subr.bf16.mxu0 %v6774_v0 }
  0x3c   :  { %6063 = vmatpush1.bf16.msra.mxu0 %v6062_v46  ;;  %v101_v46 = vld [vmem:[%s8987_s0 + $0x1e8] sm:$0x3] }
  0x3d   :  { %6064 = vmatprep.subr.bf16.mxu0 %v6774_v0 }
  0x40   :  { %6066 = vmatpush1.bf16.msra.mxu0 %v6065_v49  ;;  %v467_v49 = vld [vmem:[%s8988_s3 + $0x28] sm:$0xff] }
  0x41   :  { %6231 = vmatprep.subr.bf16.mxu0 %v6774_v0 }
  0x43   :  { %206 = vmatmul.mubr.f32.vlgmr.msra.gmra.mrb[0].mxu0 %v40_v50  ;;  %v6067_v50 = vpack.c.bf16 %v467_v49, %v466_v48 }
  0x44   :  { %210 = vmatprep.mubr.f32.mxu0 %v43_v51  ;;  %v468_v51 = vld [vmem:[%s8988_s3 + $0x30] sm:$0xff] }
  0x45   :  { %6068 = vmatprep.subr.bf16.mxu1 %v6067_v50 }
  0x46   :  { %6070 = vmatpush3.bf16.msra.mxu1 %v6067_v50 }
  0x47   :  { %211 = vmatmul.mubr.f32.gmra.mrb[2].mxu0 %v42_v52  ;;  %v469_v52 = vld [vmem:[%s8988_s3 + $0x38] sm:$0xff] }
  0x48   :  { %215 = vmatprep.mubr.f32.mxu0 %v45_v53  ;;  %v6071_v53 = vpack.c.bf16 %v469_v52, %v468_v51 }
  0x4a   :  { %6072 = vmatprep.subr.bf16.mxu1 %v6071_v53 }
  0x4b   :  { %216 = vmatmul.mubr.f32.gmra.mrb[4].mxu0 %v44_v54  ;;  %6074 = vmatpush3.bf16.msra.mxu1 %v6071_v53  ;;  %v442_v54 = vld [vmem:[%s8988_s3] sm:$0xff] }
  0x4c   :  { %220 = vmatprep.mubr.f32.mxu0 %v47_v55  ;;  %v443_v55 = vld [vmem:[%s8988_s3 + $0x8] sm:$0xff] }
  0x4f   :  { %221 = vmatmul.mubr.f32.gmra.mrb[6].mxu0 %v46_v56  ;;  %v7154_v56 = vpack.c.bf16 %v443_v55, %v442_v54 }
  0x50   :  { %225 = vmatprep.mubr.f32.mxu0 %v49_v57  ;;  %v7160_v57 = vld [vmem:[%s8989_s2] ss:$0 sm:$0xff] }
  0x51   :  { %6076 = vmatprep.subr.bf16.mxu1 %v7154_v56 }
  0x53   :  { %226 = vmatmul.mubr.f32.gmra.mrb[8].mxu0 %v48_v58 }
  0x54   :  { %230 = vmatprep.mubr.f32.mxu0 %v51_v59 }
  0x57   :  { %231 = vmatmul.mubr.f32.gmra.mrb[10].mxu0 %v50_v60 }
  0x58   :  { %235 = vmatprep.mubr.f32.mxu0 %v53_v61 }
  0x5b   :  { %236 = vmatmul.mubr.f32.gmra.mrb[12].mxu0 %v52_v62 }
  0x5c   :  { %240 = vmatprep.mubr.f32.mxu0 %v55_v63 }
  0x5f   :  { %241 = vmatmul.mubr.f32.gmra.mrb[14].mxu0 %v54_v1 }
  0x60   :  { %245 = vmatprep.mubr.f32.mxu0 %v57_v2 }
  0x63   :  { %246 = vmatmul.mubr.f32.gmra.mrb[16].mxu0 %v56_v3 }
  0x64   :  { %250 = vmatprep.mubr.f32.mxu0 %v59_v4 }
  0x67   :  { %251 = vmatmul.mubr.f32.gmra.mrb[18].mxu0 %v58_v5 }
  0x68   :  { %255 = vmatprep.mubr.f32.mxu0 %v61_v6 }
  0x6b   :  { %256 = vmatmul.mubr.f32.gmra.mrb[20].mxu0 %v60_v7 }
  0x6c   :  { %260 = vmatprep.mubr.f32.mxu0 %v63_v8 }
  0x6f   :  { %261 = vmatmul.mubr.f32.gmra.mrb[22].mxu0 %v62_v9 }
  0x70   :  { %265 = vmatprep.mubr.f32.mxu0 %v65_v10 }
  0x73   :  { %266 = vmatmul.mubr.f32.gmra.mrb[24].mxu0 %v64_v11 }
  0x74   :  { %270 = vmatprep.mubr.f32.mxu0 %v67_v12 }
  0x77   :  { %271 = vmatmul.mubr.f32.gmra.mrb[26].mxu0 %v66_v13 }
  0x78   :  { %275 = vmatprep.mubr.f32.mxu0 %v69_v14 }
  0x7b   :  { %276 = vmatmul.mubr.f32.gmra.mrb[28].mxu0 %v68_v15 }
  0x7c   :  { %280 = vmatprep.mubr.f32.mxu0 %v71_v16 }
  0x7f   :  { %281 = vmatmul.mubr.f32.gmra.mrb[30].mxu0 %v70_v17 }
  0x80   :  { %285 = vmatprep.mubr.f32.mxu0 %v73_v18 }
  0x83   :  { %286 = vmatmul.mubr.f32.gmra.mrb[32].mxu0 %v72_v19 }
  0x84   :  { %290 = vmatprep.mubr.f32.mxu0 %v75_v20 }
  0x87   :  { %291 = vmatmul.mubr.f32.gmra.mrb[34].mxu0 %v74_v21 }
  0x88   :  { %295 = vmatprep.mubr.f32.mxu0 %v77_v22 }
  0x8b   :  { %296 = vmatmul.mubr.f32.gmra.mrb[36].mxu0 %v76_v23 }
  0x8c   :  { %300 = vmatprep.mubr.f32.mxu0 %v79_v24 }
  0x8f   :  { %301 = vmatmul.mubr.f32.gmra.mrb[38].mxu0 %v78_v25 }
  0x90   :  { %305 = vmatprep.mubr.f32.mxu0 %v81_v26 }
  0x93   :  { %306 = vmatmul.mubr.f32.gmra.mrb[40].mxu0 %v80_v27 }
  0x94   :  { %310 = vmatprep.mubr.f32.mxu0 %v83_v28 }
  0x97   :  { %311 = vmatmul.mubr.f32.gmra.mrb[42].mxu0 %v82_v29 }
  0x98   :  { %315 = vmatprep.mubr.f32.mxu0 %v85_v30 }
  0x9b   :  { %316 = vmatmul.mubr.f32.gmra.mrb[44].mxu0 %v84_v31 }
  0x9c   :  { %320 = vmatprep.mubr.f32.mxu0 %v87_v32 }
  0x9f   :  { %321 = vmatmul.mubr.f32.gmra.mrb[46].mxu0 %v86_v33 }
  0xa0   :  { %325 = vmatprep.mubr.f32.mxu0 %v89_v34 }
  0xa3   :  { %326 = vmatmul.mubr.f32.gmra.mrb[48].mxu0 %v88_v35 }
  0xa4   :  { %330 = vmatprep.mubr.f32.mxu0 %v91_v36 }
  0xa7   :  { %331 = vmatmul.mubr.f32.gmra.mrb[50].mxu0 %v90_v37 }
  0xa8   :  { %335 = vmatprep.mubr.f32.mxu0 %v93_v38 }
  0xab   :  { %336 = vmatmul.mubr.f32.gmra.mrb[52].mxu0 %v92_v39 }
  0xac   :  { %340 = vmatprep.mubr.f32.mxu0 %v95_v40 }
  0xaf   :  { %341 = vmatmul.mubr.f32.gmra.mrb[54].mxu0 %v94_v41 }
  0xb0   :  { %345 = vmatprep.mubr.f32.mxu0 %v97_v42 }
  0xb3   :  { %346 = vmatmul.mubr.f32.gmra.mrb[56].mxu0 %v96_v43 }
  0xb4   :  { %350 = vmatprep.mubr.f32.mxu0 %v99_v44 }
  0xb7   :  { %351 = vmatmul.mubr.f32.gmra.mrb[58].mxu0 %v98_v45 }
  0xb8   :  { %355 = vmatprep.mubr.f32.mxu0 %v101_v46 }
  0xbb   :  { %356 = vmatmul.mubr.f32.gmra.mrb[60].mxu0 %v100_v47 }
 0x116   :  { %v207_v58 = vpop.f32.mrb[0].mxu0 }
 0x117   :  { %v208_v59 = vadd.f32 %v7160_v57, %v207_v58  ;;  %v209_v60 = vpop.f32.mrb[1].mxu0 }
 0x119   :  { %v361_v61 = vmax.f32 %v208_v59, 0.0 }
 0x11a   :  { %v212_v62 = vpop.f32.mrb[2].mxu0 }
 0x11b   :  { %393 = vst.msk [vmem:[#allocation2] sm:$0xff] %vm392_vm0, %v361_v61  ;;  %v213_v63 = vadd.f32 %v7160_v57, %v212_v62  ;;  %v214_v1 = vpop.f32.mrb[3].mxu0 }
 0x11d   :  { %v362_v2 = vmax.f32 %v213_v63, 0.0 }
 0x11e   :  { %v217_v3 = vpop.f32.mrb[4].mxu0 }
 0x11f   :  { %394 = vst.msk [vmem:[#allocation2 + $0x8] sm:$0xff] %vm392_vm0, %v362_v2  ;;  %v218_v4 = vadd.f32 %v7160_v57, %v217_v3  ;;  %v219_v5 = vpop.f32.mrb[5].mxu0 }
 0x121   :  { %v363_v6 = vmax.f32 %v218_v4, 0.0 }
 0x122   :  { %v425_v7 = vld [vmem:[#allocation2] sm:$0xf]  ;;  %v222_v8 = vpop.f32.mrb[6].mxu0 }
 0x123   :  { %427 = vst.msk [vmem:[#allocation5] sm:$0xf] %vm426_vm1, %v425_v7  ;;  %v223_v9 = vadd.f32 %v7160_v57, %v222_v8  ;;  %v224_v10 = vpop.f32.mrb[7].mxu0 }
 0x124   :  { %395 = vst.msk [vmem:[#allocation2 + $0x10] sm:$0xff] %vm392_vm0, %v363_v6  ;;  %v445_v10 = vld [vmem:[%s8988_s3 + $0x18] sm:$0xff] }
 0x125   :  { %v364_v11 = vmax.f32 %v223_v9, 0.0  ;;  %v444_v9 = vld [vmem:[%s8988_s3 + $0x10] sm:$0xff] }
 0x126   :  { %v428_v12 = vld [vmem:[#allocation2 + $0x6] sm:$0xf]  ;;  %v430_v13 = vld [vmem:[#allocation2 + $0xc] sm:$0xf]  ;;  %v227_v14 = vpop.f32.mrb[8].mxu0 }
 0x127   :  { %429 = vst.msk [vmem:[#allocation5 + $0x4] sm:$0xf] %vm426_vm1, %v428_v12  ;;  %431 = vst.msk [vmem:[#allocation5 + $0x8] sm:$0xf] %vm426_vm1, %v430_v13  ;;  %v228_v15 = vadd.f32 %v7160_v57, %v227_v14  ;;  %v229_v16 = vpop.f32.mrb[9].mxu0 }
 0x128   :  { %396 = vst.msk [vmem:[#allocation2 + $0x18] sm:$0xff] %vm392_vm0, %v364_v11  ;;  %v668_v11 = vld [vmem:[#allocation2 + $0x1] sm:$0xf]  ;;  %v670_v12 = vld [vmem:[#allocation2 + $0x7] sm:$0xf] }
 0x129   :  { %v365_v18 = vmax.f32 %v228_v15, 0.0  ;;  %v684_v16 = vld [vmem:[%s8988_s3 + $0x40] sm:$0xff] }
 0x12a   :  { %v232_v19 = vpop.f32.mrb[10].mxu0 }
 0x12b   :  { %v432_v17 = vld [vmem:[#allocation2 + $0x12] sm:$0xf]  ;;  %v233_v20 = vadd.f32 %v7160_v57, %v232_v19  ;;  %v234_v21 = vpop.f32.mrb[11].mxu0  ;;  %397 = vst.msk [vmem:[#allocation2 + $0x20] sm:$0xff] %vm392_vm0, %v365_v18  ;;  %v672_v18 = vld [vmem:[#allocation2 + $0xd] sm:$0xf] }
 0x12c   :  { %433 = vst.msk [vmem:[#allocation5 + $0xc] sm:$0xf] %vm426_vm1, %v432_v17  ;;  %v685_v17 = vld [vmem:[%s8988_s3 + $0x48] sm:$0xff]  ;;  %v674_v19 = vld [vmem:[#allocation2 + $0x13] sm:$0xf] }
 0x12d   :  { %v366_v23 = vmax.f32 %v233_v20, 0.0 }
 0x12e   :  { %v237_v22 = vpop.f32.mrb[12].mxu0  ;;  %v7195_v54 = vld [vmem:[#allocation5] sm:$0xff] }
 0x12f   :  { %v238_v24 = vadd.f32 %v7160_v57, %v237_v22  ;;  %v239_v25 = vpop.f32.mrb[13].mxu0  ;;  %398 = vst.msk [vmem:[#allocation2 + $0x28] sm:$0xff] %vm392_vm0, %v366_v23  ;;  %v6079_v22 = vpack.c.bf16 %v445_v10, %v444_v9 }
 0x131   :  { %v367_v26 = vmax.f32 %v238_v24, 0.0 }
 0x132   :  { %v242_v27 = vpop.f32.mrb[14].mxu0  ;;  %v434_v30 = vld [vmem:[#allocation2 + $0x24] sm:$0xf] }
 0x133   :  { %399 = vst.msk [vmem:[#allocation2 + $0x30] sm:$0xff] %vm392_vm0, %v367_v26  ;;  %v243_v28 = vadd.f32 %v7160_v57, %v242_v27  ;;  %v244_v29 = vpop.f32.mrb[15].mxu0  ;;  %v7198_v60 = vld [vmem:[#allocation5 + $0x8] sm:$0xff] }
 0x134   :  { %435 = vst.msk [vmem:[#allocation5 + $0x10] sm:$0xf] %vm426_vm1, %v434_v30  ;;  %v7234_v30 = vpack.c.bf16 %v685_v17, %v684_v16 }
 0x135   :  { %v368_v31 = vmax.f32 %v243_v28, 0.0 }
 0x136   :  { %v247_v32 = vpop.f32.mrb[16].mxu0  ;;  %v436_v35 = vld [vmem:[#allocation2 + $0x2a] sm:$0xf] }
 0x137   :  { %400 = vst.msk [vmem:[#allocation2 + $0x38] sm:$0xff] %vm392_vm0, %v368_v31  ;;  %v248_v33 = vadd.f32 %v7160_v57, %v247_v32  ;;  %v249_v34 = vpop.f32.mrb[17].mxu0 }
 0x138   :  { %437 = vst.msk [vmem:[#allocation5 + $0x14] sm:$0xf] %vm426_vm1, %v436_v35 }
 0x139   :  { %v369_v36 = vmax.f32 %v248_v33, 0.0 }
 0x13a   :  { %v438_v37 = vld [vmem:[#allocation2 + $0x30] sm:$0xf]  ;;  %v252_v38 = vpop.f32.mrb[18].mxu0 }
 0x13b   :  { %439 = vst.msk [vmem:[#allocation5 + $0x18] sm:$0xf] %vm426_vm1, %v438_v37  ;;  %v253_v39 = vadd.f32 %v7160_v57, %v252_v38  ;;  %v254_v40 = vpop.f32.mrb[19].mxu0 }
 0x13c   :  { %401 = vst.msk [vmem:[#allocation2 + $0x40] sm:$0xff] %vm392_vm0, %v369_v36  ;;  %v678_v40 = vld [vmem:[#allocation2 + $0x2b] sm:$0xf] }
 0x13d   :  { %v370_v42 = vmax.f32 %v253_v39, 0.0  ;;  %v676_v39 = vld [vmem:[#allocation2 + $0x25] sm:$0xf] }
 0x13e   :  { %v440_v41 = vld [vmem:[#allocation2 + $0x36] sm:$0xf]  ;;  %v257_v43 = vpop.f32.mrb[20].mxu0 }
 0x13f   :  { %441 = vst.msk [vmem:[#allocation5 + $0x1c] sm:$0xf] %vm426_vm1, %v440_v41  ;;  %v258_v44 = vadd.f32 %v7160_v57, %v257_v43  ;;  %v259_v45 = vpop.f32.mrb[21].mxu0  ;;  %v7224_v20 = vld [vmem:[#allocation5 + $0x10] sm:$0xff] }
 0x140   :  { %402 = vst.msk [vmem:[#allocation2 + $0x48] sm:$0xff] %vm392_vm0, %v370_v42 }
 0x141   :  { %v371_v46 = vmax.f32 %v258_v44, 0.0 }
 0x142   :  { %v262_v47 = vpop.f32.mrb[22].mxu0 }
 0x143   :  { %v263_v48 = vadd.f32 %v7160_v57, %v262_v47  ;;  %v264_v49 = vpop.f32.mrb[23].mxu0  ;;  %403 = vst.msk [vmem:[#allocation2 + $0x50] sm:$0xff] %vm392_vm0, %v371_v46 }
 0x145   :  { %v372_v50 = vmax.f32 %v263_v48, 0.0 }
 0x146   :  { %v267_v51 = vpop.f32.mrb[24].mxu0  ;;  %v7236_v31 = vld [vmem:[#allocation5 + $0x18] sm:$0xff] }
 0x147   :  { %404 = vst.msk [vmem:[#allocation2 + $0x58] sm:$0xff] %vm392_vm0, %v372_v50  ;;  %v268_v52 = vadd.f32 %v7160_v57, %v267_v51  ;;  %v269_v53 = vpop.f32.mrb[25].mxu0  ;;  %v450_v55 = vld [vmem:[#allocation2 + $0x48] sm:$0xf] }
 0x148   :  { %451 = vst.msk [vmem:[#allocation5] sm:$0xf] %vm426_vm1, %v450_v55  ;;  %v793_v32 = vld [vmem:[#allocation2 + $0x49] sm:$0xf] }
 0x149   :  { %v373_v58 = vmax.f32 %v268_v52, 0.0 }
 0x14a   :  { %v272_v59 = vpop.f32.mrb[26].mxu0  ;;  %v452_v61 = vld [vmem:[#allocation2 + $0x4d] sm:$0xf]  ;;  %v454_v62 = vld [vmem:[#allocation2 + $0x52] sm:$0xf] }
 0x14b   :  { %405 = vst.msk [vmem:[#allocation2 + $0x60] sm:$0xff] %vm392_vm0, %v373_v58  ;;  %v273_v63 = vadd.f32 %v7160_v57, %v272_v59  ;;  %v274_v2 = vpop.f32.mrb[27].mxu0  ;;  %v795_v35 = vld [vmem:[#allocation2 + $0x4e] sm:$0xf]  ;;  %v682_v59 = vld [vmem:[#allocation2 + $0x37] sm:$0xf] }
 0x14c   :  { %453 = vst.msk [vmem:[#allocation5 + $0x4] sm:$0xf] %vm426_vm1, %v452_v61  ;;  %455 = vst.msk [vmem:[#allocation5 + $0x8] sm:$0xf] %vm426_vm1, %v454_v62  ;;  %v680_v58 = vld [vmem:[#allocation2 + $0x31] sm:$0xf] }
 0x14d   :  { %v374_v1 = vmax.f32 %v273_v63, 0.0  ;;  %v686_v61 = vld [vmem:[%s8988_s3 + $0x50] sm:$0xff]  ;;  %v687_v2 = vld [vmem:[%s8988_s3 + $0x58] sm:$0xff] }
 0x14e   :  { %v456_v3 = vld [vmem:[#allocation2 + $0x57] sm:$0xf]  ;;  %v277_v4 = vpop.f32.mrb[28].mxu0  ;;  %v6087_v10 = vpack.c.bf16 %v687_v2, %v686_v61 }
 0x14f   :  { %457 = vst.msk [vmem:[#allocation5 + $0xc] sm:$0xf] %vm426_vm1, %v456_v3  ;;  %v278_v5 = vadd.f32 %v7160_v57, %v277_v4  ;;  %v279_v6 = vpop.f32.mrb[29].mxu0  ;;  %v799_v41 = vld [vmem:[#allocation2 + $0x58] sm:$0xf]  ;;  %v1061_v2 = vld [vmem:[%s8988_s3 + $0xb0] sm:$0xff] }
 0x150   :  { %406 = vst.msk [vmem:[#allocation2 + $0x68] sm:$0xff] %vm392_vm0, %v374_v1 }
 0x151   :  { %v375_v7 = vmax.f32 %v278_v5, 0.0 }
 0x152   :  { %v282_v8 = vpop.f32.mrb[30].mxu0 }
 0x153   :  { %v470_v13 = vld [vmem:[#allocation5] sm:$0xff]  ;;  %v283_v14 = vadd.f32 %v7160_v57, %v282_v8  ;;  %v284_v15 = vpop.f32.mrb[31].mxu0  ;;  %407 = vst.msk [vmem:[#allocation2 + $0x70] sm:$0xff] %vm392_vm0, %v375_v7 }
 0x154   :  { %669 = vst.msk [vmem:[#allocation5] sm:$0xf] %vm426_vm1, %v668_v11  ;;  %671 = vst.msk [vmem:[#allocation5 + $0x4] sm:$0xf] %vm426_vm1, %v670_v12  ;;  %5632 = vmatprep.mubr.msk.f32.mxu1 %vm392_vm0, %v470_v13  ;;  %v809_v11 = vld [vmem:[%s8988_s3 + $0x60] sm:$0xff] }
 0x155   :  { %v376_v21 = vmax.f32 %v283_v14, 0.0  ;;  %v810_v14 = vld [vmem:[%s8988_s3 + $0x68] sm:$0xff] }
 0x156   :  { %v471_v23 = vld [vmem:[#allocation5 + $0x8] sm:$0xff]  ;;  %v287_v26 = vpop.f32.mrb[32].mxu0 }
 0x157   :  { %v458_v24 = vld [vmem:[#allocation2 + $0x66] sm:$0xf]  ;;  %v460_v25 = vld [vmem:[#allocation2 + $0x6b] sm:$0xf]  ;;  %673 = vst.msk [vmem:[#allocation5 + $0x8] sm:$0xf] %vm426_vm1, %v672_v18  ;;  %v288_v27 = vadd.f32 %v7160_v57, %v287_v26  ;;  %5633 = vmatmul.mubr.msk.f32.vlgmr.msra.gmra.mrb[0].mxu1 %vm392_vm0, %v471_v23  ;;  %v6091_v18 = vpack.c.bf16 %v810_v14, %v809_v11 }
 0x158   :  { %675 = vst.msk [vmem:[#allocation5 + $0xc] sm:$0xf] %vm426_vm1, %v674_v19  ;;  %459 = vst.msk [vmem:[#allocation5 + $0x10] sm:$0xf] %vm426_vm1, %v458_v24  ;;  %v289_v28 = vpop.f32.mrb[33].mxu0  ;;  %6078 = vmatpush3.bf16.msra.mxu1 %v7154_v56  ;;  %v811_v19 = vld [vmem:[%s8988_s3 + $0x70] sm:$0xff] }
 0x159   :  { %461 = vst.msk [vmem:[#allocation5 + $0x14] sm:$0xf] %vm426_vm1, %v460_v25  ;;  %v377_v29 = vmax.f32 %v288_v27, 0.0  ;;  %6080 = vmatprep.subr.bf16.mxu1 %v6079_v22  ;;  %v797_v56 = vld [vmem:[#allocation2 + $0x53] sm:$0xf]  ;;  %v1185_v14 = vld [vmem:[%s8988_s3 + $0xc8] sm:$0xff] }
 0x15a   :  { %408 = vst.msk [vmem:[#allocation2 + $0x78] sm:$0xff] %vm392_vm0, %v376_v21  ;;  %v292_v33 = vpop.f32.mrb[34].mxu0  ;;  %v462_v36 = vld [vmem:[#allocation2 + $0x70] sm:$0xf]  ;;  %v801_v62 = vld [vmem:[#allocation2 + $0x67] sm:$0xf] }
 0x15b   :  { %v7238_v34 = vld [vmem:[#allocation5] sm:$0xff]  ;;  %409 = vst.msk [vmem:[#allocation2 + $0x80] sm:$0xff] %vm392_vm0, %v377_v29  ;;  %v293_v37 = vadd.f32 %v7160_v57, %v292_v33  ;;  %v294_v38 = vpop.f32.mrb[35].mxu0  ;;  %v803_v63 = vld [vmem:[#allocation2 + $0x6c] sm:$0xf] }
 0x15c   :  { %796 = vst.msk [vmem:[#allocation5 + $0x4] sm:$0xf] %vm426_vm1, %v795_v35  ;;  %794 = vst.msk [vmem:[#allocation5] sm:$0xf] %vm426_vm1, %v793_v32  ;;  %6082 = vmatpush3.bf16.msra.mxu1 %v6079_v22  ;;  %v805_v17 = vld [vmem:[#allocation2 + $0x71] sm:$0xf] }
 0x15d   :  { %463 = vst.msk [vmem:[#allocation5 + $0x18] sm:$0xf] %vm426_vm1, %v462_v36  ;;  %v378_v42 = vmax.f32 %v293_v37, 0.0  ;;  %6084 = vmatprep.subr.bf16.mxu1 %v7234_v30  ;;  %v934_v29 = vld [vmem:[%s8988_s3 + $0x80] sm:$0xff]  ;;  %v2719_v35 = vld [vmem:[%s8990_s5 + $0xc8] sm:$0xff]  ;;  %v2720_v36 = vld [vmem:[%s8990_s5 + $0xd0] sm:$0xff] }
 0x15e   :  { %v297_v46 = vpop.f32.mrb[36].mxu0 }
 0x15f   :  { %v7246_v43 = vld [vmem:[#allocation5 + $0x8] sm:$0xff]  ;;  %410 = vst.msk [vmem:[#allocation2 + $0x88] sm:$0xff] %vm392_vm0, %v378_v42  ;;  %v298_v47 = vadd.f32 %v7160_v57, %v297_v46  ;;  %v299_v48 = vpop.f32.mrb[37].mxu0 }
 0x160   :  { %v472_v44 = vld [vmem:[#allocation5 + $0x10] sm:$0xff]  ;;  %800 = vst.msk [vmem:[#allocation5 + $0xc] sm:$0xf] %vm426_vm1, %v799_v41  ;;  %798 = vst.msk [vmem:[#allocation5 + $0x8] sm:$0xf] %vm426_vm1, %v797_v56 }
 0x161   :  { %v464_v45 = vld [vmem:[#allocation2 + $0x75] sm:$0xf]  ;;  %677 = vst.msk [vmem:[#allocation5 + $0x10] sm:$0xf] %vm426_vm1, %v676_v39  ;;  %679 = vst.msk [vmem:[#allocation5 + $0x14] sm:$0xf] %vm426_vm1, %v678_v40  ;;  %5635 = vmatprep.mubr.msk.f32.mxu1 %vm392_vm0, %v472_v44 }
 0x162   :  { %465 = vst.msk [vmem:[#allocation5 + $0x1c] sm:$0xf] %vm426_vm1, %v464_v45  ;;  %v379_v49 = vmax.f32 %v298_v47, 0.0  ;;  %v918_v50 = vld [vmem:[#allocation2 + $0x84] sm:$0xf]  ;;  %v302_v51 = vpop.f32.mrb[38].mxu0 }
 0x163   :  { %v7256_v52 = vld [vmem:[#allocation5] sm:$0xff]  ;;  %v303_v53 = vadd.f32 %v7160_v57, %v302_v51  ;;  %v304_v55 = vpop.f32.mrb[39].mxu0  ;;  %v807_v22 = vld [vmem:[#allocation2 + $0x76] sm:$0xf] }
 0x164   :  { %411 = vst.msk [vmem:[#allocation2 + $0x90] sm:$0xff] %vm392_vm0, %v379_v49  ;;  %v2721_v40 = vld [vmem:[%s8990_s5 + $0xd8] sm:$0xff]  ;;  %v1059_v51 = vld [vmem:[%s8988_s3 + $0xa0] sm:$0xff] }
 0x165   :  { %919 = vst.msk [vmem:[#allocation5] sm:$0xf] %vm426_vm1, %v918_v50  ;;  %v380_v1 = vmax.f32 %v303_v53, 0.0  ;;  %v937_v44 = vld [vmem:[%s8988_s3 + $0x98] sm:$0xff]  ;;  %v6235_v45 = vpack.c.bf16 %v2721_v40, %v2720_v36  ;;  %v1060_v53 = vld [vmem:[%s8988_s3 + $0xa8] sm:$0xff]  ;;  %v1309_v40 = vld [vmem:[%s8988_s3 + $0xe0] sm:$0xff] }
 0x166   :  { %v920_v5 = vld [vmem:[#allocation2 + $0x8a] sm:$0xf]  ;;  %v307_v6 = vpop.f32.mrb[40].mxu0 }
 0x167   :  { %921 = vst.msk [vmem:[#allocation5 + $0x4] sm:$0xf] %vm426_vm1, %v920_v5  ;;  %v308_v7 = vadd.f32 %v7160_v57, %v307_v6  ;;  %v309_v8 = vpop.f32.mrb[41].mxu0  ;;  %v7282_v12 = vld [vmem:[#allocation5 + $0x8] sm:$0xff] }
 0x168   :  { %v7267_v3 = vld [vmem:[#allocation5 + $0x10] sm:$0xff]  ;;  %412 = vst.msk [vmem:[#allocation2 + $0x98] sm:$0xff] %vm392_vm0, %v380_v1 }
 0x169   :  { %v473_v4 = vld [vmem:[#allocation5 + $0x18] sm:$0xff]  ;;  %802 = vst.msk [vmem:[#allocation5 + $0x10] sm:$0xf] %vm426_vm1, %v801_v62  ;;  %804 = vst.msk [vmem:[#allocation5 + $0x14] sm:$0xf] %vm426_vm1, %v803_v63  ;;  %v381_v9 = vmax.f32 %v308_v7, 0.0  ;;  %v6107_v63 = vpack.c.bf16 %v1060_v53, %v1059_v51 }
 0x16a   :  { %681 = vst.msk [vmem:[#allocation5 + $0x18] sm:$0xf] %vm426_vm1, %v680_v58  ;;  %683 = vst.msk [vmem:[#allocation5 + $0x1c] sm:$0xf] %vm426_vm1, %v682_v59  ;;  %5636 = vmatmul.mubr.msk.f32.gmra.mrb[2].mxu1 %vm392_vm0, %v473_v4  ;;  %v312_v15 = vpop.f32.mrb[42].mxu0 }
 0x16b   :  { %5646 = vmatprep.mubr.msk.f32.mxu1 %vm392_vm0, %v7195_v54  ;;  %v922_v13 = vld [vmem:[#allocation2 + $0x90] sm:$0xf]  ;;  %413 = vst.msk [vmem:[#allocation2 + $0xa0] sm:$0xff] %vm392_vm0, %v381_v9  ;;  %v313_v54 = vadd.f32 %v7160_v57, %v312_v15  ;;  %v314_v16 = vpop.f32.mrb[43].mxu0 }
 0x16c   :  { %923 = vst.msk [vmem:[#allocation5 + $0x8] sm:$0xf] %vm426_vm1, %v922_v13 }
 0x16d   :  { %v382_v23 = vmax.f32 %v313_v54, 0.0 }
 0x16e   :  { %5647 = vmatmul.mubr.msk.f32.vlgmr.msra.gmra.mrb[0].mxu1 %vm392_vm0, %v7198_v60  ;;  %v317_v24 = vpop.f32.mrb[44].mxu0  ;;  %v812_v60 = vld [vmem:[%s8988_s3 + $0x78] sm:$0xff]  ;;  %v938_v4 = vld [vmem:[#allocation5] sm:$0xff] }
 0x16f   :  { %5649 = vmatprep.mubr.msk.f32.mxu1 %vm392_vm0, %v7224_v20  ;;  %6086 = vmatpush3.bf16.msra.mxu1 %v7234_v30  ;;  %v924_v20 = vld [vmem:[#allocation2 + $0x96] sm:$0xf]  ;;  %v318_v25 = vadd.f32 %v7160_v57, %v317_v24  ;;  %414 = vst.msk [vmem:[#allocation2 + $0xa8] sm:$0xff] %vm392_vm0, %v382_v23  ;;  %v319_v26 = vpop.f32.mrb[45].mxu0  ;;  %v6095_v28 = vpack.c.bf16 %v812_v60, %v811_v19 }
 0x170   :  { %6088 = vmatprep.subr.bf16.mxu1 %v6087_v10  ;;  %925 = vst.msk [vmem:[#allocation5 + $0xc] sm:$0xf] %vm426_vm1, %v924_v20  ;;  %v815_v30 = vld [vmem:[#allocation5 + $0x10] sm:$0xff] }
 0x171   :  { %v691_v21 = vld [vmem:[#allocation5 + $0x18] sm:$0xff]  ;;  %v383_v27 = vmax.f32 %v318_v25, 0.0 }
 0x172   :  { %808 = vst.msk [vmem:[#allocation5 + $0x1c] sm:$0xf] %vm426_vm1, %v807_v22  ;;  %806 = vst.msk [vmem:[#allocation5 + $0x18] sm:$0xf] %vm426_vm1, %v805_v17  ;;  %5650 = vmatmul.mubr.msk.f32.gmra.mrb[2].mxu1 %vm392_vm0, %v7236_v31  ;;  %v926_v32 = vld [vmem:[#allocation2 + $0xa2] sm:$0xf] }
 0x173   :  { %6090 = vmatpush3.bf16.msra.mxu1 %v6087_v10  ;;  %5660 = vmatprep.mubr.msk.f32.mxu1 %vm392_vm0, %v7238_v34  ;;  %v935_v31 = vld [vmem:[%s8988_s3 + $0x88] sm:$0xff]  ;;  %927 = vst.msk [vmem:[#allocation5 + $0x10] sm:$0xf] %vm426_vm1, %v926_v32  ;;  %v322_v33 = vpop.f32.mrb[46].mxu0  ;;  %v2718_v34 = vld [vmem:[%s8990_s5 + $0xc0] sm:$0xff]  ;;  %v1187_v32 = vld [vmem:[%s8988_s3 + $0xd8] sm:$0xff] }
 0x174   :  { %6092 = vmatprep.subr.bf16.mxu1 %v6091_v18  ;;  %415 = vst.msk [vmem:[#allocation2 + $0xb0] sm:$0xff] %vm392_vm0, %v383_v27  ;;  %v323_v37 = vadd.f32 %v7160_v57, %v322_v33  ;;  %v324_v38 = vpop.f32.mrb[47].mxu0  ;;  %v6232_v39 = vpack.c.bf16 %v2719_v35, %v2718_v34  ;;  %v6099_v56 = vpack.c.bf16 %v935_v31, %v934_v29  ;;  %v1184_v10 = vld [vmem:[%s8988_s3 + $0xc0] sm:$0xff]  ;;  %v1170_v35 = vld [vmem:[#allocation2 + $0x8b] sm:$0xf] }
 0x175   :  { %v1168_v34 = vld [vmem:[#allocation2 + $0x85] sm:$0xf] }
 0x176   :  { %5661 = vmatmul.mubr.msk.f32.vlgmr.msra.gmra.mrb[0].mxu1 %vm392_vm0, %v7246_v43  ;;  %v384_v41 = vmax.f32 %v323_v37, 0.0  ;;  %v327_v42 = vpop.f32.mrb[48].mxu0  ;;  %v936_v43 = vld [vmem:[%s8988_s3 + $0x90] sm:$0xff]  ;;  %6233 = vmatpush3.bf16.msra.mxu0 %v6232_v39  ;;  %v928_v46 = vld [vmem:[#allocation2 + $0xa8] sm:$0xf] }
 0x177   :  { %5663 = vmatprep.mubr.msk.f32.mxu1 %vm392_vm0, %v7267_v3  ;;  %6094 = vmatpush3.bf16.msra.mxu1 %v6091_v18  ;;  %v328_v47 = vadd.f32 %v7160_v57, %v327_v42  ;;  %v329_v48 = vpop.f32.mrb[49].mxu0  ;;  %929 = vst.msk [vmem:[#allocation5 + $0x14] sm:$0xf] %vm426_vm1, %v928_v46  ;;  %v6103_v50 = vpack.c.bf16 %v937_v44, %v936_v43  ;;  %v1062_v3 = vld [vmem:[%s8988_s3 + $0xb8] sm:$0xff]  ;;  %v939_v11 = vld [vmem:[#allocation5 + $0x8] sm:$0xff] }
 0x178   :  { %6096 = vmatprep.subr.bf16.mxu1 %v6095_v28  ;;  %6234 = vmatprep.subr.bf16.mxu0 %v6774_v0  ;;  %416 = vst.msk [vmem:[#allocation2 + $0xb8] sm:$0xff] %vm392_vm0, %v384_v41  ;;  %v6111_v9 = vpack.c.bf16 %v1062_v3, %v1061_v2  ;;  %v6115_v18 = vpack.c.bf16 %v1185_v14, %v1184_v10  ;;  %v1174_v41 = vld [vmem:[#allocation2 + $0x97] sm:$0xf]  ;;  %v1434_v10 = vld [vmem:[%s8988_s3 + $0x100] sm:$0xff] }
 0x179   :  { %v385_v49 = vmax.f32 %v328_v47, 0.0  ;;  %v816_v55 = vld [vmem:[#allocation5 + $0x18] sm:$0xff] }
 0x17a   :  { %5664 = vmatmul.mubr.msk.f32.gmra.mrb[2].mxu1 %vm392_vm0, %v691_v21  ;;  %6236 = vmatpush3.bf16.msra.mxu0 %v6235_v45  ;;  %v1312_v2 = vld [vmem:[%s8988_s3 + $0xf8] sm:$0xff] }
 0x17b   :  { %6098 = vmatpush3.bf16.msra.mxu1 %v6095_v28  ;;  %5674 = vmatprep.mubr.msk.f32.mxu1 %vm392_vm0, %v7256_v52  ;;  %v930_v58 = vld [vmem:[#allocation2 + $0xae] sm:$0xf]  ;;  %v932_v59 = vld [vmem:[#allocation2 + $0xb4] sm:$0xf]  ;;  %417 = vst.msk [vmem:[#allocation2 + $0xc0] sm:$0xff] %vm392_vm0, %v385_v49  ;;  %v332_v52 = vpop.f32.mrb[50].mxu0 }
 0x17c   :  { %6100 = vmatprep.subr.bf16.mxu1 %v6099_v56  ;;  %931 = vst.msk [vmem:[#allocation5 + $0x18] sm:$0xf] %vm426_vm1, %v930_v58  ;;  %933 = vst.msk [vmem:[#allocation5 + $0x1c] sm:$0xf] %vm426_vm1, %v932_v59  ;;  %6237 = vmatprep.subr.bf16.mxu0 %v6774_v0  ;;  %v333_v61 = vadd.f32 %v7160_v57, %v332_v52  ;;  %v334_v62 = vpop.f32.mrb[51].mxu0 }
 0x17d   :  { %v1176_v58 = vld [vmem:[#allocation2 + $0xa3] sm:$0xf]  ;;  %v1178_v59 = vld [vmem:[#allocation2 + $0xa9] sm:$0xf] }
 0x17e   :  { %5675 = vmatmul.mubr.msk.f32.vlgmr.msra.gmra.mrb[0].mxu1 %vm392_vm0, %v7282_v12  ;;  %v337_v1 = vpop.f32.mrb[52].mxu0  ;;  %v386_v5 = vmax.f32 %v333_v61, 0.0  ;;  %v940_v15 = vld [vmem:[#allocation5 + $0x10] sm:$0xff]  ;;  %v1418_v61 = vld [vmem:[#allocation2 + $0x6] sm:$0xf] }
 0x17f   :  { %5677 = vmatprep.mubr.msk.f32.mxu1 %vm392_vm0, %v815_v30  ;;  %6102 = vmatpush3.bf16.msra.mxu1 %v6099_v56  ;;  %v338_v6 = vadd.f32 %v7160_v57, %v337_v1  ;;  %v339_v7 = vpop.f32.mrb[53].mxu0  ;;  %v1186_v30 = vld [vmem:[%s8988_s3 + $0xd0] sm:$0xff]  ;;  %v1310_v56 = vld [vmem:[%s8988_s3 + $0xe8] sm:$0xff] }
 0x180   :  { %6104 = vmatprep.subr.bf16.mxu1 %v6103_v50  ;;  %418 = vst.msk [vmem:[#allocation2 + $0xc8] sm:$0xff] %vm392_vm0, %v386_v5  ;;  %v6119_v39 = vpack.c.bf16 %v1187_v32, %v1186_v30  ;;  %v6123_v46 = vpack.c.bf16 %v1310_v56, %v1309_v40  ;;  %v1420_v62 = vld [vmem:[#allocation2 + $0xc] sm:$0xf]  ;;  %v1311_v1 = vld [vmem:[%s8988_s3 + $0xf0] sm:$0xff]  ;;  %v1424_v7 = vld [vmem:[#allocation2 + $0x18] sm:$0xf] }
 0x181   :  { %v387_v8 = vmax.f32 %v338_v6, 0.0  ;;  %v1182_v3 = vld [vmem:[#allocation2 + $0xb5] sm:$0xf]  ;;  %v1668_v32 = vld [vmem:[#allocation2 + $0x7] sm:$0xf] }
 0x182   :  { %5678 = vmatmul.mubr.msk.f32.gmra.mrb[2].mxu1 %vm392_vm0, %v816_v55  ;;  %v1043_v12 = vld [vmem:[#allocation2 + $0xc0] sm:$0xf]  ;;  %v342_v13 = vpop.f32.mrb[54].mxu0  ;;  %v1422_v6 = vld [vmem:[#allocation2 + $0x12] sm:$0xf] }
 0x183   :  { %6106 = vmatpush3.bf16.msra.mxu1 %v6103_v50  ;;  %5688 = vmatprep.mubr.msk.f32.mxu1 %vm392_vm0, %v938_v4  ;;  %1044 = vst.msk [vmem:[#allocation5] sm:$0xf] %vm426_vm1, %v1043_v12  ;;  %v343_v54 = vadd.f32 %v7160_v57, %v342_v13  ;;  %v344_v16 = vpop.f32.mrb[55].mxu0  ;;  %v941_v19 = vld [vmem:[#allocation5 + $0x18] sm:$0xff]  ;;  %v1293_v47 = vld [vmem:[#allocation2 + $0xc1] sm:$0xf] }
 0x184   :  { %6108 = vmatprep.subr.bf16.mxu1 %v6107_v63  ;;  %419 = vst.msk [vmem:[#allocation2 + $0xd0] sm:$0xff] %vm392_vm0, %v387_v8  ;;  %v1543_v16 = vld [vmem:[#allocation2 + $0x4d] sm:$0xf]  ;;  %v1672_v40 = vld [vmem:[#allocation2 + $0x13] sm:$0xf] }
 0x185   :  { %v388_v17 = vmax.f32 %v343_v54, 0.0  ;;  %v1437_v54 = vld [vmem:[%s8988_s3 + $0x118] sm:$0xff] }
 0x186   :  { %5689 = vmatmul.mubr.msk.f32.vlgmr.msra.gmra.mrb[0].mxu1 %vm392_vm0, %v939_v11  ;;  %v347_v21 = vpop.f32.mrb[56].mxu0  ;;  %v1435_v11 = vld [vmem:[%s8988_s3 + $0x108] sm:$0xff]  ;;  %v1674_v56 = vld [vmem:[#allocation2 + $0x19] sm:$0xf] }
 0x187   :  { %5691 = vmatprep.mubr.msk.f32.mxu1 %vm392_vm0, %v940_v15  ;;  %6110 = vmatpush3.bf16.msra.mxu1 %v6107_v63  ;;  %420 = vst.msk [vmem:[#allocation2 + $0xd8] sm:$0xff] %vm392_vm0, %v388_v17  ;;  %v349_v22 = vpop.f32.mrb[57].mxu0  ;;  %v1045_v23 = vld [vmem:[#allocation2 + $0xc5] sm:$0xf]  ;;  %v1047_v24 = vld [vmem:[#allocation2 + $0xca] sm:$0xf]  ;;  %v348_v60 = vadd.f32 %v7160_v57, %v347_v21 }
 0x188   :  { %6112 = vmatprep.subr.bf16.mxu1 %v6111_v9  ;;  %1046 = vst.msk [vmem:[#allocation5 + $0x4] sm:$0xf] %vm426_vm1, %v1045_v23  ;;  %1048 = vst.msk [vmem:[#allocation5 + $0x8] sm:$0xf] %vm426_vm1, %v1047_v24  ;;  %v1295_v49 = vld [vmem:[#allocation2 + $0xc6] sm:$0xf] }
 0x189   :  { %v389_v25 = vmax.f32 %v348_v60, 0.0  ;;  %v1297_v51 = vld [vmem:[#allocation2 + $0xcb] sm:$0xf]  ;;  %v1180_v63 = vld [vmem:[#allocation2 + $0xaf] sm:$0xf] }
 0x18a   :  { %5692 = vmatmul.mubr.msk.f32.gmra.mrb[2].mxu1 %vm392_vm0, %v941_v19  ;;  %v352_v26 = vpop.f32.mrb[58].mxu0  ;;  %v1436_v15 = vld [vmem:[%s8988_s3 + $0x110] sm:$0xff]  ;;  %v6131_v19 = vpack.c.bf16 %v1435_v11, %v1434_v10  ;;  %v1549_v60 = vld [vmem:[#allocation2 + $0x5c] sm:$0xf] }
 0x18b   :  { %6114 = vmatpush3.bf16.msra.mxu1 %v6111_v9  ;;  %v1049_v20 = vld [vmem:[#allocation2 + $0xcf] sm:$0xf]  ;;  %v353_v27 = vadd.f32 %v7160_v57, %v352_v26  ;;  %v354_v28 = vpop.f32.mrb[59].mxu0  ;;  %421 = vst.msk [vmem:[#allocation2 + $0xe0] sm:$0xff] %vm392_vm0, %v389_v25  ;;  %v6127_v9 = vpack.c.bf16 %v1312_v2, %v1311_v1  ;;  %v1547_v24 = vld [vmem:[#allocation2 + $0x57] sm:$0xf]  ;;  %v6135_v25 = vpack.c.bf16 %v1437_v54, %v1436_v15 }
 0x18c   :  { %6116 = vmatprep.subr.bf16.mxu1 %v6115_v18  ;;  %1050 = vst.msk [vmem:[#allocation5 + $0xc] sm:$0xf] %vm426_vm1, %v1049_v20  ;;  %v1299_v55 = vld [vmem:[#allocation2 + $0xd0] sm:$0xf]  ;;  %v1559_v26 = vld [vmem:[%s8988_s3 + $0x120] sm:$0xff]  ;;  %v1810_v2 = vld [vmem:[%s8988_s3 + $0x168] sm:$0xff] }
 0x18d   :  { %v390_v31 = vmax.f32 %v353_v27, 0.0  ;;  %v1545_v17 = vld [vmem:[#allocation2 + $0x52] sm:$0xf]  ;;  %v1560_v27 = vld [vmem:[%s8988_s3 + $0x128] sm:$0xff]  ;;  %v1809_v1 = vld [vmem:[%s8988_s3 + $0x160] sm:$0xff] }
 0x18e   :  { %v1051_v29 = vld [vmem:[#allocation2 + $0xd9] sm:$0xf]  ;;  %v357_v33 = vpop.f32.mrb[60].mxu0  ;;  %v1426_v28 = vld [vmem:[#allocation2 + $0x2a] sm:$0xf]  ;;  %v1811_v10 = vld [vmem:[%s8988_s3 + $0x170] sm:$0xff] }
 0x18f   :  { %1052 = vst.msk [vmem:[#allocation5 + $0x10] sm:$0xf] %vm426_vm1, %v1051_v29  ;;  %v1063_v36 = vld [vmem:[#allocation5] sm:$0xff]  ;;  %v358_v37 = vadd.f32 %v7160_v57, %v357_v33  ;;  %v359_v38 = vpop.f32.mrb[61].mxu0  ;;  %v1172_v57 = vld [vmem:[#allocation2 + $0x91] sm:$0xf] }
 0x190   :  { %1169 = vst.msk [vmem:[#allocation5] sm:$0xf] %vm426_vm1, %v1168_v34  ;;  %1171 = vst.msk [vmem:[#allocation5 + $0x4] sm:$0xf] %vm426_vm1, %v1170_v35  ;;  %5702 = vmatprep.mubr.msk.f32.mxu1 %vm392_vm0, %v1063_v36  ;;  %v1301_v12 = vld [vmem:[#allocation2 + $0xda] sm:$0xf]  ;;  %v6139_v34 = vpack.c.bf16 %v1560_v27, %v1559_v26 }
 0x191   :  { %422 = vst.msk [vmem:[#allocation2 + $0xe8] sm:$0xff] %vm392_vm0, %v390_v31  ;;  %v391_v43 = vmax.f32 %v358_v37, 0.0  ;;  %v1428_v29 = vld [vmem:[#allocation2 + $0x30] sm:$0xf]  ;;  %v1430_v33 = vld [vmem:[#allocation2 + $0x36] sm:$0xf] }
 0x192   :  { %v1053_v44 = vld [vmem:[#allocation2 + $0xde] sm:$0xf]  ;;  %v1055_v45 = vld [vmem:[#allocation2 + $0xe3] sm:$0xf]  ;;  %v1670_v31 = vld [vmem:[#allocation2 + $0xd] sm:$0xf] }
 0x193   :  { %v1064_v42 = vld [vmem:[#allocation5 + $0x8] sm:$0xff]  ;;  %424 = vst.msk [vmem:[#allocation2 + $0xf0] sm:$0x3] %vm423_vm2, %v391_v43  ;;  %v1303_v14 = vld [vmem:[#allocation2 + $0xdf] sm:$0xf]  ;;  %v1561_v35 = vld [vmem:[%s8988_s3 + $0x130] sm:$0xff] }
 0x194   :  { %1173 = vst.msk [vmem:[#allocation5 + $0x8] sm:$0xf] %vm426_vm1, %v1172_v57  ;;  %1175 = vst.msk [vmem:[#allocation5 + $0xc] sm:$0xf] %vm426_vm1, %v1174_v41  ;;  %5703 = vmatmul.mubr.msk.f32.vlgmr.msra.gmra.mrb[0].mxu1 %vm392_vm0, %v1064_v42  ;;  %v1562_v36 = vld [vmem:[%s8988_s3 + $0x138] sm:$0xff]  ;;  %v1684_v42 = vld [vmem:[%s8988_s3 + $0x140] sm:$0xff] }
 0x195   :  { %6118 = vmatpush3.bf16.msra.mxu1 %v6115_v18  ;;  %1054 = vst.msk [vmem:[#allocation5 + $0x14] sm:$0xf] %vm426_vm1, %v1053_v44  ;;  %1056 = vst.msk [vmem:[#allocation5 + $0x18] sm:$0xf] %vm426_vm1, %v1055_v45  ;;  %v1305_v18 = vld [vmem:[#allocation2 + $0xe4] sm:$0xf]  ;;  %v6143_v41 = vpack.c.bf16 %v1562_v36, %v1561_v35 }
 0x196   :  { %6120 = vmatprep.subr.bf16.mxu1 %v6119_v39  ;;  %v1432_v37 = vld [vmem:[#allocation2 + $0x3c] sm:$0xf]  ;;  %v1685_v43 = vld [vmem:[%s8988_s3 + $0x148] sm:$0xff]  ;;  %v1553_v45 = vld [vmem:[#allocation2 + $0x70] sm:$0xf] }
 0x197   :  { %v1188_v48 = vld [vmem:[#allocation5] sm:$0xff]  ;;  %v1551_v44 = vld [vmem:[#allocation2 + $0x6b] sm:$0xf]  ;;  %v1812_v11 = vld [vmem:[%s8988_s3 + $0x178] sm:$0xff] }
 0x198   :  { %v1057_v50 = vld [vmem:[#allocation2 + $0xe8] sm:$0xf]  ;;  %1296 = vst.msk [vmem:[#allocation5 + $0x4] sm:$0xf] %vm426_vm1, %v1295_v49  ;;  %1294 = vst.msk [vmem:[#allocation5] sm:$0xf] %vm426_vm1, %v1293_v47 }
 0x199   :  { %6122 = vmatpush3.bf16.msra.mxu1 %v6119_v39  ;;  %1058 = vst.msk [vmem:[#allocation5 + $0x1c] sm:$0xf] %vm426_vm1, %v1057_v50  ;;  %v1307_v22 = vld [vmem:[#allocation2 + $0xe9] sm:$0xf]  ;;  %v1686_v47 = vld [vmem:[%s8988_s3 + $0x150] sm:$0xff]  ;;  %v2059_v35 = vld [vmem:[%s8988_s3 + $0x1a0] sm:$0xff] }
 0x19a   :  { %6124 = vmatprep.subr.bf16.mxu1 %v6123_v46  ;;  %v1793_v49 = vld [vmem:[#allocation2 + $0x4e] sm:$0xf]  ;;  %v1795_v50 = vld [vmem:[#allocation2 + $0x53] sm:$0xf]  ;;  %v1924_v54 = vld [vmem:[#allocation2 + $0x9c] sm:$0xf] }
 0x19b   :  { %v1189_v53 = vld [vmem:[#allocation5 + $0x8] sm:$0xff]  ;;  %v1922_v15 = vld [vmem:[#allocation2 + $0x96] sm:$0xf] }
 0x19c   :  { %1300 = vst.msk [vmem:[#allocation5 + $0xc] sm:$0xf] %vm426_vm1, %v1299_v55  ;;  %1298 = vst.msk [vmem:[#allocation5 + $0x8] sm:$0xf] %vm426_vm1, %v1297_v51  ;;  %v1065_v52 = vld [vmem:[#allocation5 + $0x10] sm:$0xff]  ;;  %v2060_v36 = vld [vmem:[%s8988_s3 + $0x1a8] sm:$0xff] }
 0x19d   :  { %1177 = vst.msk [vmem:[#allocation5 + $0x10] sm:$0xf] %vm426_vm1, %v1176_v58  ;;  %1179 = vst.msk [vmem:[#allocation5 + $0x14] sm:$0xf] %vm426_vm1, %v1178_v59  ;;  %5705 = vmatprep.mubr.msk.f32.mxu1 %vm392_vm0, %v1065_v52  ;;  %v1555_v51 = vld [vmem:[#allocation2 + $0x75] sm:$0xf] }
 0x19e   :  { %v1557_v55 = vld [vmem:[#allocation2 + $0x7a] sm:$0xf]  ;;  %v2043_v26 = vld [vmem:[#allocation2 + $0xc5] sm:$0xf] }
 0x19f   :  { %v1313_v5 = vld [vmem:[#allocation5] sm:$0xff]  ;;  %v1797_v52 = vld [vmem:[#allocation2 + $0x58] sm:$0xf] }
 0x1a0   :  { %v1066_v4 = vld [vmem:[#allocation5 + $0x18] sm:$0xff]  ;;  %1419 = vst.msk [vmem:[#allocation5] sm:$0xf] %vm426_vm1, %v1418_v61  ;;  %1421 = vst.msk [vmem:[#allocation5 + $0x4] sm:$0xf] %vm426_vm1, %v1420_v62 }
 0x1a1   :  { %1181 = vst.msk [vmem:[#allocation5 + $0x18] sm:$0xf] %vm426_vm1, %v1180_v63  ;;  %1183 = vst.msk [vmem:[#allocation5 + $0x1c] sm:$0xf] %vm426_vm1, %v1182_v3  ;;  %5706 = vmatmul.mubr.msk.f32.gmra.mrb[2].mxu1 %vm392_vm0, %v1066_v4  ;;  %v1799_v61 = vld [vmem:[#allocation2 + $0x5d] sm:$0xf] }
 0x1a2   :  { %5716 = vmatprep.mubr.msk.f32.mxu1 %vm392_vm0, %v1188_v48  ;;  %v1687_v48 = vld [vmem:[%s8988_s3 + $0x158] sm:$0xff]  ;;  %v1676_v3 = vld [vmem:[#allocation2 + $0x2b] sm:$0xf]  ;;  %v1678_v4 = vld [vmem:[#allocation2 + $0x31] sm:$0xf] }
 0x1a3   :  { %v1314_v8 = vld [vmem:[#allocation5 + $0x8] sm:$0xff]  ;;  %v6151_v63 = vpack.c.bf16 %v1687_v48, %v1686_v47  ;;  %v2172_v47 = vld [vmem:[#allocation2 + $0x97] sm:$0xf]  ;;  %v2174_v48 = vld [vmem:[#allocation2 + $0x9d] sm:$0xf] }
 0x1a4   :  { %1423 = vst.msk [vmem:[#allocation5 + $0x8] sm:$0xf] %vm426_vm1, %v1422_v6  ;;  %1425 = vst.msk [vmem:[#allocation5 + $0xc] sm:$0xf] %vm426_vm1, %v1424_v7  ;;  %v1190_v13 = vld [vmem:[#allocation5 + $0x10] sm:$0xff] }
 0x1a5   :  { %5717 = vmatmul.mubr.msk.f32.vlgmr.msra.gmra.mrb[0].mxu1 %vm392_vm0, %v1189_v53  ;;  %1304 = vst.msk [vmem:[#allocation5 + $0x14] sm:$0xf] %vm426_vm1, %v1303_v14  ;;  %1302 = vst.msk [vmem:[#allocation5 + $0x10] sm:$0xf] %vm426_vm1, %v1301_v12  ;;  %v6147_v53 = vpack.c.bf16 %v1685_v43, %v1684_v42  ;;  %v1680_v6 = vld [vmem:[#allocation2 + $0x37] sm:$0xf]  ;;  %v6171_v43 = vpack.c.bf16 %v2060_v36, %v2059_v35 }
 0x1a6   :  { %6126 = vmatpush3.bf16.msra.mxu1 %v6123_v46  ;;  %5719 = vmatprep.mubr.msk.f32.mxu1 %vm392_vm0, %v1190_v13  ;;  %v1682_v7 = vld [vmem:[#allocation2 + $0x3d] sm:$0xf]  ;;  %v1920_v12 = vld [vmem:[#allocation2 + $0x90] sm:$0xf]  ;;  %v1930_v42 = vld [vmem:[#allocation2 + $0xb4] sm:$0xf] }
 0x1a7   :  { %6128 = vmatprep.subr.bf16.mxu1 %v6127_v9  ;;  %v1438_v23 = vld [vmem:[#allocation5] sm:$0xff] }
 0x1a8   :  { %v1191_v21 = vld [vmem:[#allocation5 + $0x18] sm:$0xff]  ;;  %1544 = vst.msk [vmem:[#allocation5] sm:$0xf] %vm426_vm1, %v1543_v16  ;;  %1546 = vst.msk [vmem:[#allocation5 + $0x4] sm:$0xf] %vm426_vm1, %v1545_v17  ;;  %v6159_v17 = vpack.c.bf16 %v1812_v11, %v1811_v10  ;;  %v2309_v10 = vld [vmem:[%s8988_s3 + $0x1e0] sm:$0xff] }
 0x1a9   :  { %1308 = vst.msk [vmem:[#allocation5 + $0x1c] sm:$0xf] %vm426_vm1, %v1307_v22  ;;  %1306 = vst.msk [vmem:[#allocation5 + $0x18] sm:$0xf] %vm426_vm1, %v1305_v18  ;;  %5720 = vmatmul.mubr.msk.f32.gmra.mrb[2].mxu1 %vm392_vm0, %v1191_v21  ;;  %v1934_v18 = vld [vmem:[%s8988_s3 + $0x180] sm:$0xff]  ;;  %v2310_v11 = vld [vmem:[%s8988_s3 + $0x1e8] sm:$0xff] }
 0x1aa   :  { %6130 = vmatpush3.bf16.msra.mxu1 %v6127_v9  ;;  %5730 = vmatprep.mubr.msk.f32.mxu1 %vm392_vm0, %v1313_v5  ;;  %v6155_v9 = vpack.c.bf16 %v1810_v2, %v1809_v1  ;;  %v1801_v21 = vld [vmem:[#allocation2 + $0x6c] sm:$0xf]  ;;  %v1803_v22 = vld [vmem:[#allocation2 + $0x71] sm:$0xf]  ;;  %v2055_v1 = vld [vmem:[#allocation2 + $0xe8] sm:$0xf] }
 0x1ab   :  { %v1439_v20 = vld [vmem:[#allocation5 + $0x8] sm:$0xff]  ;;  %6132 = vmatprep.subr.bf16.mxu1 %v6131_v19  ;;  %v2468_v36 = vld [vmem:[%s8990_s5 + $0x60] sm:$0xff] }
 0x1ac   :  { %1548 = vst.msk [vmem:[#allocation5 + $0x8] sm:$0xf] %vm426_vm1, %v1547_v24  ;;  %1550 = vst.msk [vmem:[#allocation5 + $0xc] sm:$0xf] %vm426_vm1, %v1549_v60  ;;  %v1315_v30 = vld [vmem:[#allocation5 + $0x10] sm:$0xff]  ;;  %v1937_v60 = vld [vmem:[%s8988_s3 + $0x198] sm:$0xff] }
 0x1ad   :  { %5731 = vmatmul.mubr.msk.f32.vlgmr.msra.gmra.mrb[0].mxu1 %vm392_vm0, %v1314_v8  ;;  %1427 = vst.msk [vmem:[#allocation5 + $0x10] sm:$0xf] %vm426_vm1, %v1426_v28  ;;  %1429 = vst.msk [vmem:[#allocation5 + $0x14] sm:$0xf] %vm426_vm1, %v1428_v29  ;;  %v1918_v8 = vld [vmem:[#allocation2 + $0x8a] sm:$0xf] }
 0x1ae   :  { %6134 = vmatpush3.bf16.msra.mxu1 %v6131_v19  ;;  %5733 = vmatprep.mubr.msk.f32.mxu1 %vm392_vm0, %v1315_v30  ;;  %v1935_v19 = vld [vmem:[%s8988_s3 + $0x188] sm:$0xff]  ;;  %v1936_v24 = vld [vmem:[%s8988_s3 + $0x190] sm:$0xff] }
 0x1af   :  { %6136 = vmatprep.subr.bf16.mxu1 %v6135_v25  ;;  %v1563_v39 = vld [vmem:[#allocation5] sm:$0xff]  ;;  %v6163_v27 = vpack.c.bf16 %v1935_v19, %v1934_v18  ;;  %v2045_v28 = vld [vmem:[#allocation2 + $0xca] sm:$0xf]  ;;  %v2182_v18 = vld [vmem:[#allocation2 + $0xbb] sm:$0xf] }
 0x1b0   :  { %v1316_v38 = vld [vmem:[#allocation5 + $0x18] sm:$0xff]  ;;  %1669 = vst.msk [vmem:[#allocation5] sm:$0xf] %vm426_vm1, %v1668_v32  ;;  %1671 = vst.msk [vmem:[#allocation5 + $0x4] sm:$0xf] %vm426_vm1, %v1670_v31 }
 0x1b1   :  { %5734 = vmatmul.mubr.msk.f32.gmra.mrb[2].mxu1 %vm392_vm0, %v1316_v38  ;;  %1431 = vst.msk [vmem:[#allocation5 + $0x18] sm:$0xf] %vm426_vm1, %v1430_v33  ;;  %1433 = vst.msk [vmem:[#allocation5 + $0x1c] sm:$0xf] %vm426_vm1, %v1432_v37  ;;  %v2047_v32 = vld [vmem:[#allocation2 + $0xcf] sm:$0xf] }
 0x1b2   :  { %6138 = vmatpush3.bf16.msra.mxu1 %v6135_v25  ;;  %5744 = vmatprep.mubr.msk.f32.mxu1 %vm392_vm0, %v1438_v23  ;;  %v1807_v25 = vld [vmem:[#allocation2 + $0x7b] sm:$0xf]  ;;  %v2049_v31 = vld [vmem:[#allocation2 + $0xd4] sm:$0xf]  ;;  %v1926_v37 = vld [vmem:[#allocation2 + $0xa8] sm:$0xf] }
 0x1b3   :  { %v1564_v57 = vld [vmem:[#allocation5 + $0x8] sm:$0xff]  ;;  %6140 = vmatprep.subr.bf16.mxu1 %v6139_v34 }
 0x1b4   :  { %1673 = vst.msk [vmem:[#allocation5 + $0x8] sm:$0xf] %vm426_vm1, %v1672_v40  ;;  %1675 = vst.msk [vmem:[#allocation5 + $0xc] sm:$0xf] %vm426_vm1, %v1674_v56  ;;  %v1440_v46 = vld [vmem:[#allocation5 + $0x10] sm:$0xff]  ;;  %v2062_v56 = vld [vmem:[%s8988_s3 + $0x1b8] sm:$0xff] }
 0x1b5   :  { %5745 = vmatmul.mubr.msk.f32.vlgmr.msra.gmra.mrb[0].mxu1 %vm392_vm0, %v1439_v20  ;;  %1552 = vst.msk [vmem:[#allocation5 + $0x10] sm:$0xf] %vm426_vm1, %v1551_v44  ;;  %1554 = vst.msk [vmem:[#allocation5 + $0x14] sm:$0xf] %vm426_vm1, %v1553_v45  ;;  %v1805_v20 = vld [vmem:[#allocation2 + $0x76] sm:$0xf] }
 0x1b6   :  { %6142 = vmatpush3.bf16.msra.mxu1 %v6139_v34  ;;  %5747 = vmatprep.mubr.msk.f32.mxu1 %vm392_vm0, %v1440_v46  ;;  %v6167_v34 = vpack.c.bf16 %v1937_v60, %v1936_v24  ;;  %v1928_v38 = vld [vmem:[#allocation2 + $0xae] sm:$0xf]  ;;  %v1932_v44 = vld [vmem:[#allocation2 + $0xba] sm:$0xf]  ;;  %v2305_v60 = vld [vmem:[#allocation2 + $0xe9] sm:$0xf] }
 0x1b7   :  { %6144 = vmatprep.subr.bf16.mxu1 %v6143_v41  ;;  %v1688_v59 = vld [vmem:[#allocation5] sm:$0xff]  ;;  %v2061_v40 = vld [vmem:[%s8988_s3 + $0x1b0] sm:$0xff] }
 0x1b8   :  { %v1441_v58 = vld [vmem:[#allocation5 + $0x18] sm:$0xff]  ;;  %1794 = vst.msk [vmem:[#allocation5] sm:$0xf] %vm426_vm1, %v1793_v49  ;;  %1796 = vst.msk [vmem:[#allocation5 + $0x4] sm:$0xf] %vm426_vm1, %v1795_v50  ;;  %v6175_v50 = vpack.c.bf16 %v2062_v56, %v2061_v40 }
 0x1b9   :  { %5748 = vmatmul.mubr.msk.f32.gmra.mrb[2].mxu1 %vm392_vm0, %v1441_v58  ;;  %1556 = vst.msk [vmem:[#allocation5 + $0x18] sm:$0xf] %vm426_vm1, %v1555_v51  ;;  %1558 = vst.msk [vmem:[#allocation5 + $0x1c] sm:$0xf] %vm426_vm1, %v1557_v55  ;;  %v2184_v51 = vld [vmem:[%s8988_s3 + $0x1c0] sm:$0xff]  ;;  %v2471_v40 = vld [vmem:[%s8990_s5 + $0x78] sm:$0xff] }
 0x1ba   :  { %6146 = vmatpush3.bf16.msra.mxu1 %v6143_v41  ;;  %5758 = vmatprep.mubr.msk.f32.mxu1 %vm392_vm0, %v1563_v39  ;;  %v2170_v41 = vld [vmem:[#allocation2 + $0x91] sm:$0xf]  ;;  %v2051_v55 = vld [vmem:[#allocation2 + $0xde] sm:$0xf]  ;;  %v2053_v58 = vld [vmem:[#allocation2 + $0xe3] sm:$0xf] }
 0x1bb   :  { %v1689_v62 = vld [vmem:[#allocation5 + $0x8] sm:$0xff]  ;;  %6148 = vmatprep.subr.bf16.mxu1 %v6147_v53 }
 0x1bc   :  { %1798 = vst.msk [vmem:[#allocation5 + $0x8] sm:$0xf] %vm426_vm1, %v1797_v52  ;;  %1800 = vst.msk [vmem:[#allocation5 + $0xc] sm:$0xf] %vm426_vm1, %v1799_v61  ;;  %v1565_v5 = vld [vmem:[#allocation5 + $0x10] sm:$0xff]  ;;  %v2187_v61 = vld [vmem:[%s8988_s3 + $0x1d8] sm:$0xff] }
 0x1bd   :  { %5759 = vmatmul.mubr.msk.f32.vlgmr.msra.gmra.mrb[0].mxu1 %vm392_vm0, %v1564_v57  ;;  %1677 = vst.msk [vmem:[#allocation5 + $0x10] sm:$0xf] %vm426_vm1, %v1676_v3  ;;  %1679 = vst.msk [vmem:[#allocation5 + $0x14] sm:$0xf] %vm426_vm1, %v1678_v4  ;;  %v2168_v57 = vld [vmem:[#allocation2 + $0x8b] sm:$0xf] }
 0x1be   :  { %6150 = vmatpush3.bf16.msra.mxu1 %v6147_v53  ;;  %5761 = vmatprep.mubr.msk.f32.mxu1 %vm392_vm0, %v1565_v5  ;;  %v2185_v53 = vld [vmem:[%s8988_s3 + $0x1c8] sm:$0xff]  ;;  %v2186_v52 = vld [vmem:[%s8988_s3 + $0x1d0] sm:$0xff] }
 0x1bf   :  { %6152 = vmatprep.subr.bf16.mxu1 %v6151_v63  ;;  %v1813_v14 = vld [vmem:[#allocation5] sm:$0xff]  ;;  %v6179_v2 = vpack.c.bf16 %v2185_v53, %v2184_v51  ;;  %v2057_v3 = vld [vmem:[#allocation2 + $0xed] sm:$0xf] }
 0x1c0   :  { %v1566_v13 = vld [vmem:[#allocation5 + $0x18] sm:$0xff]  ;;  %1919 = vst.msk [vmem:[#allocation5] sm:$0xf] %vm426_vm1, %v1918_v8  ;;  %1921 = vst.msk [vmem:[#allocation5 + $0x4] sm:$0xf] %vm426_vm1, %v1920_v12 }
 0x1c1   :  { %5762 = vmatmul.mubr.msk.f32.gmra.mrb[2].mxu1 %vm392_vm0, %v1566_v13  ;;  %1681 = vst.msk [vmem:[#allocation5 + $0x18] sm:$0xf] %vm426_vm1, %v1680_v6  ;;  %1683 = vst.msk [vmem:[#allocation5 + $0x1c] sm:$0xf] %vm426_vm1, %v1682_v7  ;;  %v2297_v6 = vld [vmem:[#allocation2 + $0xd0] sm:$0xf] }
 0x1c2   :  { %6154 = vmatpush3.bf16.msra.mxu1 %v6151_v63  ;;  %5772 = vmatprep.mubr.msk.f32.mxu1 %vm392_vm0, %v1688_v59  ;;  %v2295_v63 = vld [vmem:[#allocation2 + $0xcb] sm:$0xf]  ;;  %v2299_v7 = vld [vmem:[#allocation2 + $0xd5] sm:$0xf]  ;;  %v2178_v13 = vld [vmem:[#allocation2 + $0xaf] sm:$0xf] }
 0x1c3   :  { %v1814_v16 = vld [vmem:[#allocation5 + $0x8] sm:$0xff]  ;;  %6156 = vmatprep.subr.bf16.mxu1 %v6155_v9 }
 0x1c4   :  { %1923 = vst.msk [vmem:[#allocation5 + $0x8] sm:$0xf] %vm426_vm1, %v1922_v15  ;;  %1925 = vst.msk [vmem:[#allocation5 + $0xc] sm:$0xf] %vm426_vm1, %v1924_v54  ;;  %v1690_v23 = vld [vmem:[#allocation5 + $0x10] sm:$0xff]  ;;  %v6187_v15 = vpack.c.bf16 %v2310_v11, %v2309_v10  ;;  %v2447_v10 = vld [vmem:[%s8990_s5] sm:$0xff] }
 0x1c5   :  { %5773 = vmatmul.mubr.msk.f32.vlgmr.msra.gmra.mrb[0].mxu1 %vm392_vm0, %v1689_v62  ;;  %1802 = vst.msk [vmem:[#allocation5 + $0x10] sm:$0xf] %vm426_vm1, %v1801_v21  ;;  %1804 = vst.msk [vmem:[#allocation5 + $0x14] sm:$0xf] %vm426_vm1, %v1803_v22  ;;  %v2293_v62 = vld [vmem:[#allocation2 + $0xc6] sm:$0xf] }
 0x1c6   :  { %6158 = vmatpush3.bf16.msra.mxu1 %v6155_v9  ;;  %5775 = vmatprep.mubr.msk.f32.mxu1 %vm392_vm0, %v1690_v23  ;;  %v6183_v9 = vpack.c.bf16 %v2187_v61, %v2186_v52  ;;  %v2176_v12 = vld [vmem:[#allocation2 + $0xa9] sm:$0xf]  ;;  %v2311_v54 = vld [vmem:[%s8988_s3 + $0x1f0] sm:$0xff]  ;;  %v2301_v22 = vld [vmem:[#allocation2 + $0xdf] sm:$0xf] }
 0x1c7   :  { %6160 = vmatprep.subr.bf16.mxu1 %v6159_v17  ;;  %v1938_v30 = vld [vmem:[#allocation5] sm:$0xff]  ;;  %v2448_v11 = vld [vmem:[%s8990_s5 + $0x8] sm:$0xff] }
 0x1c8   :  { %v1691_v29 = vld [vmem:[#allocation5 + $0x18] sm:$0xff]  ;;  %2044 = vst.msk [vmem:[#allocation5] sm:$0xf] %vm426_vm1, %v2043_v26  ;;  %2046 = vst.msk [vmem:[#allocation5 + $0x4] sm:$0xf] %vm426_vm1, %v2045_v28 }
 0x1c9   :  { %5776 = vmatmul.mubr.msk.f32.gmra.mrb[2].mxu1 %vm392_vm0, %v1691_v29  ;;  %1806 = vst.msk [vmem:[#allocation5 + $0x18] sm:$0xf] %vm426_vm1, %v1805_v20  ;;  %1808 = vst.msk [vmem:[#allocation5 + $0x1c] sm:$0xf] %vm426_vm1, %v1807_v25  ;;  %v2303_v23 = vld [vmem:[#allocation2 + $0xe4] sm:$0xf] }
 0x1ca   :  { %6162 = vmatpush3.bf16.msra.mxu1 %v6159_v17  ;;  %5786 = vmatprep.mubr.msk.f32.mxu1 %vm392_vm0, %v1813_v14  ;;  %v2180_v17 = vld [vmem:[#allocation2 + $0xb5] sm:$0xf]  ;;  %v2307_v20 = vld [vmem:[#allocation2 + $0xee] sm:$0xf] }
 0x1cb   :  { %v1939_v33 = vld [vmem:[#allocation5 + $0x8] sm:$0xff]  ;;  %6164 = vmatprep.subr.bf16.mxu1 %v6163_v27 }
 0x1cc   :  { %2048 = vst.msk [vmem:[#allocation5 + $0x8] sm:$0xf] %vm426_vm1, %v2047_v32  ;;  %2050 = vst.msk [vmem:[#allocation5 + $0xc] sm:$0xf] %vm426_vm1, %v2049_v31  ;;  %v1815_v39 = vld [vmem:[#allocation5 + $0x10] sm:$0xff]  ;;  %v2465_v32 = vld [vmem:[%s8990_s5 + $0x48] sm:$0xff] }
 0x1cd   :  { %5787 = vmatmul.mubr.msk.f32.vlgmr.msra.gmra.mrb[0].mxu1 %vm392_vm0, %v1814_v16  ;;  %1927 = vst.msk [vmem:[#allocation5 + $0x10] sm:$0xf] %vm426_vm1, %v1926_v37  ;;  %1929 = vst.msk [vmem:[#allocation5 + $0x14] sm:$0xf] %vm426_vm1, %v1928_v38  ;;  %v2312_v16 = vld [vmem:[%s8988_s3 + $0x1f8] sm:$0xff]  ;;  %v2469_v37 = vld [vmem:[%s8990_s5 + $0x68] sm:$0xff] }
 0x1ce   :  { %6166 = vmatpush3.bf16.msra.mxu1 %v6163_v27  ;;  %5789 = vmatprep.mubr.msk.f32.mxu1 %vm392_vm0, %v1815_v39  ;;  %v6191_v21 = vpack.c.bf16 %v2312_v16, %v2311_v54  ;;  %v6202_v38 = vpack.c.bf16 %v2469_v37, %v2468_v36  ;;  %v2470_v39 = vld [vmem:[%s8990_s5 + $0x70] sm:$0xff]  ;;  %v2450_v54 = vld [vmem:[%s8990_s5 + $0x18] sm:$0xff] }
 0x1cf   :  { %6168 = vmatprep.subr.bf16.mxu1 %v6167_v34  ;;  %v2063_v46 = vld [vmem:[#allocation5] sm:$0xff]  ;;  %v6205_v56 = vpack.c.bf16 %v2471_v40, %v2470_v39  ;;  %v2629_v36 = vld [vmem:[%s8990_s5 + $0x90] sm:$0xff]  ;;  %v2630_v37 = vld [vmem:[%s8990_s5 + $0x98] sm:$0xff] }
 0x1d0   :  { %v1816_v45 = vld [vmem:[#allocation5 + $0x18] sm:$0xff]  ;;  %2169 = vst.msk [vmem:[#allocation5] sm:$0xf] %vm426_vm1, %v2168_v57  ;;  %2171 = vst.msk [vmem:[#allocation5 + $0x4] sm:$0xf] %vm426_vm1, %v2170_v41  ;;  %v8998_v57 = vmov 0.0  }
 0x1d1   :  { %5790 = vmatmul.mubr.msk.f32.gmra.mrb[2].mxu1 %vm392_vm0, %v1816_v45  ;;  %1931 = vst.msk [vmem:[#allocation5 + $0x18] sm:$0xf] %vm426_vm1, %v1930_v42  ;;  %1933 = vst.msk [vmem:[#allocation5 + $0x1c] sm:$0xf] %vm426_vm1, %v1932_v44  ;;  %5921 = vmatprep.mubr.msk.f32.mxu0 %vm6775_vm3, %v8998_v57  ;;  %v2722_v41 = vld [vmem:[%s8990_s5 + $0xe0] sm:$0xff]  ;;  %v2723_v42 = vld [vmem:[%s8990_s5 + $0xe8] sm:$0xff] }
 0x1d2   :  { %6170 = vmatpush3.bf16.msra.mxu1 %v6167_v34  ;;  %5800 = vmatprep.mubr.msk.f32.mxu1 %vm392_vm0, %v1938_v30  ;;  %v2464_v30 = vld [vmem:[%s8990_s5 + $0x40] sm:$0xff]  ;;  %v2467_v34 = vld [vmem:[%s8990_s5 + $0x58] sm:$0xff]  ;;  %v2724_v44 = vld [vmem:[%s8990_s5 + $0xf0] sm:$0xff] }
 0x1d3   :  { %v2064_v49 = vld [vmem:[#allocation5 + $0x8] sm:$0xff]  ;;  %6172 = vmatprep.subr.bf16.mxu1 %v6171_v43  ;;  %v6196_v31 = vpack.c.bf16 %v2465_v32, %v2464_v30  ;;  %v2725_v45 = vld [vmem:[%s8990_s5 + $0xf8] sm:$0xff]  ;;  %v2627_v30 = vld [vmem:[%s8990_s5 + $0x80] sm:$0xff] }
 0x1d4   :  { %2173 = vst.msk [vmem:[#allocation5 + $0x8] sm:$0xf] %vm426_vm1, %v2172_v47  ;;  %2175 = vst.msk [vmem:[#allocation5 + $0xc] sm:$0xf] %vm426_vm1, %v2174_v48  ;;  %v1940_v59 = vld [vmem:[#allocation5 + $0x10] sm:$0xff]  ;;  %v2628_v32 = vld [vmem:[%s8990_s5 + $0x88] sm:$0xff] }
 0x1d5   :  { %5801 = vmatmul.mubr.msk.f32.vlgmr.msra.gmra.mrb[0].mxu1 %vm392_vm0, %v1939_v33  ;;  %2052 = vst.msk [vmem:[#allocation5 + $0x10] sm:$0xf] %vm426_vm1, %v2051_v55  ;;  %2054 = vst.msk [vmem:[#allocation5 + $0x14] sm:$0xf] %vm426_vm1, %v2053_v58  ;;  %v2466_v33 = vld [vmem:[%s8990_s5 + $0x50] sm:$0xff] }
 0x1d6   :  { %6174 = vmatpush3.bf16.msra.mxu1 %v6171_v43  ;;  %5803 = vmatprep.mubr.msk.f32.mxu1 %vm392_vm0, %v1940_v59  ;;  %v6199_v35 = vpack.c.bf16 %v2467_v34, %v2466_v33  ;;  %v6238_v43 = vpack.c.bf16 %v2723_v42, %v2722_v41  ;;  %v5248_v47 = vld [vmem:[%s8991_s4] ss:$0 sm:$0xff]  ;;  %v2901_v33 = vld [vmem:[%s8990_s5 + $0x148] sm:$0xff]  ;;  %v6220_v34 = vpack.c.bf16 %v2628_v32, %v2627_v30  ;;  %v3089_v30 = vld [vmem:[%s8990_s5 + $0x1f8] sm:$0xff] }
 0x1d7   :  { %6176 = vmatprep.subr.bf16.mxu1 %v6175_v50  ;;  %v2188_v5 = vld [vmem:[#allocation5] sm:$0xff] }
 0x1d8   :  { %v1941_v4 = vld [vmem:[#allocation5 + $0x18] sm:$0xff]  ;;  %2294 = vst.msk [vmem:[#allocation5] sm:$0xf] %vm426_vm1, %v2293_v62  ;;  %2296 = vst.msk [vmem:[#allocation5 + $0x4] sm:$0xf] %vm426_vm1, %v2295_v63  ;;  %6239 = vmatpush3.bf16.msra.mxu0 %v6238_v43 }
 0x1d9   :  { %5804 = vmatmul.mubr.msk.f32.gmra.mrb[2].mxu1 %vm392_vm0, %v1941_v4  ;;  %2056 = vst.msk [vmem:[#allocation5 + $0x18] sm:$0xf] %vm426_vm1, %v2055_v1  ;;  %2058 = vst.msk [vmem:[#allocation5 + $0x1c] sm:$0xf] %vm426_vm1, %v2057_v3  ;;  %6240 = vmatprep.subr.bf16.mxu0 %v6774_v0 }
 0x1da   :  { %6178 = vmatpush3.bf16.msra.mxu1 %v6175_v50  ;;  %5814 = vmatprep.mubr.msk.f32.mxu1 %vm392_vm0, %v2063_v46  ;;  %v6241_v46 = vpack.c.bf16 %v2725_v45, %v2724_v44  ;;  %v6223_v44 = vpack.c.bf16 %v2630_v37, %v2629_v36  ;;  %v2991_v36 = vld [vmem:[%s8990_s5 + $0x180] sm:$0xff]  ;;  %v2992_v37 = vld [vmem:[%s8990_s5 + $0x188] sm:$0xff] }
 0x1db   :  { %v2189_v8 = vld [vmem:[#allocation5 + $0x8] sm:$0xff]  ;;  %6180 = vmatprep.subr.bf16.mxu1 %v6179_v2 }
 0x1dc   :  { %2298 = vst.msk [vmem:[#allocation5 + $0x8] sm:$0xf] %vm426_vm1, %v2297_v6  ;;  %2300 = vst.msk [vmem:[#allocation5 + $0xc] sm:$0xf] %vm426_vm1, %v2299_v7  ;;  %v2065_v14 = vld [vmem:[#allocation5 + $0x10] sm:$0xff]  ;;  %6242 = vmatpush3.bf16.msra.mxu0 %v6241_v46  ;;  %v2631_v46 = vld [vmem:[%s8990_s5 + $0xa0] sm:$0xff] }
 0x1dd   :  { %5815 = vmatmul.mubr.msk.f32.vlgmr.msra.gmra.mrb[0].mxu1 %vm392_vm0, %v2064_v49  ;;  %2177 = vst.msk [vmem:[#allocation5 + $0x10] sm:$0xf] %vm426_vm1, %v2176_v12  ;;  %2179 = vst.msk [vmem:[#allocation5 + $0x14] sm:$0xf] %vm426_vm1, %v2178_v13  ;;  %6255 = vmatprep.subr.bf16.mxu0 %v6774_v0  ;;  %v6208_v12 = vpack.c.bf16 %v2448_v11, %v2447_v10  ;;  %v2449_v13 = vld [vmem:[%s8990_s5 + $0x10] sm:$0xff]  ;;  %v2812_v11 = vld [vmem:[%s8990_s5 + $0x118] sm:$0xff] }
 0x1de   :  { %6182 = vmatpush3.bf16.msra.mxu1 %v6179_v2  ;;  %5817 = vmatprep.mubr.msk.f32.mxu1 %vm392_vm0, %v2065_v14  ;;  %v2811_v10 = vld [vmem:[%s8990_s5 + $0x110] sm:$0xff] }
 0x1df   :  { %6184 = vmatprep.subr.bf16.mxu1 %v6183_v9  ;;  %v2313_v26 = vld [vmem:[#allocation5] sm:$0xff] }
 0x1e0   :  { %v2066_v19 = vld [vmem:[#allocation5 + $0x18] sm:$0xff] }
 0x1e1   :  { %5818 = vmatmul.mubr.msk.f32.gmra.mrb[2].mxu1 %vm392_vm0, %v2066_v19  ;;  %2181 = vst.msk [vmem:[#allocation5 + $0x18] sm:$0xf] %vm426_vm1, %v2180_v17  ;;  %2183 = vst.msk [vmem:[#allocation5 + $0x1c] sm:$0xf] %vm426_vm1, %v2182_v18  ;;  %v6211_v19 = vpack.c.bf16 %v2450_v54, %v2449_v13 }
 0x1e2   :  { %6186 = vmatpush3.bf16.msra.mxu1 %v6183_v9  ;;  %5828 = vmatprep.mubr.msk.f32.mxu1 %vm392_vm0, %v2188_v5 }
 0x1e3   :  { %6188 = vmatprep.subr.bf16.mxu1 %v6187_v15  ;;  %v2314_v27 = vld [vmem:[#allocation5 + $0x8] sm:$0xff] }
 0x1e4   :  { %v2190_v24 = vld [vmem:[#allocation5 + $0x10] sm:$0xff] }
 0x1e5   :  { %5829 = vmatmul.mubr.msk.f32.vlgmr.msra.gmra.mrb[0].mxu1 %vm392_vm0, %v2189_v8  ;;  %2302 = vst.msk [vmem:[#allocation5 + $0x10] sm:$0xf] %vm426_vm1, %v2301_v22  ;;  %2304 = vst.msk [vmem:[#allocation5 + $0x14] sm:$0xf] %vm426_vm1, %v2303_v23  ;;  %v2452_v22 = vld [vmem:[%s8990_s5 + $0x28] sm:$0xff] }
 0x1e6   :  { %6190 = vmatpush3.bf16.msra.mxu1 %v6187_v15  ;;  %5831 = vmatprep.mubr.msk.f32.mxu1 %vm392_vm0, %v2190_v24  ;;  %v2453_v24 = vld [vmem:[%s8990_s5 + $0x30] sm:$0xff] }
 0x1e7   :  { %6192 = vmatprep.subr.bf16.mxu1 %v6191_v21 }
 0x1e8   :  { %v2191_v25 = vld [vmem:[#allocation5 + $0x18] sm:$0xff] }
 0x1e9   :  { %5832 = vmatmul.mubr.msk.f32.gmra.mrb[2].mxu1 %vm392_vm0, %v2191_v25  ;;  %2306 = vst.msk [vmem:[#allocation5 + $0x18] sm:$0xf] %vm426_vm1, %v2305_v60  ;;  %2308 = vst.msk [vmem:[#allocation5 + $0x1c] sm:$0xf] %vm426_vm1, %v2307_v20  ;;  %v2454_v25 = vld [vmem:[%s8990_s5 + $0x38] sm:$0xff] }
 0x1ea   :  { %6194 = vmatpush3.bf16.msra.mxu1 %v6191_v21  ;;  %5842 = vmatprep.mubr.msk.f32.mxu1 %vm392_vm0, %v2313_v26  ;;  %v2451_v21 = vld [vmem:[%s8990_s5 + $0x20] sm:$0xff] }
 0x1eb   :  { %6195 = vmatprep.subr.bf16.mxu1 %v6774_v0  ;;  %v6214_v23 = vpack.c.bf16 %v2452_v22, %v2451_v21  ;;  %v2813_v21 = vld [vmem:[%s8990_s5 + $0x120] sm:$0xff]  ;;  %v2814_v22 = vld [vmem:[%s8990_s5 + $0x128] sm:$0xff] }
 0x1ec   :  { %v2315_v28 = vld [vmem:[#allocation5 + $0x10] sm:$0xff] }
 0x1ed   :  { %5843 = vmatmul.mubr.msk.f32.vlgmr.msra.gmra.mrb[0].mxu1 %vm392_vm0, %v2314_v27 }
 0x1ee   :  { %5845 = vmatprep.mubr.msk.f32.mxu1 %vm392_vm0, %v2315_v28  ;;  %6197 = vmatpush3.bf16.msra.mxu1 %v6196_v31  ;;  %v2900_v31 = vld [vmem:[%s8990_s5 + $0x140] sm:$0xff] }
 0x1ef   :  { %6198 = vmatprep.subr.bf16.mxu1 %v6774_v0 }
 0x1f0   :  { %v2316_v29 = vld [vmem:[#allocation5 + $0x18] sm:$0xff] }
 0x1f1   :  { %5846 = vmatmul.mubr.msk.f32.gmra.mrb[2].mxu1 %vm392_vm0, %v2316_v29  ;;  %v6217_v29 = vpack.c.bf16 %v2454_v25, %v2453_v24  ;;  %v3087_v24 = vld [vmem:[%s8990_s5 + $0x1e8] sm:$0xff]  ;;  %v2815_v25 = vld [vmem:[%s8990_s5 + $0x130] sm:$0xff] }
 0x1f2   :  { %6200 = vmatpush3.bf16.msra.mxu1 %v6199_v35  ;;  %5864 = vmatprep.mubr.msk.f32.mxu1 %vm6775_vm3, %v8998_v57  ;;  %v6256_v35 = vpack.c.bf16 %v2901_v33, %v2900_v31 }
 0x1f3   :  { %6201 = vmatprep.subr.bf16.mxu1 %v6774_v0 }
 0x1f6   :  { %6203 = vmatpush3.bf16.msra.mxu1 %v6202_v38  ;;  %v2902_v38 = vld [vmem:[%s8990_s5 + $0x150] sm:$0xff] }
 0x1f7   :  { %6204 = vmatprep.subr.bf16.mxu1 %v6774_v0 }
 0x1fa   :  { %6206 = vmatpush3.bf16.msra.mxu1 %v6205_v56  ;;  %v2903_v56 = vld [vmem:[%s8990_s5 + $0x158] sm:$0xff] }
 0x1fb   :  { %6207 = vmatprep.subr.bf16.mxu1 %v6774_v0  ;;  %v6259_v45 = vpack.c.bf16 %v2903_v56, %v2902_v38  ;;  %v6268_v38 = vpack.c.bf16 %v2992_v37, %v2991_v36  ;;  %v3318_v36 = vld [vmem:[%s8992_s7 + $0x190] sm:$0xff] }
 0x1fc   :  { %v3322_v37 = vld [vmem:[%s8992_s7 + $0x1b0] sm:$0xff] }
 0x2c0   :  { %v5844_v48 = vpop.f32.mrb[0].mxu1 }
 0x2c1   :  { %v2426_v49 = vadd.f32 %v5844_v48, %v5248_v47  ;;  %v2395_v50 = vpop.f32.mrb[1].mxu1  ;;  %v2904_v48 = vld [vmem:[%s8990_s5 + $0x160] sm:$0xff] }
 0x2c2   :  { %v2425_v51 = vadd.f32 %v5248_v47, %v2395_v50 }
 0x2c3   :  { %v2430_v53 = vmax.f32 %v2426_v49, 0.0  ;;  %v2905_v49 = vld [vmem:[%s8990_s5 + $0x168] sm:$0xff] }
 0x2c4   :  { %v2429_v55 = vmax.f32 %v2425_v51, 0.0  ;;  %v5847_v58 = vpop.f32.mrb[2].mxu1  ;;  %v6262_v51 = vpack.c.bf16 %v2905_v49, %v2904_v48  ;;  %v2997_v49 = vld [vmem:[%s8990_s5 + $0x1b0] sm:$0xff] }
 0x2c5   :  { %2435 = vst.msk [vmem:[#allocation3 + $0x8] sm:$0xff] %vm2433_vm4, %v2430_v53  ;;  %v2428_v59 = vadd.f32 %v5847_v58, %v5248_v47  ;;  %v2405_v52 = vpop.f32.mrb[3].mxu1  ;;  %v2633_v53 = vld [vmem:[%s8990_s5 + $0xb0] sm:$0xff] }
 0x2c6   :  { %2434 = vst.msk [vmem:[#allocation3] sm:$0xff] %vm2433_vm4, %v2429_v55  ;;  %v2427_v61 = vadd.f32 %v5248_v47, %v2405_v52  ;;  %v2632_v47 = vld [vmem:[%s8990_s5 + $0xa8] sm:$0xff]  ;;  %v2634_v55 = vld [vmem:[%s8990_s5 + $0xb8] sm:$0xff]  ;;  %v2906_v58 = vld [vmem:[%s8990_s5 + $0x170] sm:$0xff] }
 0x2c7   :  { %v2432_v62 = vmax.f32 %v2428_v59, 0.0  ;;  %v6226_v50 = vpack.c.bf16 %v2632_v47, %v2631_v46  ;;  %v2995_v46 = vld [vmem:[%s8990_s5 + $0x1a0] sm:$0xff]  ;;  %v2996_v47 = vld [vmem:[%s8990_s5 + $0x1a8] sm:$0xff] }
 0x2c8   :  { %v2431_v63 = vmax.f32 %v2427_v61, 0.0  ;;  %v2907_v61 = vld [vmem:[%s8990_s5 + $0x178] sm:$0xff]  ;;  %v6274_v48 = vpack.c.bf16 %v2996_v47, %v2995_v46  ;;  %v3326_v47 = vld [vmem:[%s8992_s7 + $0x1d0] sm:$0xff] }
 0x2c9   :  { %2437 = vst.msk [vmem:[#allocation3 + $0x18] sm:$0xff] %vm2433_vm4, %v2432_v62 }
 0x2ca   :  { %2436 = vst.msk [vmem:[#allocation3 + $0x10] sm:$0xff] %vm2433_vm4, %v2431_v63 }
 0x2cc   :  { %v2712_v60 = vld [vmem:[#allocation3 + $0x8] sm:$0x3]  ;;  %v2894_v59 = vld [vmem:[#allocation3 + $0xa] sm:$0x3]  ;;  %v3167_v56 = vld [vmem:[#allocation3 + $0xe] sm:$0x3] }
 0x2cd   :  { %v2438_v1 = vld [vmem:[#allocation3] sm:$0x3]  ;;  %v2441_v2 = vld [vmem:[#allocation3 + $0x4] sm:$0x3]  ;;  %v2619_v14 = vld [vmem:[#allocation3 + $0x2] sm:$0x3] }
 0x2ce   :  { %2440 = vst.msk [vmem:[#allocation6] sm:$0x3] %vm2439_vm5, %v2438_v1  ;;  %2442 = vst.msk [vmem:[#allocation6 + $0x2] sm:$0x3] %vm2439_vm5, %v2441_v2  ;;  %v2456_v5 = vld [vmem:[#allocation3 + $0x1] sm:$0x3]  ;;  %v6229_v2 = vpack.c.bf16 %v2634_v55, %v2633_v53 }
 0x2cf   :  { %v2458_v6 = vld [vmem:[#allocation3 + $0x5] sm:$0x3]  ;;  %v2803_v39 = vld [vmem:[#allocation3 + $0x9] sm:$0x3]  ;;  %v3174_v55 = vld [vmem:[%s8990_s5 + $0x208] sm:$0xff] }
 0x2d0   :  { %v2621_v15 = vld [vmem:[#allocation3 + $0x6] sm:$0x3]  ;;  %v2710_v20 = vld [vmem:[#allocation3 + $0x4] sm:$0x3]  ;;  %v2716_v26 = vld [vmem:[#allocation3 + $0x18] sm:$0x3] }
 0x2d1   :  { %v2443_v3 = vld [vmem:[#allocation3 + $0x10] sm:$0x3]  ;;  %v2445_v4 = vld [vmem:[#allocation3 + $0x14] sm:$0x3]  ;;  %v2623_v17 = vld [vmem:[#allocation3 + $0x12] sm:$0x3] }
 0x2d2   :  { %2444 = vst.msk [vmem:[#allocation6 + $0x4] sm:$0x3] %vm2439_vm5, %v2443_v3  ;;  %2446 = vst.msk [vmem:[#allocation6 + $0x6] sm:$0x3] %vm2439_vm5, %v2445_v4  ;;  %v2460_v8 = vld [vmem:[#allocation3 + $0x11] sm:$0x3]  ;;  %v6265_v3 = vpack.c.bf16 %v2907_v61, %v2906_v58 }
 0x2d3   :  { %v2462_v9 = vld [vmem:[#allocation3 + $0x15] sm:$0x3]  ;;  %v2801_v40 = vld [vmem:[#allocation3 + $0x5] sm:$0x3]  ;;  %v2807_v41 = vld [vmem:[#allocation3 + $0x19] sm:$0x3] }
 0x2d4   :  { %v2625_v18 = vld [vmem:[#allocation3 + $0x16] sm:$0x3]  ;;  %v2714_v28 = vld [vmem:[#allocation3 + $0x14] sm:$0x3]  ;;  %v2892_v52 = vld [vmem:[#allocation3 + $0x6] sm:$0x3] }
 0x2d5   :  { %v2805_v43 = vld [vmem:[#allocation3 + $0x15] sm:$0x3]  ;;  %v2898_v62 = vld [vmem:[#allocation3 + $0x1a] sm:$0x3]  ;;  %v2809_v4 = vld [vmem:[%s8990_s5 + $0x100] sm:$0xff] }
 0x2d6   :  { %v2896_v1 = vld [vmem:[#allocation3 + $0x16] sm:$0x3]  ;;  %v2983_v13 = vld [vmem:[#allocation3 + $0x8] sm:$0x3]  ;;  %v2987_v54 = vld [vmem:[#allocation3 + $0x18] sm:$0x3] }
 0x2d7   :  { %v3078_v32 = vld [vmem:[#allocation3 + $0x19] sm:$0x3]  ;;  %v3080_v31 = vld [vmem:[#allocation3 + $0x1d] sm:$0x3]  ;;  %v3173_v53 = vld [vmem:[%s8990_s5 + $0x200] sm:$0xff] }
 0x2d8   :  { %v6292_v58 = vpack.c.bf16 %v3174_v55, %v3173_v53  ;;  %v3270_v53 = vld [vmem:[%s8992_s7 + $0x18] sm:$0xff] }
 0x2d9   :  { %v7693_v7 = vld [vmem:[#allocation6] sm:$0xff]  ;;  %v3274_v55 = vld [vmem:[%s8992_s7 + $0x38] sm:$0xff] }
 0x2da   :  { %2457 = vst.msk [vmem:[#allocation6] sm:$0x3] %vm2439_vm5, %v2456_v5  ;;  %2459 = vst.msk [vmem:[#allocation6 + $0x2] sm:$0x3] %vm2439_vm5, %v2458_v6  ;;  %v2810_v5 = vld [vmem:[%s8990_s5 + $0x108] sm:$0xff]  ;;  %v3082_v6 = vld [vmem:[%s8990_s5 + $0x1c0] sm:$0xff] }
 0x2db   :  { %2461 = vst.msk [vmem:[#allocation6 + $0x4] sm:$0x3] %vm2439_vm5, %v2460_v8  ;;  %2463 = vst.msk [vmem:[#allocation6 + $0x6] sm:$0x3] %vm2439_vm5, %v2462_v9  ;;  %v6244_v8 = vpack.c.bf16 %v2810_v5, %v2809_v4 }
 0x2e2   :  { %v2472_v16 = vld [vmem:[#allocation6] sm:$0xff] }
 0x2e3   :  { %2620 = vst.msk [vmem:[#allocation6] sm:$0x3] %vm2439_vm5, %v2619_v14  ;;  %2622 = vst.msk [vmem:[#allocation6 + $0x2] sm:$0x3] %vm2439_vm5, %v2621_v15  ;;  %5865 = vmatmul.mubr.msk.f32.vlgmr.msra.gmra.mrb[4].mxu1 %vm2433_vm4, %v2472_v16  ;;  %v2985_v14 = vld [vmem:[#allocation3 + $0xc] sm:$0x3] }
 0x2e4   :  { %2624 = vst.msk [vmem:[#allocation6 + $0x4] sm:$0x3] %vm2439_vm5, %v2623_v17  ;;  %2626 = vst.msk [vmem:[#allocation6 + $0x6] sm:$0x3] %vm2439_vm5, %v2625_v18  ;;  %6209 = vmatpush3.bf16.msra.mxu1 %v6208_v12  ;;  %5883 = vmatprep.mubr.msk.f32.mxu1 %vm6775_vm3, %v8998_v57  ;;  %v3084_v12 = vld [vmem:[%s8990_s5 + $0x1d0] sm:$0xff]  ;;  %v3085_v15 = vld [vmem:[%s8990_s5 + $0x1d8] sm:$0xff]  ;;  %v6247_v18 = vpack.c.bf16 %v2812_v11, %v2811_v10 }
 0x2e5   :  { %6210 = vmatprep.subr.bf16.mxu1 %v6774_v0  ;;  %v2989_v16 = vld [vmem:[#allocation3 + $0x1c] sm:$0x3]  ;;  %v3300_v10 = vld [vmem:[%s8992_s7 + $0x100] sm:$0xff] }
 0x2e6   :  { %v3304_v11 = vld [vmem:[%s8992_s7 + $0x120] sm:$0xff] }
 0x2e8   :  { %6212 = vmatpush3.bf16.msra.mxu1 %v6211_v19  ;;  %v6283_v19 = vpack.c.bf16 %v3085_v15, %v3084_v12  ;;  %v3306_v15 = vld [vmem:[%s8992_s7 + $0x130] sm:$0xff] }
 0x2e9   :  { %6213 = vmatprep.subr.bf16.mxu1 %v6774_v0 }
 0x2eb   :  { %v7732_v27 = vld [vmem:[#allocation6] sm:$0xff] }
 0x2ec   :  { %2711 = vst.msk [vmem:[#allocation6] sm:$0x3] %vm2439_vm5, %v2710_v20  ;;  %2713 = vst.msk [vmem:[#allocation6 + $0x2] sm:$0x3] %vm2439_vm5, %v2712_v60  ;;  %6215 = vmatpush3.bf16.msra.mxu1 %v6214_v23  ;;  %v3086_v23 = vld [vmem:[%s8990_s5 + $0x1e0] sm:$0xff]  ;;  %v6250_v60 = vpack.c.bf16 %v2814_v22, %v2813_v21  ;;  %v3315_v21 = vld [vmem:[%s8992_s7 + $0x178] sm:$0xff] }
 0x2ed   :  { %2715 = vst.msk [vmem:[#allocation6 + $0x4] sm:$0x3] %vm2439_vm5, %v2714_v28  ;;  %2717 = vst.msk [vmem:[#allocation6 + $0x6] sm:$0x3] %vm2439_vm5, %v2716_v26  ;;  %6216 = vmatprep.subr.bf16.mxu1 %v6774_v0  ;;  %v6286_v20 = vpack.c.bf16 %v3087_v24, %v3086_v23  ;;  %v2816_v26 = vld [vmem:[%s8990_s5 + $0x138] sm:$0xff]  ;;  %v3308_v22 = vld [vmem:[%s8992_s7 + $0x140] sm:$0xff] }
 0x2ee   :  { %v3074_v28 = vld [vmem:[#allocation3 + $0x9] sm:$0x3] }
 0x2ef   :  { %v3312_v24 = vld [vmem:[%s8992_s7 + $0x160] sm:$0xff] }
 0x2f0   :  { %6218 = vmatpush3.bf16.msra.mxu1 %v6217_v29  ;;  %v3076_v29 = vld [vmem:[#allocation3 + $0xd] sm:$0x3] }
 0x2f1   :  { %6219 = vmatprep.subr.bf16.mxu1 %v6774_v0 }
 0x2f3   :  { %5884 = vmatmul.mubr.msk.f32.vlgmr.msra.gmra.mrb[6].mxu1 %vm2433_vm4, %v7693_v7  ;;  %v3083_v7 = vld [vmem:[%s8990_s5 + $0x1c8] sm:$0xff] }
 0x2f4   :  { %v2726_v42 = vld [vmem:[#allocation6] sm:$0xff]  ;;  %6221 = vmatpush3.bf16.msra.mxu1 %v6220_v34  ;;  %5902 = vmatprep.mubr.msk.f32.mxu1 %vm6775_vm3, %v8998_v57  ;;  %v6280_v9 = vpack.c.bf16 %v3083_v7, %v3082_v6  ;;  %v6253_v34 = vpack.c.bf16 %v2816_v26, %v2815_v25  ;;  %v3301_v6 = vld [vmem:[%s8992_s7 + $0x108] sm:$0xff]  ;;  %v8018_v25 = vpack.c.bf16 %v3312_v24, %v3308_v22 }
 0x2f5   :  { %2802 = vst.msk [vmem:[#allocation6] sm:$0x3] %vm2439_vm5, %v2801_v40  ;;  %2804 = vst.msk [vmem:[#allocation6 + $0x2] sm:$0x3] %vm2439_vm5, %v2803_v39  ;;  %5922 = vmatmul.mubr.msk.f32.vlgmr.msra.gmra.mrb[62].mxu0 %vm2433_vm4, %v2726_v42  ;;  %6222 = vmatprep.subr.bf16.mxu1 %v6774_v0  ;;  %v2993_v39 = vld [vmem:[%s8990_s5 + $0x190] sm:$0xff]  ;;  %v3305_v7 = vld [vmem:[%s8992_s7 + $0x128] sm:$0xff] }
 0x2f6   :  { %2806 = vst.msk [vmem:[#allocation6 + $0x4] sm:$0x3] %vm2439_vm5, %v2805_v43  ;;  %2808 = vst.msk [vmem:[#allocation6 + $0x6] sm:$0x3] %vm2439_vm5, %v2807_v41  ;;  %6257 = vmatpush3.bf16.msra.mxu0 %v6256_v35  ;;  %5959 = vmatprep.mubr.msk.f32.mxu0 %vm6775_vm3, %v8998_v57  ;;  %v3165_v40 = vld [vmem:[#allocation3 + $0xa] sm:$0x3] }
 0x2f7   :  { %6258 = vmatprep.subr.bf16.mxu0 %v6774_v0  ;;  %v2994_v41 = vld [vmem:[%s8990_s5 + $0x198] sm:$0xff]  ;;  %v3169_v42 = vld [vmem:[#allocation3 + $0x1a] sm:$0x3]  ;;  %v3171_v43 = vld [vmem:[#allocation3 + $0x1e] sm:$0x3] }
 0x2f8   :  { %6224 = vmatpush3.bf16.msra.mxu1 %v6223_v44 }
 0x2f9   :  { %6225 = vmatprep.subr.bf16.mxu1 %v6774_v0 }
 0x2fa   :  { %6260 = vmatpush3.bf16.msra.mxu0 %v6259_v45  ;;  %v6271_v45 = vpack.c.bf16 %v2994_v41, %v2993_v39  ;;  %v3325_v39 = vld [vmem:[%s8992_s7 + $0x1c8] sm:$0xff] }
 0x2fb   :  { %6261 = vmatprep.subr.bf16.mxu0 %v6774_v0 }
 0x2fc   :  { %6227 = vmatpush3.bf16.msra.mxu1 %v6226_v50  ;;  %v2998_v50 = vld [vmem:[%s8990_s5 + $0x1b8] sm:$0xff] }
 0x2fd   :  { %v7803_v63 = vld [vmem:[#allocation6] sm:$0xff]  ;;  %6228 = vmatprep.subr.bf16.mxu1 %v6774_v0 }
 0x2fe   :  { %2897 = vst.msk [vmem:[#allocation6 + $0x4] sm:$0x3] %vm2439_vm5, %v2896_v1  ;;  %2893 = vst.msk [vmem:[#allocation6] sm:$0x3] %vm2439_vm5, %v2892_v52  ;;  %6263 = vmatpush3.bf16.msra.mxu0 %v6262_v51  ;;  %v6277_v51 = vpack.c.bf16 %v2998_v50, %v2997_v49  ;;  %v3176_v52 = vld [vmem:[%s8990_s5 + $0x218] sm:$0xff]  ;;  %v3268_v49 = vld [vmem:[%s8992_s7 + $0x8] sm:$0xff] }
 0x2ff   :  { %2895 = vst.msk [vmem:[#allocation6 + $0x2] sm:$0x3] %vm2439_vm5, %v2894_v59  ;;  %2899 = vst.msk [vmem:[#allocation6 + $0x6] sm:$0x3] %vm2439_vm5, %v2898_v62  ;;  %6264 = vmatprep.subr.bf16.mxu0 %v6774_v0  ;;  %v3175_v59 = vld [vmem:[%s8990_s5 + $0x210] sm:$0xff]  ;;  %v3177_v62 = vld [vmem:[%s8990_s5 + $0x220] sm:$0xff] }
 0x300   :  { %6230 = vmatpush3.bf16.msra.mxu1 %v6229_v2  ;;  %v6295_v61 = vpack.c.bf16 %v3176_v52, %v3175_v59  ;;  %v3179_v2 = vld [vmem:[%s8990_s5 + $0x230] sm:$0xff]  ;;  %v8109_v59 = vpack.c.bf16 %v3274_v55, %v3270_v53 }
 0x301   :  { %6243 = vmatprep.subr.bf16.mxu1 %v6774_v0  ;;  %v3281_v55 = vld [vmem:[%s8992_s7 + $0x70] sm:$0xff] }
 0x302   :  { %6266 = vmatpush3.bf16.msra.mxu0 %v6265_v3  ;;  %v3180_v3 = vld [vmem:[%s8990_s5 + $0x238] sm:$0xff] }
 0x303   :  { %6279 = vmatprep.subr.bf16.mxu0 %v6774_v0  ;;  %5903 = vmatmul.mubr.msk.f32.vlgmr.msra.gmra.mrb[8].mxu1 %vm2433_vm4, %v7732_v27  ;;  %v3088_v27 = vld [vmem:[%s8990_s5 + $0x1f0] sm:$0xff]  ;;  %v6301_v4 = vpack.c.bf16 %v3180_v3, %v3179_v2 }
 0x304   :  { %6245 = vmatpush3.bf16.msra.mxu1 %v6244_v8  ;;  %5940 = vmatprep.mubr.msk.f32.mxu1 %vm6775_vm3, %v8998_v57  ;;  %v6289_v35 = vpack.c.bf16 %v3089_v30, %v3088_v27  ;;  %v3303_v8 = vld [vmem:[%s8992_s7 + $0x118] sm:$0xff]  ;;  %v3317_v27 = vld [vmem:[%s8992_s7 + $0x188] sm:$0xff] }
 0x305   :  { %6246 = vmatprep.subr.bf16.mxu1 %v6774_v0 }
 0x306   :  { %v2908_v17 = vld [vmem:[#allocation6] sm:$0xff] }
 0x307   :  { %5960 = vmatmul.mubr.msk.f32.vlgmr.msra.gmra.mrb[64].mxu0 %vm2433_vm4, %v2908_v17  ;;  %2984 = vst.msk [vmem:[#allocation6] sm:$0x3] %vm2439_vm5, %v2983_v13  ;;  %2986 = vst.msk [vmem:[#allocation6 + $0x2] sm:$0x3] %vm2439_vm5, %v2985_v14  ;;  %v7975_v13 = vpack.c.bf16 %v3304_v11, %v3300_v10  ;;  %v3302_v14 = vld [vmem:[%s8992_s7 + $0x110] sm:$0xff]  ;;  %v3313_v17 = vld [vmem:[%s8992_s7 + $0x168] sm:$0xff] }
 0x308   :  { %2988 = vst.msk [vmem:[#allocation6 + $0x4] sm:$0x3] %vm2439_vm5, %v2987_v54  ;;  %2990 = vst.msk [vmem:[#allocation6 + $0x6] sm:$0x3] %vm2439_vm5, %v2989_v16  ;;  %6281 = vmatpush3.bf16.msra.mxu0 %v6280_v9  ;;  %5997 = vmatprep.mubr.msk.f32.mxu0 %vm6775_vm3, %v8998_v57  ;;  %v7962_v9 = vpack.c.bf16 %v3305_v7, %v3301_v6  ;;  %v7984_v54 = vpack.c.bf16 %v3306_v15, %v3302_v14  ;;  %v3309_v16 = vld [vmem:[%s8992_s7 + $0x148] sm:$0xff] }
 0x309   :  { %6282 = vmatprep.subr.bf16.mxu0 %v6774_v0  ;;  %6248 = vmatpush3.bf16.msra.mxu1 %v6247_v18  ;;  %v3311_v18 = vld [vmem:[%s8992_s7 + $0x158] sm:$0xff] }
 0x30a   :  { %6249 = vmatprep.subr.bf16.mxu1 %v6774_v0  ;;  %v8006_v23 = vpack.c.bf16 %v3315_v21, %v3311_v18 }
 0x30c   :  { %6284 = vmatpush3.bf16.msra.mxu0 %v6283_v19  ;;  %v7998_v19 = vpack.c.bf16 %v3313_v17, %v3309_v16 }
 0x30d   :  { %6285 = vmatprep.subr.bf16.mxu0 %v6774_v0  ;;  %6251 = vmatpush3.bf16.msra.mxu1 %v6250_v60  ;;  %v3310_v60 = vld [vmem:[%s8992_s7 + $0x150] sm:$0xff] }
 0x30e   :  { %6252 = vmatprep.subr.bf16.mxu1 %v6774_v0 }
 0x30f   :  { %v2999_v33 = vld [vmem:[#allocation6] sm:$0xff] }
 0x310   :  { %3075 = vst.msk [vmem:[#allocation6] sm:$0x3] %vm2439_vm5, %v3074_v28  ;;  %3077 = vst.msk [vmem:[#allocation6 + $0x2] sm:$0x3] %vm2439_vm5, %v3076_v29  ;;  %6287 = vmatpush3.bf16.msra.mxu0 %v6286_v20  ;;  %v3314_v20 = vld [vmem:[%s8992_s7 + $0x170] sm:$0xff]  ;;  %v3321_v28 = vld [vmem:[%s8992_s7 + $0x1a8] sm:$0xff] }
 0x311   :  { %3079 = vst.msk [vmem:[#allocation6 + $0x4] sm:$0x3] %vm2439_vm5, %v3078_v32  ;;  %3081 = vst.msk [vmem:[#allocation6 + $0x6] sm:$0x3] %vm2439_vm5, %v3080_v31  ;;  %6288 = vmatprep.subr.bf16.mxu0 %v6774_v0  ;;  %6254 = vmatpush3.bf16.msra.mxu1 %v6253_v34  ;;  %v8020_v26 = vpack.c.bf16 %v3314_v20, %v3310_v60  ;;  %v3319_v29 = vld [vmem:[%s8992_s7 + $0x198] sm:$0xff]  ;;  %v8034_v30 = vpack.c.bf16 %v3321_v28, %v3317_v27  ;;  %v3316_v31 = vld [vmem:[%s8992_s7 + $0x180] sm:$0xff] }
 0x312   :  { %6267 = vmatprep.subr.bf16.mxu1 %v6774_v0  ;;  %v3323_v32 = vld [vmem:[%s8992_s7 + $0x1b8] sm:$0xff]  ;;  %v5258_v20 = vld [vmem:[%s8993_s6] ss:$0 sm:$0xff] }
 0x313   :  { %v8045_v34 = vpack.c.bf16 %v3323_v32, %v3319_v29 }
 0x314   :  { %6290 = vmatpush3.bf16.msra.mxu0 %v6289_v35  ;;  %5941 = vmatmul.mubr.msk.f32.vlgmr.msra.gmra.mrb[10].mxu1 %vm2433_vm4, %v7803_v63  ;;  %v3178_v63 = vld [vmem:[%s8990_s5 + $0x228] sm:$0xff] }
 0x315   :  { %6269 = vmatpush3.bf16.msra.mxu1 %v6268_v38  ;;  %5978 = vmatprep.mubr.msk.f32.mxu1 %vm6775_vm3, %v8998_v57  ;;  %v6298_v1 = vpack.c.bf16 %v3178_v63, %v3177_v62  ;;  %v8056_v38 = vpack.c.bf16 %v3322_v37, %v3318_v36  ;;  %v3269_v36 = vld [vmem:[%s8992_s7 + $0x10] sm:$0xff] }
 0x316   :  { %6270 = vmatprep.subr.bf16.mxu1 %v6774_v0  ;;  %6304 = vmatprep.subr.bf16.mxu0 %v7962_v9  ;;  %v3273_v37 = vld [vmem:[%s8992_s7 + $0x30] sm:$0xff] }
 0x318   :  { %v3090_v44 = vld [vmem:[#allocation6] sm:$0xff] }
 0x319   :  { %5998 = vmatmul.mubr.msk.f32.vlgmr.msra.gmra.mrb[66].mxu0 %vm2433_vm4, %v3090_v44  ;;  %3166 = vst.msk [vmem:[#allocation6] sm:$0x3] %vm2439_vm5, %v3165_v40  ;;  %3168 = vst.msk [vmem:[#allocation6 + $0x2] sm:$0x3] %vm2439_vm5, %v3167_v56  ;;  %6272 = vmatpush3.bf16.msra.mxu1 %v6271_v45  ;;  %v3329_v40 = vld [vmem:[%s8992_s7 + $0x1e8] sm:$0xff]  ;;  %v3327_v56 = vld [vmem:[%s8992_s7 + $0x1d8] sm:$0xff] }
 0x31a   :  { %3170 = vst.msk [vmem:[#allocation6 + $0x4] sm:$0x3] %vm2439_vm5, %v3169_v42  ;;  %3172 = vst.msk [vmem:[#allocation6 + $0x6] sm:$0x3] %vm2439_vm5, %v3171_v43  ;;  %3399 = vmatprep.mubr.f32.mxu0 %v8998_v57  ;;  %6273 = vmatprep.subr.bf16.mxu1 %v6774_v0  ;;  %v8068_v41 = vpack.c.bf16 %v3329_v40, %v3325_v39  ;;  %v3331_v42 = vld [vmem:[%s8992_s7 + $0x1f8] sm:$0xff]  ;;  %v3324_v43 = vld [vmem:[%s8992_s7 + $0x1c0] sm:$0xff] }
 0x31b   :  { %6306 = vmatpush1.bf16.msra.mxu0 %v7975_v13  ;;  %v3328_v44 = vld [vmem:[%s8992_s7 + $0x1e0] sm:$0xff]  ;;  %v8081_v45 = vpack.c.bf16 %v3331_v42, %v3327_v56  ;;  %v3276_v39 = vld [vmem:[%s8992_s7 + $0x48] sm:$0xff]  ;;  %v3278_v56 = vld [vmem:[%s8992_s7 + $0x58] sm:$0xff] }
 0x31c   :  { %6308 = vmatprep.subr.bf16.mxu0 %v7998_v19  ;;  %v8083_v46 = vpack.c.bf16 %v3328_v44, %v3324_v43  ;;  %v3280_v40 = vld [vmem:[%s8992_s7 + $0x68] sm:$0xff]  ;;  %v3282_v42 = vld [vmem:[%s8992_s7 + $0x78] sm:$0xff]  ;;  %v8145_v44 = vpack.c.bf16 %v3273_v37, %v3269_v36  ;;  %v3623_v36 = vld [vmem:[%s8992_s7 + $0x200] sm:$0xff] }
 0x31d   :  { %6275 = vmatpush3.bf16.msra.mxu1 %v6274_v48  ;;  %v3330_v48 = vld [vmem:[%s8992_s7 + $0x1f0] sm:$0xff]  ;;  %v8158_v53 = vpack.c.bf16 %v3282_v42, %v3278_v56  ;;  %v3627_v37 = vld [vmem:[%s8992_s7 + $0x220] sm:$0xff] }
 0x31e   :  { %6276 = vmatprep.subr.bf16.mxu1 %v6774_v0  ;;  %v8095_v50 = vpack.c.bf16 %v3330_v48, %v3326_v47  ;;  %v3275_v47 = vld [vmem:[%s8992_s7 + $0x40] sm:$0xff]  ;;  %v3625_v56 = vld [vmem:[%s8992_s7 + $0x210] sm:$0xff] }
 0x31f   :  { %6310 = vmatpush1.bf16.msra.mxu0 %v8018_v25  ;;  %v3279_v48 = vld [vmem:[%s8992_s7 + $0x60] sm:$0xff]  ;;  %v3629_v42 = vld [vmem:[%s8992_s7 + $0x230] sm:$0xff] }
 0x320   :  { %6312 = vmatprep.subr.bf16.mxu0 %v8034_v30 }
 0x321   :  { %6278 = vmatpush3.bf16.msra.mxu1 %v6277_v51  ;;  %v3181_v5 = vld [vmem:[#allocation6] sm:$0xff]  ;;  %v3272_v51 = vld [vmem:[%s8992_s7 + $0x28] sm:$0xff] }
 0x322   :  { %6291 = vmatprep.subr.bf16.mxu1 %v6774_v0 }
 0x324   :  { %5979 = vmatmul.mubr.msk.f32.vlgmr.msra.gmra.mrb[12].mxu1 %vm2433_vm4, %v2999_v33  ;;  %v3320_v33 = vld [vmem:[%s8992_s7 + $0x1a0] sm:$0xff] }
 0x325   :  { %6293 = vmatpush3.bf16.msra.mxu1 %v6292_v58  ;;  %6016 = vmatprep.mubr.msk.f32.mxu1 %vm6775_vm3, %v8998_v57  ;;  %v8047_v35 = vpack.c.bf16 %v3320_v33, %v3316_v31  ;;  %v8107_v58 = vpack.c.bf16 %v3272_v51, %v3268_v49  ;;  %v3267_v31 = vld [vmem:[%s8992_s7] sm:$0xff]  ;;  %v3277_v49 = vld [vmem:[%s8992_s7 + $0x50] sm:$0xff]  ;;  %v8156_v51 = vpack.c.bf16 %v3280_v40, %v3276_v39 }
 0x326   :  { %6294 = vmatprep.subr.bf16.mxu1 %v6774_v0  ;;  %v3271_v33 = vld [vmem:[%s8992_s7 + $0x20] sm:$0xff] }
 0x327   :  { %6314 = vmatpush1.bf16.msra.mxu0 %v8047_v35  ;;  %v8143_v43 = vpack.c.bf16 %v3271_v33, %v3267_v31 }
 0x328   :  { %6316 = vmatprep.subr.bf16.mxu0 %v8068_v41 }
 0x329   :  { %6296 = vmatpush3.bf16.msra.mxu1 %v6295_v61 }
 0x32a   :  { %6297 = vmatprep.subr.bf16.mxu1 %v6774_v0 }
 0x32b   :  { %6318 = vmatpush1.bf16.msra.mxu0 %v8083_v46 }
 0x32c   :  { %6336 = vmatprep.subr.bf16.mxu0 %v8107_v58 }
 0x32d   :  { %6299 = vmatpush3.bf16.msra.mxu1 %v6298_v1 }
 0x32e   :  { %6300 = vmatprep.subr.bf16.mxu1 %v6774_v0  ;;  %v3307_v0 = vld [vmem:[%s8992_s7 + $0x138] sm:$0xff] }
 0x32f   :  { %v7973_v12 = vpack.c.bf16 %v3307_v0, %v3303_v8 }
 0x331   :  { %6302 = vmatpush3.bf16.msra.mxu1 %v6301_v4 }
 0x332   :  { %6320 = vmatprep.subr.bf16.mxu1 %v7973_v12 }
 0x334   :  { %6017 = vmatmul.mubr.msk.f32.vlgmr.msra.gmra.mrb[14].mxu1 %vm2433_vm4, %v3181_v5 }
 0x335   :  { %3470 = vmatprep.mubr.f32.mxu1 %v8998_v57  ;;  %6322 = vmatpush1.bf16.msra.mxu1 %v7984_v54 }
 0x336   :  { %6324 = vmatprep.subr.bf16.mxu1 %v8006_v23 }
 0x339   :  { %6326 = vmatpush1.bf16.msra.mxu1 %v8020_v26 }
 0x33a   :  { %6328 = vmatprep.subr.bf16.mxu1 %v8045_v34 }
 0x33d   :  { %6330 = vmatpush1.bf16.msra.mxu1 %v8056_v38 }
 0x33e   :  { %6332 = vmatprep.subr.bf16.mxu1 %v8081_v45 }
 0x341   :  { %6334 = vmatpush1.bf16.msra.mxu1 %v8095_v50 }
 0x342   :  { %6352 = vmatprep.subr.bf16.mxu1 %v8109_v59 }
 0x3b6   :  { %v2542_v52 = vpop.f32.mrb[4].mxu1 }
 0x3b7   :  { %v5866_v61 = vpop.f32.mrb[5].mxu1 }
 0x3b8   :  { %v3288_v61 = vld [vmem:[%s8992_s7 + $0xa8] sm:$0xff] }
 0x3c6   :  { %v2615_v62 = vpop.f32.mrb[6].mxu1 }
 0x3c7   :  { %v2616_v1 = vadd.f32 %v2615_v62, %v2542_v52  ;;  %v5885_v2 = vpop.f32.mrb[7].mxu1  ;;  %v3284_v52 = vld [vmem:[%s8992_s7 + $0x88] sm:$0xff] }
 0x3c8   :  { %v2796_v63 = vpop.f32.mrb[62].mxu0  ;;  %v8179_v2 = vpack.c.bf16 %v3279_v48, %v3275_v47  ;;  %v3632_v47 = vld [vmem:[%s8992_s7 + $0x248] sm:$0xff] }
 0x3c9   :  { %v5923_v3 = vpop.f32.mrb[63].mxu0  ;;  %v3636_v48 = vld [vmem:[%s8992_s7 + $0x268] sm:$0xff] }
 0x3ca   :  { %v8181_v3 = vpack.c.bf16 %v3281_v55, %v3277_v49  ;;  %v3634_v49 = vld [vmem:[%s8992_s7 + $0x258] sm:$0xff] }
 0x3cb   :  { %v3638_v55 = vld [vmem:[%s8992_s7 + $0x278] sm:$0xff] }
 0x3d6   :  { %v2705_v4 = vpop.f32.mrb[8].mxu1 }
 0x3d7   :  { %v2709_v6 = vadd.f32 %v2705_v4, %v2616_v1  ;;  %v5904_v7 = vpop.f32.mrb[9].mxu1  ;;  %v3290_v1 = vld [vmem:[%s8992_s7 + $0xb8] sm:$0xff]  ;;  %v3283_v4 = vld [vmem:[%s8992_s7 + $0x80] sm:$0xff] }
 0x3d9   :  { %v2800_v0 = vadd.f32 %v2796_v63, %v2709_v6  ;;  %v3286_v63 = vld [vmem:[%s8992_s7 + $0x98] sm:$0xff]  ;;  %v8191_v6 = vpack.c.bf16 %v3288_v61, %v3284_v52  ;;  %v8289_v52 = vpack.c.bf16 %v3627_v37, %v3623_v36  ;;  %v8291_v61 = vpack.c.bf16 %v3629_v42, %v3625_v56  ;;  %v3648_v36 = vld [vmem:[%s8992_s7 + $0x2c8] sm:$0xff] }
 0x3da   :  { %v2978_v5 = vpop.f32.mrb[64].mxu0  ;;  %v8193_v7 = vpack.c.bf16 %v3290_v1, %v3286_v63  ;;  %v3635_v63 = vld [vmem:[%s8992_s7 + $0x260] sm:$0xff]  ;;  %v3633_v1 = vld [vmem:[%s8992_s7 + $0x250] sm:$0xff]  ;;  %v3652_v37 = vld [vmem:[%s8992_s7 + $0x2e8] sm:$0xff] }
 0x3db   :  { %v5961_v8 = vpop.f32.mrb[65].mxu0  ;;  %v3650_v56 = vld [vmem:[%s8992_s7 + $0x2d8] sm:$0xff] }
 0x3dc   :  { %v3285_v8 = vld [vmem:[%s8992_s7 + $0x90] sm:$0xff]  ;;  %v3654_v42 = vld [vmem:[%s8992_s7 + $0x2f8] sm:$0xff] }
 0x3e7   :  { %v2887_v10 = vpop.f32.mrb[10].mxu1 }
 0x3e8   :  { %v2891_v14 = vadd.f32 %v2887_v10, %v2800_v0  ;;  %v5942_v15 = vpop.f32.mrb[11].mxu1  ;;  %v3289_v0 = vld [vmem:[%s8992_s7 + $0xb0] sm:$0xff]  ;;  %v3292_v10 = vld [vmem:[%s8992_s7 + $0xc8] sm:$0xff] }
 0x3e9   :  { %v3298_v15 = vld [vmem:[%s8992_s7 + $0xf8] sm:$0xff] }
 0x3ea   :  { %v2982_v17 = vadd.f32 %v2978_v5, %v2891_v14  ;;  %v3287_v5 = vld [vmem:[%s8992_s7 + $0xa0] sm:$0xff]  ;;  %v3294_v14 = vld [vmem:[%s8992_s7 + $0xd8] sm:$0xff] }
 0x3ec   :  { %v3160_v11 = vpop.f32.mrb[66].mxu0 }
 0x3ed   :  { %v5999_v16 = vpop.f32.mrb[67].mxu0 }
 0x3ee   :  { %v8217_v16 = vpack.c.bf16 %v3287_v5, %v3283_v4  ;;  %v8304_v4 = vpack.c.bf16 %v3636_v48, %v3632_v47  ;;  %v8306_v5 = vpack.c.bf16 %v3638_v55, %v3634_v49  ;;  %v3647_v49 = vld [vmem:[%s8992_s7 + $0x2c0] sm:$0xff] }
 0x3ef   :  { %v3651_v55 = vld [vmem:[%s8992_s7 + $0x2e0] sm:$0xff] }
 0x3f7   :  { %v3069_v18 = vpop.f32.mrb[12].mxu1 }
 0x3f8   :  { %v3073_v21 = vadd.f32 %v3069_v18, %v2982_v17  ;;  %v5980_v22 = vpop.f32.mrb[13].mxu1  ;;  %v8219_v17 = vpack.c.bf16 %v3289_v0, %v3285_v8  ;;  %v3291_v18 = vld [vmem:[%s8992_s7 + $0xc0] sm:$0xff]  ;;  %v3637_v8 = vld [vmem:[%s8992_s7 + $0x270] sm:$0xff]  ;;  %v3640_v0 = vld [vmem:[%s8992_s7 + $0x288] sm:$0xff] }
 0x3fa   :  { %v3164_v24 = vadd.f32 %v3160_v11, %v3073_v21  ;;  %v3296_v11 = vld [vmem:[%s8992_s7 + $0xe8] sm:$0xff]  ;;  %v3295_v21 = vld [vmem:[%s8992_s7 + $0xe0] sm:$0xff] }
 0x3fb   :  { %v8229_v22 = vpack.c.bf16 %v3296_v11, %v3292_v10  ;;  %v8253_v31 = vpack.c.bf16 %v3295_v21, %v3291_v18  ;;  %v3644_v10 = vld [vmem:[%s8992_s7 + $0x2a8] sm:$0xff]  ;;  %v8329_v21 = vpack.c.bf16 %v3637_v8, %v3633_v1  ;;  %v3649_v1 = vld [vmem:[%s8992_s7 + $0x2d0] sm:$0xff] }
 0x3fc   :  { %v3653_v8 = vld [vmem:[%s8992_s7 + $0x2f0] sm:$0xff] }
 0x407   :  { %v3251_v60 = vpop.f32.mrb[14].mxu1 }
 0x408   :  { %v3255_v27 = vadd.f32 %v3251_v60, %v3164_v24  ;;  %v6018_v28 = vpop.f32.mrb[15].mxu1  ;;  %v8231_v24 = vpack.c.bf16 %v3298_v15, %v3294_v14  ;;  %v3293_v60 = vld [vmem:[%s8992_s7 + $0xd0] sm:$0xff]  ;;  %v3642_v14 = vld [vmem:[%s8992_s7 + $0x298] sm:$0xff] }
 0x409   :  { %v3628_v28 = vld [vmem:[%s8992_s7 + $0x228] sm:$0xff]  ;;  %v3646_v15 = vld [vmem:[%s8992_s7 + $0x2b8] sm:$0xff] }
 0x40a   :  { %v3263_v29 = vadd.f32 %v5258_v20, %v3255_v27  ;;  %v3297_v20 = vld [vmem:[%s8992_s7 + $0xf0] sm:$0xff]  ;;  %v3624_v27 = vld [vmem:[%s8992_s7 + $0x208] sm:$0xff] }
 0x40b   :  { %v8255_v33 = vpack.c.bf16 %v3297_v20, %v3293_v60  ;;  %v8265_v39 = vpack.c.bf16 %v3628_v28, %v3624_v27  ;;  %v3639_v60 = vld [vmem:[%s8992_s7 + $0x280] sm:$0xff]  ;;  %v8339_v27 = vpack.c.bf16 %v3644_v10, %v3640_v0  ;;  %v8341_v28 = vpack.c.bf16 %v3646_v15, %v3642_v14  ;;  %v3806_v0 = vld [vmem:[%s8992_s7 + $0x308] sm:$0xff]  ;;  %v3812_v14 = vld [vmem:[%s8992_s7 + $0x338] sm:$0xff] }
 0x40c   :  { %v3264_v32 = vmax.f32 %v3263_v29, 0.0  ;;  %v3626_v29 = vld [vmem:[%s8992_s7 + $0x218] sm:$0xff]  ;;  %v3643_v20 = vld [vmem:[%s8992_s7 + $0x2a0] sm:$0xff]  ;;  %v3810_v10 = vld [vmem:[%s8992_s7 + $0x328] sm:$0xff]  ;;  %v8401_v15 = vpack.c.bf16 %v3651_v55, %v3647_v49 }
 0x40d   :  { %v8365_v47 = vpack.c.bf16 %v3643_v20, %v3639_v60  ;;  %v8403_v60 = vpack.c.bf16 %v3653_v8, %v3649_v1  ;;  %v3805_v20 = vld [vmem:[%s8992_s7 + $0x300] sm:$0xff]  ;;  %v3818_v49 = vld [vmem:[%s8992_s7 + $0x368] sm:$0xff]  ;;  %v3816_v55 = vld [vmem:[%s8992_s7 + $0x358] sm:$0xff] }
 0x40e   :  { %3265 = vst.msk [vmem:[#allocation4] sm:$0xff] %vm2433_vm4, %v3264_v32  ;;  %v3630_v32 = vld [vmem:[%s8992_s7 + $0x238] sm:$0xff]  ;;  %9055 = vst [vmem:[#allocation10_spill] sm:$0xff] %v8401_v15 }
 0x40f   :  { %v8267_v40 = vpack.c.bf16 %v3630_v32, %v3626_v29  ;;  %v3641_v29 = vld [vmem:[%s8992_s7 + $0x290] sm:$0xff]  ;;  %9056 = vst [vmem:[#allocation11_spill] sm:$0xff] %v8403_v60  ;;  %v3820_v1 = vld [vmem:[%s8992_s7 + $0x378] sm:$0xff] }
 0x410   :  { %v3645_v32 = vld [vmem:[%s8992_s7 + $0x2b0] sm:$0xff] }
 0x411   :  { %v8367_v48 = vpack.c.bf16 %v3645_v32, %v3641_v29  ;;  %v3809_v29 = vld [vmem:[%s8992_s7 + $0x320] sm:$0xff]  ;;  %v8413_v32 = vpack.c.bf16 %v3810_v10, %v3806_v0 }
 0x412   :  { %v8437_v8 = vpack.c.bf16 %v3809_v29, %v3805_v20  ;;  %v3813_v10 = vld [vmem:[%s8992_s7 + $0x340] sm:$0xff]  ;;  %v8454_v29 = vpack.c.bf16 %v3820_v1, %v3816_v55 }
 0x413   :  { %9057 = vst [vmem:[#allocation12_spill] sm:$0xff] %v8413_v32 }
 0x414   :  { %9059 = vst [vmem:[#allocation14_spill] sm:$0xff] %v8437_v8  ;;  %9062 = vst [vmem:[#allocation17_spill] sm:$0xff] %v8454_v29 }
 0x415   :  { %v3299_v62 = vld [vmem:[#allocation4 + $0x1] sm:$0x1]  ;;  %v3266_v11 = vld [vmem:[#allocation4] sm:$0x1] }
 0x416   :  { %5259 = vmatmul.mubr.msk.f32.vlgmr.msra.gmra.mrb[68].mxu0 %vm2433_vm4, %v3299_v62  ;;  %5260 = vmatmul.mubr.msk.f32.vlgmr.msra.gmra.mrb[16].mxu1 %vm2433_vm4, %v3299_v62  ;;  %v3631_v62 = vld [vmem:[%s8992_s7 + $0x240] sm:$0xff] }
 0x417   :  { %6338 = vmatpush1.bf16.msra.mxu0 %v8143_v43  ;;  %6354 = vmatpush1.bf16.msra.mxu1 %v8145_v44  ;;  %v8327_v18 = vpack.c.bf16 %v3635_v63, %v3631_v62  ;;  %v8377_v62 = vpack.c.bf16 %v3652_v37, %v3648_v36  ;;  %v8379_v63 = vpack.c.bf16 %v3654_v42, %v3650_v56  ;;  %v3807_v37 = vld [vmem:[%s8992_s7 + $0x310] sm:$0xff]  ;;  %v3814_v42 = vld [vmem:[%s8992_s7 + $0x348] sm:$0xff] }
 0x418   :  { %6340 = vmatprep.subr.bf16.mxu0 %v8156_v51  ;;  %6356 = vmatprep.subr.bf16.mxu1 %v8158_v53  ;;  %v3811_v56 = vld [vmem:[%s8992_s7 + $0x330] sm:$0xff]  ;;  %v8452_v20 = vpack.c.bf16 %v3818_v49, %v3814_v42  ;;  %v3824_v42 = vld [vmem:[%s8992_s7 + $0x398] sm:$0xff] }
 0x419   :  { %3544 = vmatprep.mubr.f32.mxu0 %v8998_v57  ;;  %3615 = vmatprep.mubr.f32.mxu1 %v8998_v57  ;;  %9053 = vst [vmem:[#allocation8_spill] sm:$0xff] %v8377_v62  ;;  %9054 = vst [vmem:[#allocation9_spill] sm:$0xff] %v8379_v63  ;;  %v8439_v0 = vpack.c.bf16 %v3811_v56, %v3807_v37  ;;  %v3819_v37 = vld [vmem:[%s8992_s7 + $0x370] sm:$0xff]  ;;  %v3822_v56 = vld [vmem:[%s8992_s7 + $0x388] sm:$0xff] }
 0x41a   :  { %9061 = vst [vmem:[#allocation16_spill] sm:$0xff] %v8452_v20  ;;  %v3828_v49 = vld [vmem:[%s8992_s7 + $0x3b8] sm:$0xff] }
 0x41b   :  { %6342 = vmatpush1.bf16.msra.mxu0 %v8179_v2  ;;  %6358 = vmatpush1.bf16.msra.mxu1 %v8181_v3  ;;  %9060 = vst [vmem:[#allocation15_spill] sm:$0xff] %v8439_v0 }
 0x41c   :  { %6344 = vmatprep.subr.bf16.mxu0 %v8191_v6  ;;  %6360 = vmatprep.subr.bf16.mxu1 %v8193_v7 }
 0x41f   :  { %6346 = vmatpush1.bf16.msra.mxu0 %v8217_v16  ;;  %6362 = vmatpush1.bf16.msra.mxu1 %v8219_v17 }
 0x420   :  { %6348 = vmatprep.subr.bf16.mxu0 %v8229_v22  ;;  %6364 = vmatprep.subr.bf16.mxu1 %v8231_v24 }
 0x423   :  { %6350 = vmatpush1.bf16.msra.mxu0 %v8253_v31  ;;  %6366 = vmatpush1.bf16.msra.mxu1 %v8255_v33 }
 0x424   :  { %6368 = vmatprep.subr.bf16.mxu0 %v8265_v39  ;;  %6384 = vmatprep.subr.bf16.mxu1 %v8267_v40 }
 0x426   :  { %5261 = vmatmul.mubr.msk.f32.vlgmr.msra.gmra.mrb[68].mxu0 %vm2433_vm4, %v3266_v11  ;;  %5262 = vmatmul.mubr.msk.f32.vlgmr.msra.gmra.mrb[16].mxu1 %vm2433_vm4, %v3266_v11  ;;  %v3808_v11 = vld [vmem:[%s8992_s7 + $0x318] sm:$0xff] }
 0x427   :  { %6370 = vmatpush1.bf16.msra.mxu0 %v8289_v52  ;;  %6386 = vmatpush1.bf16.msra.mxu1 %v8291_v61  ;;  %v8415_v36 = vpack.c.bf16 %v3812_v14, %v3808_v11  ;;  %v3817_v11 = vld [vmem:[%s8992_s7 + $0x360] sm:$0xff]  ;;  %v3815_v14 = vld [vmem:[%s8992_s7 + $0x350] sm:$0xff] }
 0x428   :  { %6372 = vmatprep.subr.bf16.mxu0 %v8304_v4  ;;  %6388 = vmatprep.subr.bf16.mxu1 %v8306_v5  ;;  %v8475_v55 = vpack.c.bf16 %v3817_v11, %v3813_v10  ;;  %v8477_v1 = vpack.c.bf16 %v3819_v37, %v3815_v14  ;;  %v3823_v10 = vld [vmem:[%s8992_s7 + $0x390] sm:$0xff]  ;;  %v3830_v14 = vld [vmem:[%s8992_s7 + $0x3c8] sm:$0xff] }
 0x429   :  { %3722 = vmatprep.mubr.f32.mxu0 %v8998_v57  ;;  %3793 = vmatprep.mubr.f32.mxu1 %v8998_v57  ;;  %9058 = vst [vmem:[#allocation13_spill] sm:$0xff] %v8415_v36  ;;  %v3826_v57 = vld [vmem:[%s8992_s7 + $0x3a8] sm:$0xff]  ;;  %v3827_v11 = vld [vmem:[%s8992_s7 + $0x3b0] sm:$0xff] }
 0x42a   :  { %9063 = vst [vmem:[#allocation18_spill] sm:$0xff] %v8475_v55  ;;  %9064 = vst [vmem:[#allocation19_spill] sm:$0xff] %v8477_v1  ;;  %v3834_v37 = vld [vmem:[%s8992_s7 + $0x3e8] sm:$0xff] }
 0x42b   :  { %6374 = vmatpush1.bf16.msra.mxu0 %v8327_v18  ;;  %6390 = vmatpush1.bf16.msra.mxu1 %v8329_v21 }
 0x42c   :  { %6376 = vmatprep.subr.bf16.mxu0 %v8339_v27  ;;  %6392 = vmatprep.subr.bf16.mxu1 %v8341_v28 }
 0x42f   :  { %6378 = vmatpush1.bf16.msra.mxu0 %v8365_v47  ;;  %6394 = vmatpush1.bf16.msra.mxu1 %v8367_v48 }
 0x430   :  { %6380 = vmatprep.subr.bf16.mxu0 %v8377_v62  ;;  %6396 = vmatprep.subr.bf16.mxu1 %v8379_v63 }
 0x433   :  { %6382 = vmatpush1.bf16.msra.mxu0 %v8401_v15  ;;  %6398 = vmatpush1.bf16.msra.mxu1 %v8403_v60  ;;  %v3622_v60 = vld [vmem:[#allocation4 + $0x2] sm:$0x1]  ;;  %v8525_v15 = vpack.c.bf16 %v3834_v37, %v3830_v14  ;;  %v4064_v14 = vld [vmem:[%s8994_s9 + $0x180] sm:$0xff]  ;;  %v4065_v37 = vld [vmem:[%s8994_s9 + $0x188] sm:$0xff] }
 0x434   :  { %6400 = vmatprep.subr.bf16.mxu0 %v8413_v32  ;;  %6416 = vmatprep.subr.bf16.mxu1 %v8415_v36  ;;  %v3821_v36 = vld [vmem:[%s8992_s7 + $0x380] sm:$0xff] }
 0x435   :  { %v3825_v32 = vld [vmem:[%s8992_s7 + $0x3a0] sm:$0xff]  ;;  %9070 = vst [vmem:[#allocation24_spill] sm:$0xff] %v8525_v15 }
 0x436   :  { %5263 = vmatmul.mubr.msk.f32.vlgmr.msra.gmra.mrb[68].mxu0 %vm2433_vm4, %v3622_v60  ;;  %5264 = vmatmul.mubr.msk.f32.vlgmr.msra.gmra.mrb[16].mxu1 %vm2433_vm4, %v3622_v60  ;;  %v8487_v60 = vpack.c.bf16 %v3826_v57, %v3822_v56  ;;  %v3832_v57 = vld [vmem:[%s8992_s7 + $0x3d8] sm:$0xff] }
 0x437   :  { %6402 = vmatpush1.bf16.msra.mxu0 %v8437_v8  ;;  %6418 = vmatpush1.bf16.msra.mxu1 %v8439_v0  ;;  %v8489_v8 = vpack.c.bf16 %v3828_v49, %v3824_v42  ;;  %v3836_v56 = vld [vmem:[%s8992_s7 + $0x3f8] sm:$0xff]  ;;  %v9067_v42 = vmov 0.0   ;;  %v8513_v49 = vpack.c.bf16 %v3825_v32, %v3821_v36  ;;  %v3833_v0 = vld [vmem:[%s8992_s7 + $0x3e0] sm:$0xff]  ;;  %v3831_v32 = vld [vmem:[%s8992_s7 + $0x3d0] sm:$0xff] }
 0x438   :  { %6404 = vmatprep.subr.bf16.mxu0 %v8452_v20  ;;  %6420 = vmatprep.subr.bf16.mxu1 %v8454_v29  ;;  %9065 = vst [vmem:[#allocation20_spill] sm:$0xff] %v8487_v60  ;;  %v8515_v29 = vpack.c.bf16 %v3827_v11, %v3823_v10  ;;  %v3829_v20 = vld [vmem:[%s8992_s7 + $0x3c0] sm:$0xff]  ;;  %v3835_v36 = vld [vmem:[%s8992_s7 + $0x3f0] sm:$0xff]  ;;  %v4033_v11 = vld [vmem:[%s8994_s9 + $0x88] sm:$0xff] }
 0x439   :  { %9066 = vst [vmem:[#allocation21_spill] sm:$0xff] %v8489_v8  ;;  %3904 = vmatprep.mubr.f32.mxu0 %v9067_v42  ;;  %3975 = vmatprep.mubr.f32.mxu1 %v9067_v42  ;;  %9068 = vst [vmem:[#allocation22_spill] sm:$0xff] %v8513_v49  ;;  %v4032_v10 = vld [vmem:[%s8994_s9 + $0x80] sm:$0xff] }
 0x43a   :  { %9069 = vst [vmem:[#allocation23_spill] sm:$0xff] %v8515_v29 }
 0x43b   :  { %6406 = vmatpush1.bf16.msra.mxu0 %v8475_v55  ;;  %6422 = vmatpush1.bf16.msra.mxu1 %v8477_v1  ;;  %v8527_v55 = vpack.c.bf16 %v3836_v56, %v3832_v57  ;;  %v8549_v57 = vpack.c.bf16 %v3833_v0, %v3829_v20  ;;  %v8551_v56 = vpack.c.bf16 %v3835_v36, %v3831_v32  ;;  %v4048_v0 = vld [vmem:[%s8994_s9 + $0x100] sm:$0xff]  ;;  %v4049_v20 = vld [vmem:[%s8994_s9 + $0x108] sm:$0xff]  ;;  %v4034_v32 = vld [vmem:[%s8994_s9 + $0x90] sm:$0xff] }
 0x43c   :  { %6408 = vmatprep.subr.bf16.mxu0 %v8487_v60  ;;  %6424 = vmatprep.subr.bf16.mxu1 %v8489_v8  ;;  %v4016_v8 = vld [vmem:[%s8994_s9] sm:$0xff]  ;;  %v4017_v60 = vld [vmem:[%s8994_s9 + $0x8] sm:$0xff]  ;;  %v8561_v1 = vpack.c.bf16 %v4033_v11, %v4032_v10  ;;  %v4035_v36 = vld [vmem:[%s8994_s9 + $0x98] sm:$0xff] }
 0x43d   :  { %9071 = vst [vmem:[#allocation25_spill] sm:$0xff] %v8527_v55  ;;  %9072 = vst [vmem:[#allocation26_spill] sm:$0xff] %v8549_v57  ;;  %v4066_v10 = vld [vmem:[%s8994_s9 + $0x190] sm:$0xff]  ;;  %v4067_v11 = vld [vmem:[%s8994_s9 + $0x198] sm:$0xff] }
 0x43e   :  { %9073 = vst [vmem:[#allocation27_spill] sm:$0xff] %v8551_v56  ;;  %9074 = vst [vmem:[#allocation28_spill] sm:$0xff] %v8561_v1 }
 0x43f   :  { %6410 = vmatpush1.bf16.msra.mxu0 %v8513_v49  ;;  %6426 = vmatpush1.bf16.msra.mxu1 %v8515_v29  ;;  %v8563_v49 = vpack.c.bf16 %v4065_v37, %v4064_v14  ;;  %v8585_v14 = vpack.c.bf16 %v4017_v60, %v4016_v8  ;;  %v8587_v37 = vpack.c.bf16 %v4049_v20, %v4048_v0  ;;  %v4050_v29 = vld [vmem:[%s8994_s9 + $0x110] sm:$0xff]  ;;  %v4051_v0 = vld [vmem:[%s8994_s9 + $0x118] sm:$0xff]  ;;  %v4036_v20 = vld [vmem:[%s8994_s9 + $0xa0] sm:$0xff] }
 0x440   :  { %6412 = vmatprep.subr.bf16.mxu0 %v8525_v15  ;;  %6428 = vmatprep.subr.bf16.mxu1 %v8527_v55  ;;  %v4018_v55 = vld [vmem:[%s8994_s9 + $0x10] sm:$0xff]  ;;  %v4019_v15 = vld [vmem:[%s8994_s9 + $0x18] sm:$0xff]  ;;  %v8600_v8 = vpack.c.bf16 %v4035_v36, %v4034_v32  ;;  %v8602_v60 = vpack.c.bf16 %v4067_v11, %v4066_v10  ;;  %v4068_v32 = vld [vmem:[%s8994_s9 + $0x1a0] sm:$0xff]  ;;  %v8625_v11 = vpack.c.bf16 %v4051_v0, %v4050_v29 }
 0x441   :  { %9075 = vst [vmem:[#allocation29_spill] sm:$0xff] %v8563_v49  ;;  %9076 = vst [vmem:[#allocation30_spill] sm:$0xff] %v8585_v14  ;;  %v4069_v36 = vld [vmem:[%s8994_s9 + $0x1a8] sm:$0xff]  ;;  %v8623_v10 = vpack.c.bf16 %v4019_v15, %v4018_v55  ;;  %v4052_v15 = vld [vmem:[%s8994_s9 + $0x120] sm:$0xff] }
 0x442   :  { %9077 = vst [vmem:[#allocation31_spill] sm:$0xff] %v8587_v37  ;;  %9078 = vst [vmem:[#allocation32_spill] sm:$0xff] %v8600_v8  ;;  %v4053_v29 = vld [vmem:[%s8994_s9 + $0x128] sm:$0xff]  ;;  %v4038_v55 = vld [vmem:[%s8994_s9 + $0xb0] sm:$0xff] }
 0x443   :  { %6414 = vmatpush1.bf16.msra.mxu0 %v8549_v57  ;;  %6430 = vmatpush1.bf16.msra.mxu1 %v8551_v56  ;;  %9079 = vst [vmem:[#allocation33_spill] sm:$0xff] %v8602_v60  ;;  %v4037_v56 = vld [vmem:[%s8994_s9 + $0xa8] sm:$0xff]  ;;  %v3804_v57 = vld [vmem:[#allocation4 + $0x3] sm:$0x1]  ;;  %9080 = vst [vmem:[#allocation34_spill] sm:$0xff] %v8623_v10 }
 0x444   :  { %6432 = vmatprep.subr.bf16.mxu0 %v8561_v1  ;;  %6464 = vmatprep.subr.bf16.mxu1 %v8563_v49  ;;  %9081 = vst [vmem:[#allocation35_spill] sm:$0xff] %v8625_v11  ;;  %v4020_v49 = vld [vmem:[%s8994_s9 + $0x20] sm:$0xff]  ;;  %v4021_v1 = vld [vmem:[%s8994_s9 + $0x28] sm:$0xff]  ;;  %v4039_v0 = vld [vmem:[%s8994_s9 + $0xb8] sm:$0xff] }
 0x446   :  { %5265 = vmatmul.mubr.msk.f32.vlgmr.msra.gmra.mrb[68].mxu0 %vm2433_vm4, %v3804_v57  ;;  %5266 = vmatmul.mubr.msk.f32.vlgmr.msra.gmra.mrb[16].mxu1 %vm2433_vm4, %v3804_v57  ;;  %v8635_v57 = vpack.c.bf16 %v4037_v56, %v4036_v20  ;;  %v4070_v56 = vld [vmem:[%s8994_s9 + $0x1b0] sm:$0xff]  ;;  %v4071_v20 = vld [vmem:[%s8994_s9 + $0x1b8] sm:$0xff] }
 0x447   :  { %6434 = vmatpush3.bf16.msra.mxu0 %v8585_v14  ;;  %6466 = vmatpush3.bf16.msra.mxu1 %v8587_v37  ;;  %v8637_v14 = vpack.c.bf16 %v4069_v36, %v4068_v32  ;;  %v8659_v32 = vpack.c.bf16 %v4021_v1, %v4020_v49  ;;  %v8661_v36 = vpack.c.bf16 %v4053_v29, %v4052_v15  ;;  %v4054_v1 = vld [vmem:[%s8994_s9 + $0x130] sm:$0xff]  ;;  %v4055_v49 = vld [vmem:[%s8994_s9 + $0x138] sm:$0xff]  ;;  %v4040_v15 = vld [vmem:[%s8994_s9 + $0xc0] sm:$0xff] }
 0x448   :  { %6436 = vmatprep.subr.bf16.mxu0 %v8600_v8  ;;  %6468 = vmatprep.subr.bf16.mxu1 %v8602_v60  ;;  %9082 = vst [vmem:[#allocation36_spill] sm:$0xff] %v8635_v57  ;;  %v4022_v60 = vld [vmem:[%s8994_s9 + $0x30] sm:$0xff]  ;;  %v4023_v8 = vld [vmem:[%s8994_s9 + $0x38] sm:$0xff]  ;;  %v8671_v37 = vpack.c.bf16 %v4039_v0, %v4038_v55  ;;  %v4041_v29 = vld [vmem:[%s8994_s9 + $0xc8] sm:$0xff] }
 0x449   :  { %9083 = vst [vmem:[#allocation37_spill] sm:$0xff] %v8637_v14  ;;  %9084 = vst [vmem:[#allocation38_spill] sm:$0xff] %v8659_v32  ;;  %v4072_v55 = vld [vmem:[%s8994_s9 + $0x1c0] sm:$0xff]  ;;  %v4073_v0 = vld [vmem:[%s8994_s9 + $0x1c8] sm:$0xff] }
 0x44a   :  { %9085 = vst [vmem:[#allocation39_spill] sm:$0xff] %v8661_v36  ;;  %9086 = vst [vmem:[#allocation40_spill] sm:$0xff] %v8671_v37 }
 0x44b   :  { %6438 = vmatpush3.bf16.msra.mxu0 %v8623_v10  ;;  %6470 = vmatpush3.bf16.msra.mxu1 %v8625_v11  ;;  %v8673_v10 = vpack.c.bf16 %v4071_v20, %v4070_v56  ;;  %v8695_v56 = vpack.c.bf16 %v4023_v8, %v4022_v60  ;;  %v8697_v20 = vpack.c.bf16 %v4055_v49, %v4054_v1  ;;  %v4056_v8 = vld [vmem:[%s8994_s9 + $0x140] sm:$0xff]  ;;  %v4057_v60 = vld [vmem:[%s8994_s9 + $0x148] sm:$0xff]  ;;  %v4042_v1 = vld [vmem:[%s8994_s9 + $0xd0] sm:$0xff] }
 0x44c   :  { %6440 = vmatprep.subr.bf16.mxu0 %v8635_v57  ;;  %6472 = vmatprep.subr.bf16.mxu1 %v8637_v14  ;;  %v4024_v14 = vld [vmem:[%s8994_s9 + $0x40] sm:$0xff]  ;;  %v4025_v57 = vld [vmem:[%s8994_s9 + $0x48] sm:$0xff]  ;;  %v8707_v11 = vpack.c.bf16 %v4041_v29, %v4040_v15  ;;  %v4043_v49 = vld [vmem:[%s8994_s9 + $0xd8] sm:$0xff] }
 0x44d   :  { %9087 = vst [vmem:[#allocation41_spill] sm:$0xff] %v8673_v10  ;;  %9088 = vst [vmem:[#allocation42_spill] sm:$0xff] %v8695_v56  ;;  %v4074_v15 = vld [vmem:[%s8994_s9 + $0x1d0] sm:$0xff]  ;;  %v4075_v29 = vld [vmem:[%s8994_s9 + $0x1d8] sm:$0xff] }
 0x44e   :  { %9089 = vst [vmem:[#allocation43_spill] sm:$0xff] %v8697_v20  ;;  %9090 = vst [vmem:[#allocation44_spill] sm:$0xff] %v8707_v11 }
 0x44f   :  { %6442 = vmatpush3.bf16.msra.mxu0 %v8659_v32  ;;  %6474 = vmatpush3.bf16.msra.mxu1 %v8661_v36  ;;  %v8709_v32 = vpack.c.bf16 %v4073_v0, %v4072_v55  ;;  %v8731_v55 = vpack.c.bf16 %v4025_v57, %v4024_v14  ;;  %v8733_v0 = vpack.c.bf16 %v4057_v60, %v4056_v8  ;;  %v4058_v14 = vld [vmem:[%s8994_s9 + $0x150] sm:$0xff]  ;;  %v4059_v57 = vld [vmem:[%s8994_s9 + $0x158] sm:$0xff]  ;;  %v4044_v8 = vld [vmem:[%s8994_s9 + $0xe0] sm:$0xff] }
 0x450   :  { %6444 = vmatprep.subr.bf16.mxu0 %v8671_v37  ;;  %6476 = vmatprep.subr.bf16.mxu1 %v8673_v10  ;;  %v4026_v10 = vld [vmem:[%s8994_s9 + $0x50] sm:$0xff]  ;;  %v4027_v37 = vld [vmem:[%s8994_s9 + $0x58] sm:$0xff]  ;;  %v8743_v36 = vpack.c.bf16 %v4043_v49, %v4042_v1  ;;  %v4045_v60 = vld [vmem:[%s8994_s9 + $0xe8] sm:$0xff] }
 0x451   :  { %9091 = vst [vmem:[#allocation45_spill] sm:$0xff] %v8709_v32  ;;  %9092 = vst [vmem:[#allocation46_spill] sm:$0xff] %v8731_v55  ;;  %v4076_v1 = vld [vmem:[%s8994_s9 + $0x1e0] sm:$0xff]  ;;  %v4077_v49 = vld [vmem:[%s8994_s9 + $0x1e8] sm:$0xff] }
 0x452   :  { %9093 = vst [vmem:[#allocation47_spill] sm:$0xff] %v8733_v0  ;;  %9094 = vst [vmem:[#allocation48_spill] sm:$0xff] %v8743_v36 }
 0x453   :  { %6446 = vmatpush3.bf16.msra.mxu0 %v8695_v56  ;;  %6478 = vmatpush3.bf16.msra.mxu1 %v8697_v20  ;;  %v8745_v56 = vpack.c.bf16 %v4075_v29, %v4074_v15  ;;  %v8767_v15 = vpack.c.bf16 %v4027_v37, %v4026_v10  ;;  %v8769_v29 = vpack.c.bf16 %v4059_v57, %v4058_v14  ;;  %v4060_v37 = vld [vmem:[%s8994_s9 + $0x160] sm:$0xff]  ;;  %v4061_v10 = vld [vmem:[%s8994_s9 + $0x168] sm:$0xff] }
 0x454   :  { %6448 = vmatprep.subr.bf16.mxu0 %v8707_v11  ;;  %6480 = vmatprep.subr.bf16.mxu1 %v8709_v32  ;;  %v4028_v32 = vld [vmem:[%s8994_s9 + $0x60] sm:$0xff]  ;;  %v8776_v11 = vpack.c.bf16 %v4045_v60, %v4044_v8  ;;  %v8778_v20 = vpack.c.bf16 %v4077_v49, %v4076_v1  ;;  %v8793_v57 = vpack.c.bf16 %v4061_v10, %v4060_v37  ;;  %v4046_v8 = vld [vmem:[%s8994_s9 + $0xf0] sm:$0xff]  ;;  %v4047_v60 = vld [vmem:[%s8994_s9 + $0xf8] sm:$0xff] }
 0x455   :  { %9095 = vst [vmem:[#allocation49_spill] sm:$0xff] %v8745_v56  ;;  %9096 = vst [vmem:[#allocation50_spill] sm:$0xff] %v8767_v15  ;;  %v4079_v1 = vld [vmem:[%s8994_s9 + $0x1f8] sm:$0xff]  ;;  %v4030_v49 = vld [vmem:[%s8994_s9 + $0x70] sm:$0xff] }
 0x456   :  { %9097 = vst [vmem:[#allocation51_spill] sm:$0xff] %v8769_v29  ;;  %9098 = vst [vmem:[#allocation52_spill] sm:$0xff] %v8776_v11  ;;  %v4031_v37 = vld [vmem:[%s8994_s9 + $0x78] sm:$0xff] }
 0x457   :  { %6450 = vmatpush3.bf16.msra.mxu0 %v8731_v55  ;;  %6482 = vmatpush3.bf16.msra.mxu1 %v8733_v0  ;;  %9099 = vst [vmem:[#allocation53_spill] sm:$0xff] %v8778_v20  ;;  %v4029_v0 = vld [vmem:[%s8994_s9 + $0x68] sm:$0xff]  ;;  %9101 = vst [vmem:[#allocation55_spill] sm:$0xff] %v8793_v57 }
 0x458   :  { %6452 = vmatprep.subr.bf16.mxu0 %v8743_v36  ;;  %6484 = vmatprep.subr.bf16.mxu1 %v8745_v56  ;;  %v8791_v14 = vpack.c.bf16 %v4029_v0, %v4028_v32  ;;  %v4078_v32 = vld [vmem:[%s8994_s9 + $0x1f0] sm:$0xff]  ;;  %v8808_v0 = vpack.c.bf16 %v4047_v60, %v4046_v8  ;;  %v4063_v60 = vld [vmem:[%s8994_s9 + $0x178] sm:$0xff] }
 0x459   :  { %v8819_v10 = vpack.c.bf16 %v4079_v1, %v4078_v32  ;;  %v4062_v8 = vld [vmem:[%s8994_s9 + $0x170] sm:$0xff]  ;;  %v3988_v32 = vlaneseq }
 0x45a   :  { %9100 = vst [vmem:[#allocation54_spill] sm:$0xff] %v8791_v14  ;;  %9102 = vst [vmem:[#allocation56_spill] sm:$0xff] %v8808_v0 }
 0x45b   :  { %6454 = vmatpush3.bf16.msra.mxu0 %v8767_v15  ;;  %6486 = vmatpush3.bf16.msra.mxu1 %v8769_v29  ;;  %9103 = vst [vmem:[#allocation57_spill] sm:$0xff] %v8819_v10  ;;  %v8837_v1 = vshrl.u32 %v3988_v32, 7 }
 0x45c   :  { %6456 = vmatprep.subr.bf16.mxu0 %v8776_v11  ;;  %6488 = vmatprep.subr.bf16.mxu1 %v8778_v20 }
 0x45f   :  { %6458 = vmatpush3.bf16.msra.mxu0 %v8791_v14  ;;  %6490 = vmatpush3.bf16.msra.mxu1 %v8793_v57  ;;  %v8821_v57 = vpack.c.bf16 %v4031_v37, %v4030_v49  ;;  %v8830_v14 = vpack.c.bf16 %v4063_v60, %v4062_v8  ;;  %v9051_v49 = vsub.s32 0, %v8837_v1  ;;  %v3998_v37 = vsub.s32 2, %v8837_v1  ;;  %v3986_v8 = vld [vmem:[%s8995_s8] sm:$0xf] }
 0x460   :  { %6460 = vmatprep.subr.bf16.mxu0 %v8808_v0  ;;  %6492 = vmatprep.subr.bf16.mxu1 %v8819_v10  ;;  %v3994_v60 = vsub.s32 1, %v8837_v1 }
 0x461   :  { %9104 = vst [vmem:[#allocation58_spill] sm:$0xff] %v8821_v57  ;;  %9105 = vst [vmem:[#allocation59_spill] sm:$0xff] %v8830_v14 }
 0x462   :  { %v3995_v32 = vrot.slane %v3986_v8, %v3994_v60 }
 0x463   :  { %6462 = vmatpush3.bf16.msra.mxu0 %v8821_v57  ;;  %6494 = vmatpush3.bf16.msra.mxu1 %v8830_v14  ;;  %v4002_v57 = vsub.s32 3, %v8837_v1 }
 0x464   :  { %6496 = vmatprep.subr.bf16.mxu0 %v7962_v9  ;;  %6512 = vmatprep.subr.bf16.mxu1 %v7973_v12  ;;  %v3991_v9 = vrot.slane %v3986_v8, %v9051_v49  ;;  %v3999_v12 = vrot.slane %v3986_v8, %v3998_v37 }
 0x465   :  { %v4003_v14 = vrot.slane %v3986_v8, %v4002_v57 }
 0x468   :  { %v9157_v8 = vld [vmem:[#allocation59_spill] sm:$0xff] }
 0x519   :  { %v3906_v10 = vpop.f32.mrb[68].mxu0  ;;  %v3977_v0 = vpop.f32.mrb[16].mxu1 }
 0x51a   :  { %v4008_v20 = vadd.f32 %v3991_v9, %v3906_v10  ;;  %v4010_v11 = vadd.f32 %v3999_v12, %v3977_v0  ;;  %v3908_v29 = vpop.f32.mrb[69].mxu0  ;;  %v3979_v15 = vpop.f32.mrb[17].mxu1  ;;  %v9154_v0 = vld [vmem:[#allocation56_spill] sm:$0xff]  ;;  %v9155_v10 = vld [vmem:[#allocation57_spill] sm:$0xff] }
 0x51b   :  { %v4009_v56 = vadd.f32 %v3995_v32, %v3908_v29  ;;  %v4011_v36 = vadd.f32 %v4003_v14, %v3979_v15  ;;  %v9151_v15 = vld [vmem:[#allocation53_spill] sm:$0xff]  ;;  %v9152_v29 = vld [vmem:[#allocation54_spill] sm:$0xff]  ;;  %v9153_v14 = vld [vmem:[#allocation55_spill] sm:$0xff] }
 0x51c   :  { %v4012_v49 = vmax.f32 %v4008_v20, 0.0  ;;  %v4014_v62 = vmax.f32 %v4010_v11, 0.0  ;;  %v9146_v11 = vld [vmem:[#allocation48_spill] sm:$0xff]  ;;  %v9149_v20 = vld [vmem:[#allocation51_spill] sm:$0xff] }
 0x51d   :  { %v4013_v55 = vmax.f32 %v4009_v56, 0.0  ;;  %v4015_v63 = vmax.f32 %v4011_v36, 0.0  ;;  %v9147_v36 = vld [vmem:[#allocation49_spill] sm:$0xff]  ;;  %v9148_v56 = vld [vmem:[#allocation50_spill] sm:$0xff] }
 0x51f   :  { %4145 = vmatprep.mubr.f32.mxu0 %v4013_v55  ;;  %4215 = vmatprep.mubr.f32.mxu1 %v4015_v63  ;;  %v9144_v63 = vld [vmem:[#allocation46_spill] sm:$0xff]  ;;  %v9150_v55 = vld [vmem:[#allocation52_spill] sm:$0xff] }
 0x520   :  { %4146 = vmatmul.mubr.f32.vlgmr.msra.gmra.mrb[70].mxu0 %v4012_v49  ;;  %4216 = vmatmul.mubr.f32.vlgmr.msra.gmra.mrb[18].mxu1 %v4014_v62  ;;  %v16_v62 = vstv %s8996_s10  ;;  %v9156_v49 = vld [vmem:[#allocation58_spill] sm:$0xff] }
 0x521   :  { %6498 = vmatpush1.bf16.msra.mxu0 %v7975_v13  ;;  %6514 = vmatpush1.bf16.msra.mxu1 %v7984_v54  ;;  %v4256_v13 = vld [vmem:[#allocation4 + $0x5] sm:$0x1]  ;;  %v4223_v54 = vld [vmem:[#allocation4 + $0x4] sm:$0x1]  ;;  %17 = vst [vmem:[#allocation7] sm:$0x1] %v16_v62 }
 0x522   :  { %6500 = vmatprep.subr.bf16.mxu0 %v7998_v19  ;;  %6516 = vmatprep.subr.bf16.mxu1 %v8006_v23  ;;  %v9106_v19 = vld [vmem:[#allocation8_spill] sm:$0xff]  ;;  %v9107_v23 = vld [vmem:[#allocation9_spill] sm:$0xff] }
 0x523   :  { %4356 = vmatprep.mubr.f32.mxu0 %v9067_v42  ;;  %4427 = vmatprep.mubr.f32.mxu1 %v9067_v42 }
 0x525   :  { %6502 = vmatpush1.bf16.msra.mxu0 %v8018_v25  ;;  %6518 = vmatpush1.bf16.msra.mxu1 %v8020_v26  ;;  %v9108_v25 = vld [vmem:[#allocation10_spill] sm:$0xff]  ;;  %v9109_v26 = vld [vmem:[#allocation11_spill] sm:$0xff] }
 0x526   :  { %6504 = vmatprep.subr.bf16.mxu0 %v8034_v30  ;;  %6520 = vmatprep.subr.bf16.mxu1 %v8045_v34  ;;  %v9110_v30 = vld [vmem:[#allocation12_spill] sm:$0xff]  ;;  %v9111_v34 = vld [vmem:[#allocation13_spill] sm:$0xff] }
 0x528   :  { %v4080_v32 = vld [vmem:[#allocation7] sm:$0x1] }
 0x529   :  { %6506 = vmatpush1.bf16.msra.mxu0 %v8047_v35  ;;  %6522 = vmatpush1.bf16.msra.mxu1 %v8056_v38  ;;  %v4579_v35 = vld [vmem:[#allocation4 + $0x6] sm:$0x1] }
 0x52a   :  { %6508 = vmatprep.subr.bf16.mxu0 %v8068_v41  ;;  %6524 = vmatprep.subr.bf16.mxu1 %v8081_v45  ;;  %v9112_v38 = vld [vmem:[#allocation14_spill] sm:$0xff]  ;;  %v9113_v41 = vld [vmem:[#allocation15_spill] sm:$0xff]  ;;  %v9114_v45 = vld [vmem:[#allocation16_spill] sm:$0xff] }
 0x52d   :  { %6510 = vmatpush1.bf16.msra.mxu0 %v8083_v46  ;;  %6526 = vmatpush1.bf16.msra.mxu1 %v8095_v50  ;;  %v9115_v46 = vld [vmem:[#allocation17_spill] sm:$0xff]  ;;  %v9116_v50 = vld [vmem:[#allocation18_spill] sm:$0xff] }
 0x52e   :  { %6528 = vmatprep.subr.bf16.mxu0 %v8107_v58  ;;  %6544 = vmatprep.subr.bf16.mxu1 %v8109_v59  ;;  %v9117_v58 = vld [vmem:[#allocation19_spill] sm:$0xff]  ;;  %v9118_v59 = vld [vmem:[#allocation20_spill] sm:$0xff] }
 0x530   :  { %5267 = vmatmul.mubr.msk.f32.vlgmr.msra.gmra.mrb[72].mxu0 %vm2433_vm4, %v4256_v13  ;;  %5268 = vmatmul.mubr.msk.f32.vlgmr.msra.gmra.mrb[20].mxu1 %vm2433_vm4, %v4256_v13 }
 0x531   :  { %6530 = vmatpush1.bf16.msra.mxu0 %v8143_v43  ;;  %6546 = vmatpush1.bf16.msra.mxu1 %v8145_v44  ;;  %v9119_v43 = vld [vmem:[#allocation21_spill] sm:$0xff]  ;;  %v9120_v44 = vld [vmem:[#allocation22_spill] sm:$0xff] }
 0x532   :  { %6532 = vmatprep.subr.bf16.mxu0 %v8156_v51  ;;  %6548 = vmatprep.subr.bf16.mxu1 %v8158_v53  ;;  %v9121_v51 = vld [vmem:[#allocation23_spill] sm:$0xff]  ;;  %v9122_v53 = vld [vmem:[#allocation24_spill] sm:$0xff] }
 0x533   :  { %4501 = vmatprep.mubr.f32.mxu0 %v9067_v42  ;;  %4572 = vmatprep.mubr.f32.mxu1 %v9067_v42 }
 0x535   :  { %6534 = vmatpush1.bf16.msra.mxu0 %v8179_v2  ;;  %6550 = vmatpush1.bf16.msra.mxu1 %v8181_v3  ;;  %v9123_v2 = vld [vmem:[#allocation25_spill] sm:$0xff]  ;;  %v9124_v3 = vld [vmem:[#allocation26_spill] sm:$0xff] }
 0x536   :  { %6536 = vmatprep.subr.bf16.mxu0 %v8191_v6  ;;  %6552 = vmatprep.subr.bf16.mxu1 %v8193_v7  ;;  %v9125_v6 = vld [vmem:[#allocation27_spill] sm:$0xff]  ;;  %v9126_v7 = vld [vmem:[#allocation28_spill] sm:$0xff] }
 0x539   :  { %6538 = vmatpush1.bf16.msra.mxu0 %v8217_v16  ;;  %6554 = vmatpush1.bf16.msra.mxu1 %v8219_v17  ;;  %v9127_v16 = vld [vmem:[#allocation29_spill] sm:$0xff]  ;;  %v4761_v17 = vld [vmem:[#allocation4 + $0x7] sm:$0x1] }
 0x53a   :  { %6540 = vmatprep.subr.bf16.mxu0 %v8229_v22  ;;  %6556 = vmatprep.subr.bf16.mxu1 %v8231_v24  ;;  %v9128_v22 = vld [vmem:[#allocation30_spill] sm:$0xff]  ;;  %v9129_v24 = vld [vmem:[#allocation31_spill] sm:$0xff] }
 0x53d   :  { %6542 = vmatpush1.bf16.msra.mxu0 %v8253_v31  ;;  %6558 = vmatpush1.bf16.msra.mxu1 %v8255_v33  ;;  %v9130_v31 = vld [vmem:[#allocation32_spill] sm:$0xff]  ;;  %v9131_v33 = vld [vmem:[#allocation33_spill] sm:$0xff] }
 0x53e   :  { %6560 = vmatprep.subr.bf16.mxu0 %v8265_v39  ;;  %6576 = vmatprep.subr.bf16.mxu1 %v8267_v40  ;;  %v9132_v39 = vld [vmem:[#allocation34_spill] sm:$0xff]  ;;  %v9133_v40 = vld [vmem:[#allocation35_spill] sm:$0xff] }
 0x540   :  { %5269 = vmatmul.mubr.msk.f32.vlgmr.msra.gmra.mrb[72].mxu0 %vm2433_vm4, %v4223_v54  ;;  %5270 = vmatmul.mubr.msk.f32.vlgmr.msra.gmra.mrb[20].mxu1 %vm2433_vm4, %v4223_v54 }
 0x541   :  { %6562 = vmatpush1.bf16.msra.mxu0 %v8289_v52  ;;  %6578 = vmatpush1.bf16.msra.mxu1 %v8291_v61  ;;  %v9134_v52 = vld [vmem:[#allocation36_spill] sm:$0xff]  ;;  %v9135_v61 = vld [vmem:[#allocation37_spill] sm:$0xff] }
 0x542   :  { %6564 = vmatprep.subr.bf16.mxu0 %v8304_v4  ;;  %6580 = vmatprep.subr.bf16.mxu1 %v8306_v5  ;;  %v9136_v4 = vld [vmem:[#allocation38_spill] sm:$0xff]  ;;  %v9137_v5 = vld [vmem:[#allocation39_spill] sm:$0xff] }
 0x543   :  { %4679 = vmatprep.mubr.f32.mxu0 %v9067_v42  ;;  %4750 = vmatprep.mubr.f32.mxu1 %v9067_v42 }
 0x545   :  { %6566 = vmatpush1.bf16.msra.mxu0 %v8327_v18  ;;  %6582 = vmatpush1.bf16.msra.mxu1 %v8329_v21  ;;  %v9138_v18 = vld [vmem:[#allocation40_spill] sm:$0xff]  ;;  %v9139_v21 = vld [vmem:[#allocation41_spill] sm:$0xff] }
 0x546   :  { %6568 = vmatprep.subr.bf16.mxu0 %v8339_v27  ;;  %6584 = vmatprep.subr.bf16.mxu1 %v8341_v28  ;;  %v9140_v27 = vld [vmem:[#allocation42_spill] sm:$0xff]  ;;  %v9141_v28 = vld [vmem:[#allocation43_spill] sm:$0xff] }
 0x549   :  { %6570 = vmatpush1.bf16.msra.mxu0 %v8365_v47  ;;  %6586 = vmatpush1.bf16.msra.mxu1 %v8367_v48  ;;  %v9142_v47 = vld [vmem:[#allocation44_spill] sm:$0xff]  ;;  %v9143_v48 = vld [vmem:[#allocation45_spill] sm:$0xff] }
 0x54a   :  { %6572 = vmatprep.subr.bf16.mxu0 %v9106_v19  ;;  %6588 = vmatprep.subr.bf16.mxu1 %v9107_v23 }
 0x54d   :  { %6574 = vmatpush1.bf16.msra.mxu0 %v9108_v25  ;;  %6590 = vmatpush1.bf16.msra.mxu1 %v9109_v26 }
 0x54e   :  { %6592 = vmatprep.subr.bf16.mxu0 %v9110_v30  ;;  %6608 = vmatprep.subr.bf16.mxu1 %v9111_v34  ;;  %v4943_v30 = vld [vmem:[%s8995_s8] sm:$0xf]  ;;  %v9158_v34 = vsub.s32 0, %v8837_v1  ;;  %v5037_v1 = vld [vmem:[#allocation7] sm:$0x1] }
 0x550   :  { %5271 = vmatmul.mubr.msk.f32.vlgmr.msra.gmra.mrb[72].mxu0 %vm2433_vm4, %v4579_v35  ;;  %5272 = vmatmul.mubr.msk.f32.vlgmr.msra.gmra.mrb[20].mxu1 %vm2433_vm4, %v4579_v35  ;;  %v4948_v35 = vrot.slane %v4943_v30, %v9158_v34 }
 0x551   :  { %6594 = vmatpush1.bf16.msra.mxu0 %v9112_v38  ;;  %6610 = vmatpush1.bf16.msra.mxu1 %v9113_v41  ;;  %v4956_v38 = vrot.slane %v4943_v30, %v3998_v37  ;;  %v4952_v41 = vrot.slane %v4943_v30, %v3994_v60 }
 0x552   :  { %6596 = vmatprep.subr.bf16.mxu0 %v9114_v45  ;;  %6612 = vmatprep.subr.bf16.mxu1 %v9115_v46  ;;  %v4960_v45 = vrot.slane %v4943_v30, %v4002_v57 }
 0x553   :  { %4861 = vmatprep.mubr.f32.mxu0 %v9067_v42  ;;  %4932 = vmatprep.mubr.f32.mxu1 %v9067_v42  ;;  %v9145_v42 = vld [vmem:[#allocation47_spill] sm:$0xff] }
 0x555   :  { %6598 = vmatpush1.bf16.msra.mxu0 %v9116_v50  ;;  %6614 = vmatpush1.bf16.msra.mxu1 %v9117_v58 }
 0x556   :  { %6600 = vmatprep.subr.bf16.mxu0 %v9118_v59  ;;  %6616 = vmatprep.subr.bf16.mxu1 %v9119_v43 }
 0x559   :  { %6602 = vmatpush1.bf16.msra.mxu0 %v9120_v44  ;;  %6618 = vmatpush1.bf16.msra.mxu1 %v9121_v51 }
 0x55a   :  { %6604 = vmatprep.subr.bf16.mxu0 %v9122_v53  ;;  %6620 = vmatprep.subr.bf16.mxu1 %v9123_v2 }
 0x55d   :  { %6606 = vmatpush1.bf16.msra.mxu0 %v9124_v3  ;;  %6622 = vmatpush1.bf16.msra.mxu1 %v9125_v6 }
 0x55e   :  { %6624 = vmatprep.subr.bf16.mxu0 %v9126_v7  ;;  %6656 = vmatprep.subr.bf16.mxu1 %v9127_v16 }
 0x560   :  { %5273 = vmatmul.mubr.msk.f32.vlgmr.msra.gmra.mrb[72].mxu0 %vm2433_vm4, %v4761_v17  ;;  %5274 = vmatmul.mubr.msk.f32.vlgmr.msra.gmra.mrb[20].mxu1 %vm2433_vm4, %v4761_v17 }
 0x561   :  { %6626 = vmatpush3.bf16.msra.mxu0 %v9128_v22  ;;  %6658 = vmatpush3.bf16.msra.mxu1 %v9129_v24 }
 0x562   :  { %6628 = vmatprep.subr.bf16.mxu0 %v9130_v31  ;;  %6660 = vmatprep.subr.bf16.mxu1 %v9131_v33 }
 0x565   :  { %6630 = vmatpush3.bf16.msra.mxu0 %v9132_v39  ;;  %6662 = vmatpush3.bf16.msra.mxu1 %v9133_v40 }
 0x566   :  { %6632 = vmatprep.subr.bf16.mxu0 %v9134_v52  ;;  %6664 = vmatprep.subr.bf16.mxu1 %v9135_v61 }
 0x569   :  { %6634 = vmatpush3.bf16.msra.mxu0 %v9136_v4  ;;  %6666 = vmatpush3.bf16.msra.mxu1 %v9137_v5 }
 0x56a   :  { %6636 = vmatprep.subr.bf16.mxu0 %v9138_v18  ;;  %6668 = vmatprep.subr.bf16.mxu1 %v9139_v21 }
 0x56d   :  { %6638 = vmatpush3.bf16.msra.mxu0 %v9140_v27  ;;  %6670 = vmatpush3.bf16.msra.mxu1 %v9141_v28 }
 0x56e   :  { %6640 = vmatprep.subr.bf16.mxu0 %v9142_v47  ;;  %6672 = vmatprep.subr.bf16.mxu1 %v9143_v48 }
 0x571   :  { %6642 = vmatpush3.bf16.msra.mxu0 %v9144_v63  ;;  %6674 = vmatpush3.bf16.msra.mxu1 %v9145_v42 }
 0x572   :  { %6644 = vmatprep.subr.bf16.mxu0 %v9146_v11  ;;  %6676 = vmatprep.subr.bf16.mxu1 %v9147_v36 }
 0x575   :  { %6646 = vmatpush3.bf16.msra.mxu0 %v9148_v56  ;;  %6678 = vmatpush3.bf16.msra.mxu1 %v9149_v20 }
 0x576   :  { %6648 = vmatprep.subr.bf16.mxu0 %v9150_v55  ;;  %6680 = vmatprep.subr.bf16.mxu1 %v9151_v15 }
 0x579   :  { %6650 = vmatpush3.bf16.msra.mxu0 %v9152_v29  ;;  %6682 = vmatpush3.bf16.msra.mxu1 %v9153_v14 }
 0x57a   :  { %6652 = vmatprep.subr.bf16.mxu0 %v9154_v0  ;;  %6684 = vmatprep.subr.bf16.mxu1 %v9155_v10 }
 0x57d   :  { %6654 = vmatpush3.bf16.msra.mxu0 %v9156_v49  ;;  %6686 = vmatpush3.bf16.msra.mxu1 %v9157_v8 }
 0x5f3   :  { %v5516_v9 = vpop.f32.mrb[70].mxu0  ;;  %v5551_v12 = vpop.f32.mrb[18].mxu1 }
 0x5f4   :  { %v5517_v13 = vpop.f32.mrb[71].mxu0  ;;  %v5552_v54 = vpop.f32.mrb[19].mxu1 }
 0x5f5   :  { %v5518_v19 = vadd.f32 %v5517_v13, %v5516_v9  ;;  %v5553_v23 = vadd.f32 %v5552_v54, %v5551_v12 }
 0x5f7   :  { %v4148_v25 = vadd.f32 %v5518_v19, %v4080_v32 }
 0x5f9   :  { %v4218_v26 = vadd.f32 %v5553_v23, %v4148_v25 }
 0x5fb   :  { %4222 = vst.msk [vmem:[%s8997_s11] sm:$0x1] %vm4221_vm6, %v4218_v26 }
 0x633   :  { %v4863_v46 = vpop.f32.mrb[72].mxu0  ;;  %v4934_v50 = vpop.f32.mrb[20].mxu1 }
 0x634   :  { %v4965_v58 = vadd.f32 %v4948_v35, %v4863_v46  ;;  %v4967_v59 = vadd.f32 %v4956_v38, %v4934_v50  ;;  %v4865_v43 = vpop.f32.mrb[73].mxu0  ;;  %v4936_v44 = vpop.f32.mrb[21].mxu1 }
 0x635   :  { %v4966_v51 = vadd.f32 %v4952_v41, %v4865_v43  ;;  %v4968_v53 = vadd.f32 %v4960_v45, %v4936_v44 }
 0x636   :  { %v4969_v6 = vmax.f32 %v4965_v58, 0.0  ;;  %v4971_v7 = vmax.f32 %v4967_v59, 0.0 }
 0x637   :  { %v4970_v2 = vmax.f32 %v4966_v51, 0.0  ;;  %v4972_v3 = vmax.f32 %v4968_v53, 0.0 }
 0x639   :  { %5102 = vmatprep.mubr.f32.mxu0 %v4970_v2  ;;  %5172 = vmatprep.mubr.f32.mxu1 %v4972_v3 }
 0x63a   :  { %5103 = vmatmul.mubr.f32.vlgmr.msra.gmra.mrb[74].mxu0 %v4969_v6  ;;  %5173 = vmatmul.mubr.f32.vlgmr.msra.gmra.mrb[22].mxu1 %v4971_v7 }
 0x70d   :  { %v5586_v37 = vpop.f32.mrb[74].mxu0  ;;  %v5621_v60 = vpop.f32.mrb[22].mxu1 }
 0x70e   :  { %v5587_v57 = vpop.f32.mrb[75].mxu0  ;;  %v5622_v16 = vpop.f32.mrb[23].mxu1 }
 0x70f   :  { %v5588_v17 = vadd.f32 %v5587_v57, %v5586_v37  ;;  %v5623_v22 = vadd.f32 %v5622_v16, %v5621_v60 }
 0x711   :  { %v5105_v24 = vadd.f32 %v5588_v17, %v5037_v1 }
 0x713   :  { %v5175_v31 = vadd.f32 %v5623_v22, %v5105_v24 }
 0x715   :  { %5178 = vst.msk [vmem:[%s8997_s11 + $0x1] sm:$0x1] %vm4221_vm6, %v5175_v31 }

</bundles_post_ra>
